<compile_context>
chip_gen: v7x
topology: tpu7x:2x2x1
jax: 0.10.0
libtpu: 0.0.40
codegen_flags: <defaults>
</compile_context>

<pallas_src>
import math

import numpy as np
import jax
import jax.numpy as jnp
from jax.experimental import pallas as pl
from jax.experimental.pallas import tpu as pltpu

CFG = {
    "block_size": 206,
    "rna_model_dim": 192,
    "rna_model_num_heads": 6,
    "rna_model_num_encoder_layers": 12,
    "rna_model_ffn_multiplier": 4,
}

D = CFG["rna_model_dim"]                        # 192
H = CFG["rna_model_num_heads"]                  # 6
HD = D // H                                     # 32
FF = D * CFG["rna_model_ffn_multiplier"]        # 768
NLAYERS = CFG["rna_model_num_encoder_layers"]   # 12
LN_EPS = 1e-5
POS_M = 10000.0
ATTN_SCALE = 1.0 / math.sqrt(HD)


def _gelu(x):
    # TODO(synk): nn.GELU() defaults to exact erf-GELU; the tanh approximation
    # is used here (and in the in-script reference) for robust Mosaic lowering.
    c = math.sqrt(2.0 / math.pi)
    return 0.5 * x * (1.0 + jnp.tanh(c * (x + 0.044715 * x * x * x)))


def _layernorm(x, g, b):
    mu = jnp.mean(x, axis=-1, keepdims=True)
    xc = x - mu
    var = jnp.mean(xc * xc, axis=-1, keepdims=True)
    return xc * jax.lax.rsqrt(var + LN_EPS) * g + b


# --------------------------------------------------------------------------
# Fused encoder kernel: one grid step == one (batch, layer) pair.
# The output block (1, L, D) is the residual stream, resident in VMEM across
# the layer axis (same block index for every layer -> accumulator pattern).
# --------------------------------------------------------------------------
def _encoder_kernel(x_ref, pos_ref, bias_ref, pmask_ref,
                    ln1g_ref, ln1b_ref, wqkv_ref, bqkv_ref,
                    wout_ref, bout_ref, ln2g_ref, ln2b_ref,
                    wff1_ref, bff1_ref, wff2_ref, bff2_ref,
                    o_ref):
    layer = pl.program_id(1)

    @pl.when(layer == 0)
    def _():
        # fused `x + SinusoidalPosEmb(arange(L))`
        o_ref[0] = x_ref[0] + pos_ref[0]

    x = o_ref[0]                                   # (L, D) residual stream
    bias = bias_ref[0]                             # (1, L) additive key-pad bias

    # ---- self-attention block (pre-LN) ----
    xn = _layernorm(x, ln1g_ref[0], ln1b_ref[0])
    qkv = jnp.dot(xn, wqkv_ref[0],
                  preferred_element_type=jnp.float32) + bqkv_ref[0]   # (L, 3D)

    # per-head attention, accumulated straight into the output projection
    acc = x + bout_ref[0]
    for h in range(H):
        q = qkv[:, h * HD:(h + 1) * HD]                               # (L, HD)
        k = qkv[:, D + h * HD:D + (h + 1) * HD]
        v = qkv[:, 2 * D + h * HD:2 * D + (h + 1) * HD]
        s = jax.lax.dot_general(q, k, (((1,), (1,)), ((), ())),
                                preferred_element_type=jnp.float32)   # (L, L)
        s = s * ATTN_SCALE + bias
        m = jnp.max(s, axis=-1, keepdims=True)
        p = jnp.exp(s - m)
        o_h = jnp.dot(p, v, preferred_element_type=jnp.float32)
        o_h = o_h / jnp.sum(p, axis=-1, keepdims=True)                # (L, HD)
        acc = acc + jnp.dot(o_h, wout_ref[0, h * HD:(h + 1) * HD, :],
                            preferred_element_type=jnp.float32)       # (L, D)
    x = acc                                        # x + out_proj(mha(LN1(x)))

    # ---- feed-forward block (pre-LN): bias + GELU + residual fused ----
    xn2 = _layernorm(x, ln2g_ref[0], ln2b_ref[0])
    hid = _gelu(jnp.dot(xn2, wff1_ref[0],
                        preferred_element_type=jnp.float32) + bff1_ref[0])
    x = x + jnp.dot(hid, wff2_ref[0],
                    preferred_element_type=jnp.float32) + bff2_ref[0]
    o_ref[0] = x

    @pl.when(layer == NLAYERS - 1)
    def _():
        # num_lstm_layers == 0: pack_padded/pad_packed round trip only zeroes
        # the padded positions.
        o_ref[0] = o_ref[0] * pmask_ref[0]


@jax.jit
def _encoder_call(x, pos, attn_bias, pad_mask, p):
    B_, L_, D_ = x.shape

    def bmap(b, l):  # per-batch blocks, resident across the layer axis
        return (b, 0, 0)

    def zmap(b, l):  # broadcast blocks (fetched once)
        return (0, 0, 0)

    def lmap(b, l):  # per-layer weight blocks (streamed / double-buffered)
        return (l, 0, 0)

    in_specs = [
        pl.BlockSpec((1, L_, D_), bmap),           # x
        pl.BlockSpec((1, L_, D_), zmap),           # pos table
        pl.BlockSpec((1, 1, L_), bmap),            # additive key-padding bias
        pl.BlockSpec((1, L_, 1), bmap),            # multiplicative pad mask
        pl.BlockSpec((1, 1, D_), lmap),            # ln1_g
        pl.BlockSpec((1, 1, D_), lmap),            # ln1_b
        pl.BlockSpec((1, D_, 3 * D_), lmap),       # w_qkv
        pl.BlockSpec((1, 1, 3 * D_), lmap),        # b_qkv
        pl.BlockSpec((1, D_, D_), lmap),           # w_out
        pl.BlockSpec((1, 1, D_), lmap),            # b_out
        pl.BlockSpec((1, 1, D_), lmap),            # ln2_g
        pl.BlockSpec((1, 1, D_), lmap),            # ln2_b
        pl.BlockSpec((1, D_, FF), lmap),           # w_ff1
        pl.BlockSpec((1, 1, FF), lmap),            # b_ff1
        pl.BlockSpec((1, FF, D_), lmap),           # w_ff2
        pl.BlockSpec((1, 1, D_), lmap),            # b_ff2
    ]
    return pl.pallas_call(
        _encoder_kernel,
        out_shape=jax.ShapeDtypeStruct((B_, L_, D_), jnp.float32),
        grid=(B_, NLAYERS),
        in_specs=in_specs,
        out_specs=pl.BlockSpec((1, L_, D_), bmap),
        compiler_params=pltpu.CompilerParams(
            dimension_semantics=("parallel", "arbitrary"),
            vmem_limit_bytes=32 * 1024 * 1024),
    )(x, pos, attn_bias, pad_mask,
      p["ln1_g"], p["ln1_b"], p["w_qkv"], p["b_qkv"],
      p["w_out"], p["b_out"], p["ln2_g"], p["ln2_b"],
      p["w_ff1"], p["b_ff1"], p["w_ff2"], p["b_ff2"])


def rna_encoder_forward(params, x, mask):
    """Eval-mode RNAEncoder.forward.  x: (B, N, D) f32, mask: (B, N) bool."""
    lmax = int(jnp.max(jnp.sum(mask.astype(jnp.int32), axis=-1)))   # concrete int
    x = x[:, :lmax].astype(jnp.float32)
    cm = mask[:, :lmax]

    # Sinusoidal positional table baked on the host at trace time (tiny,
    # lane-dense, DMA'd into VMEM once and reused for every grid step).
    half = D // 2
    freqs = np.exp(np.arange(half, dtype=np.float64) * -(math.log(POS_M) / half))
    ang = np.arange(lmax, dtype=np.float64)[:, None] * freqs[None, :]
    pos = jnp.asarray(
        np.concatenate([np.sin(ang), np.cos(ang)], axis=-1).astype(np.float32))[None]

    # key_padding_mask = ~clipped_mask (True = ignore) -> additive bias.
    attn_bias = jnp.where(jnp.logical_not(cm), -1e9, 0.0).astype(jnp.float32)[:, None, :]
    pad_mask = cm.astype(jnp.float32)[:, :, None]
    # first_dropout / mha_dropout / FFN dropouts: identity in eval mode.
    return _encoder_call(x, pos, attn_bias, pad_mask, params)


# --------------------------------------------------------------------------
# Parameters (stacked over layers) + pure-jnp reference
# --------------------------------------------------------------------------
def init_params(key):
    ks = jax.random.split(key, 8)

    def n(k, shape, s):
        return s * jax.random.normal(k, shape, jnp.float32)

    return {
        "ln1_g": jnp.ones((NLAYERS, 1, D), jnp.float32),
        "ln1_b": jnp.zeros((NLAYERS, 1, D), jnp.float32),
        "w_qkv": n(ks[0], (NLAYERS, D, 3 * D), 0.05),
        "b_qkv": n(ks[1], (NLAYERS, 1, 3 * D), 0.01),
        "w_out": n(ks[2], (NLAYERS, D, D), 0.05),
        "b_out": n(ks[3], (NLAYERS, 1, D), 0.01),
        "ln2_g": jnp.ones((NLAYERS, 1, D), jnp.float32),
        "ln2_b": jnp.zeros((NLAYERS, 1, D), jnp.float32),
        "w_ff1": n(ks[4], (NLAYERS, D, FF), 0.05),
        "b_ff1": n(ks[5], (NLAYERS, 1, FF), 0.01),
        "w_ff2": n(ks[6], (NLAYERS, FF, D), 0.05),
        "b_ff2": n(ks[7], (NLAYERS, 1, D), 0.01),
    }


def reference_forward(params, x, mask):
    """Pure-jnp reference of the same eval-mode forward pass."""
    hi = jax.lax.Precision.HIGHEST
    lmax = int(jnp.max(jnp.sum(mask.astype(jnp.int32), axis=-1)))
    x = x[:, :lmax].astype(jnp.float32)
    cm = mask[:, :lmax]
    B_, L_, D_ = x.shape
    half = D_ // 2
    freqs = jnp.exp(jnp.arange(half, dtype=jnp.float32) * -(math.log(POS_M) / half))
    ang = jnp.arange(L_, dtype=jnp.float32)[:, None] * freqs[None, :]
    x = x + jnp.concatenate([jnp.sin(ang), jnp.cos(ang)], axis=-1)[None]

    bias = jnp.where(~cm, -1e9, 0.0).astype(jnp.float32)[:, None, None, :]
    for li in range(NLAYERS):
        xn = _layernorm(x, params["ln1_g"][li], params["ln1_b"][li])
        qkv = jnp.matmul(xn, params["w_qkv"][li], precision=hi) + params["b_qkv"][li]
        qkv = qkv.reshape(B_, L_, 3, H, HD)
        q = jnp.transpose(qkv[:, :, 0], (0, 2, 1, 3))
        k = jnp.transpose(qkv[:, :, 1], (0, 2, 1, 3))
        v = jnp.transpose(qkv[:, :, 2], (0, 2, 1, 3))
        s = jnp.einsum("bhqd,bhkd->bhqk", q, k, precision=hi) * ATTN_SCALE + bias
        m = jnp.max(s, axis=-1, keepdims=True)
        pexp = jnp.exp(s - m)
        attn = jnp.einsum("bhqk,bhkd->bhqd", pexp, v, precision=hi)
        attn = attn / jnp.sum(pexp, axis=-1, keepdims=True)
        attn = jnp.transpose(attn, (0, 2, 1, 3)).reshape(B_, L_, D_)
        x = x + jnp.matmul(attn, params["w_out"][li], precision=hi) + params["b_out"][li]
        xn2 = _layernorm(x, params["ln2_g"][li], params["ln2_b"][li])
        hid = _gelu(jnp.matmul(xn2, params["w_ff1"][li], precision=hi)
                    + params["b_ff1"][li])
        x = x + jnp.matmul(hid, params["w_ff2"][li], precision=hi) + params["b_ff2"][li]
    return x * cm.astype(jnp.float32)[:, :, None]


if __name__ == "__main__":
    root = jax.random.PRNGKey(0)
    kx, kp = jax.random.split(root)

    B, N = 2, 24
    seq_lengths = (20, 16)
    mask = jnp.zeros((B, N), dtype=bool)
    for b, ln in enumerate(seq_lengths):
        mask = mask.at[b, :ln].set(True)
    x = 0.1 * jax.random.normal(kx, (B, N, D), dtype=jnp.float32)

    params = init_params(kp)

    out = jax.block_until_ready(rna_encoder_forward(params, x, mask))
    ref = reference_forward(params, x, mask)

    assert out.shape == (B, max(seq_lengths), D), out.shape
    err = float(jnp.max(jnp.abs(out - ref)))
    assert jnp.allclose(out, ref, atol=5e-3, rtol=5e-3), f"max abs err = {err}"
    print("KERNEL_OK")
</pallas_src>

<mosaic_0001>
module attributes {stable_mosaic.version = 11 : i64} {
  func.func @_encoder_kernel(%arg0: i32, %arg1: i32, %arg2: memref<1x20x192xf32, #tpu.memory_space<vmem>>, %arg3: memref<1x20x192xf32, #tpu.memory_space<vmem>>, %arg4: memref<1x1x20xf32, #tpu.memory_space<vmem>>, %arg5: memref<1x20x1xf32, #tpu.memory_space<vmem>>, %arg6: memref<1x1x192xf32, #tpu.memory_space<vmem>>, %arg7: memref<1x1x192xf32, #tpu.memory_space<vmem>>, %arg8: memref<1x192x576xf32, #tpu.memory_space<vmem>>, %arg9: memref<1x1x576xf32, #tpu.memory_space<vmem>>, %arg10: memref<1x192x192xf32, #tpu.memory_space<vmem>>, %arg11: memref<1x1x192xf32, #tpu.memory_space<vmem>>, %arg12: memref<1x1x192xf32, #tpu.memory_space<vmem>>, %arg13: memref<1x1x192xf32, #tpu.memory_space<vmem>>, %arg14: memref<1x192x768xf32, #tpu.memory_space<vmem>>, %arg15: memref<1x1x768xf32, #tpu.memory_space<vmem>>, %arg16: memref<1x768x192xf32, #tpu.memory_space<vmem>>, %arg17: memref<1x1x192xf32, #tpu.memory_space<vmem>>, %arg18: memref<1x20x192xf32, #tpu.memory_space<vmem>>) attributes {dimension_semantics = [#tpu.dimension_semantics<parallel>, #tpu.dimension_semantics<arbitrary>], iteration_bounds = array<i64: 2, 12>, scalar_prefetch = 0 : i64, scratch_operands = 0 : i64, tpu.core_type = #tpu.core_type<tc>, window_params = [{transform_indices = @transform_0, window_bounds = array<i64: 1, 20, 192>}, {pipeline_mode = #tpu.pipeline_mode<synchronous>, transform_indices = @transform_1, window_bounds = array<i64: 1, 20, 192>}, {transform_indices = @transform_2, window_bounds = array<i64: 1, 1, 20>}, {transform_indices = @transform_3, window_bounds = array<i64: 1, 20, 1>}, {transform_indices = @transform_4, window_bounds = array<i64: 1, 1, 192>}, {transform_indices = @transform_5, window_bounds = array<i64: 1, 1, 192>}, {transform_indices = @transform_6, window_bounds = array<i64: 1, 192, 576>}, {transform_indices = @transform_7, window_bounds = array<i64: 1, 1, 576>}, {transform_indices = @transform_8, window_bounds = array<i64: 1, 192, 192>}, {transform_indices = @transform_9, window_bounds = array<i64: 1, 1, 192>}, {transform_indices = @transform_10, window_bounds = array<i64: 1, 1, 192>}, {transform_indices = @transform_11, window_bounds = array<i64: 1, 1, 192>}, {transform_indices = @transform_12, window_bounds = array<i64: 1, 192, 768>}, {transform_indices = @transform_13, window_bounds = array<i64: 1, 1, 768>}, {transform_indices = @transform_14, window_bounds = array<i64: 1, 768, 192>}, {transform_indices = @transform_15, window_bounds = array<i64: 1, 1, 192>}, {transform_indices = @transform_16, window_bounds = array<i64: 1, 20, 192>}]} {
    %c0_i32 = arith.constant 0 : i32
    %0 = arith.cmpi eq, %arg1, %c0_i32 : i32
    %1 = arith.extui %0 : i1 to i32
    %c0_i32_0 = arith.constant 0 : i32
    %2 = arith.cmpi ne, %1, %c0_i32_0 : i32
    scf.if %2 {
      %c0_108 = arith.constant 0 : index
      %c0_109 = arith.constant 0 : index
      %c0_110 = arith.constant 0 : index
      %232 = vector.load %arg2[%c0_108, %c0_109, %c0_110] : memref<1x20x192xf32, #tpu.memory_space<vmem>>, vector<1x20x192xf32>
      %233 = vector.shape_cast %232 : vector<1x20x192xf32> to vector<20x192xf32>
      %c0_111 = arith.constant 0 : index
      %c0_112 = arith.constant 0 : index
      %c0_113 = arith.constant 0 : index
      %234 = vector.load %arg3[%c0_111, %c0_112, %c0_113] : memref<1x20x192xf32, #tpu.memory_space<vmem>>, vector<1x20x192xf32>
      %235 = vector.shape_cast %234 : vector<1x20x192xf32> to vector<20x192xf32>
      %236 = arith.addf %233, %235 : vector<20x192xf32>
      %c0_114 = arith.constant 0 : index
      %c0_115 = arith.constant 0 : index
      %c0_116 = arith.constant 0 : index
      %237 = vector.load %arg18[%c0_114, %c0_115, %c0_116] : memref<1x20x192xf32, #tpu.memory_space<vmem>>, vector<1x20x192xf32>
      %238 = vector.shape_cast %237 : vector<1x20x192xf32> to vector<20x192xf32>
      %239 = vector.shape_cast %236 : vector<20x192xf32> to vector<1x20x192xf32>
      tpu.vector_store %arg18[%c0_114, %c0_115, %c0_116], %239 {strides = array<i32>} : memref<1x20x192xf32, #tpu.memory_space<vmem>>, vector<1x20x192xf32>,
    } else {
    }
    %c0 = arith.constant 0 : index
    %c0_1 = arith.constant 0 : index
    %c0_2 = arith.constant 0 : index
    %3 = vector.load %arg18[%c0, %c0_1, %c0_2] : memref<1x20x192xf32, #tpu.memory_space<vmem>>, vector<1x20x192xf32>
    %4 = vector.shape_cast %3 : vector<1x20x192xf32> to vector<20x192xf32>
    %c0_3 = arith.constant 0 : index
    %c0_4 = arith.constant 0 : index
    %c0_5 = arith.constant 0 : index
    %5 = vector.load %arg4[%c0_3, %c0_4, %c0_5] : memref<1x1x20xf32, #tpu.memory_space<vmem>>, vector<1x1x20xf32>
    %6 = vector.shape_cast %5 : vector<1x1x20xf32> to vector<1x20xf32>
    %c0_6 = arith.constant 0 : index
    %c0_7 = arith.constant 0 : index
    %c0_8 = arith.constant 0 : index
    %7 = vector.load %arg6[%c0_6, %c0_7, %c0_8] : memref<1x1x192xf32, #tpu.memory_space<vmem>>, vector<1x1x192xf32>
    %8 = vector.shape_cast %7 : vector<1x1x192xf32> to vector<1x192xf32>
    %c0_9 = arith.constant 0 : index
    %c0_10 = arith.constant 0 : index
    %c0_11 = arith.constant 0 : index
    %9 = vector.load %arg7[%c0_9, %c0_10, %c0_11] : memref<1x1x192xf32, #tpu.memory_space<vmem>>, vector<1x1x192xf32>
    %10 = vector.shape_cast %9 : vector<1x1x192xf32> to vector<1x192xf32>
    %cst = arith.constant dense<0.000000e+00> : vector<20xf32>
    %11 = vector.multi_reduction <add>, %4, %cst [1] : vector<20x192xf32> to vector<20xf32>
    %12 = vector.shape_cast %11 : vector<20xf32> to vector<20x1xf32>
    %cst_12 = arith.constant 1.920000e+02 : f32
    %13 = vector.broadcast %cst_12 : f32 to vector<20x1xf32>
    %14 = arith.divf %12, %13 : vector<20x1xf32>
    %15 = vector.broadcast %14 : vector<20x1xf32> to vector<20x192xf32>
    %16 = arith.subf %4, %15 : vector<20x192xf32>
    %17 = arith.mulf %16, %16 : vector<20x192xf32>
    %cst_13 = arith.constant dense<0.000000e+00> : vector<20xf32>
    %18 = vector.multi_reduction <add>, %17, %cst_13 [1] : vector<20x192xf32> to vector<20xf32>
    %19 = vector.shape_cast %18 : vector<20xf32> to vector<20x1xf32>
    %cst_14 = arith.constant 1.920000e+02 : f32
    %20 = vector.broadcast %cst_14 : f32 to vector<20x1xf32>
    %21 = arith.divf %19, %20 : vector<20x1xf32>
    %cst_15 = arith.constant 9.99999974E-6 : f32
    %22 = vector.broadcast %cst_15 : f32 to vector<20x1xf32>
    %23 = arith.addf %21, %22 : vector<20x1xf32>
    %24 = math.rsqrt %23 : vector<20x1xf32>
    %25 = vector.broadcast %24 : vector<20x1xf32> to vector<20x192xf32>
    %26 = arith.mulf %16, %25 : vector<20x192xf32>
    %27 = vector.broadcast %8 : vector<1x192xf32> to vector<20x192xf32>
    %28 = arith.mulf %26, %27 : vector<20x192xf32>
    %29 = vector.broadcast %10 : vector<1x192xf32> to vector<20x192xf32>
    %30 = arith.addf %28, %29 : vector<20x192xf32>
    %c0_16 = arith.constant 0 : index
    %c0_17 = arith.constant 0 : index
    %c0_18 = arith.constant 0 : index
    %31 = vector.load %arg8[%c0_16, %c0_17, %c0_18] : memref<1x192x576xf32, #tpu.memory_space<vmem>>, vector<1x192x576xf32>
    %32 = vector.shape_cast %31 : vector<1x192x576xf32> to vector<192x576xf32>
    %cst_19 = arith.constant dense<0.000000e+00> : vector<20x576xf32>
    %33 = tpu.matmul %30, %32, %cst_19 {dimension_numbers = #tpu.dot_dimension_numbers<[1], [0], [0], [1], [0, 0, 1, 1], [], []>} : vector<20x192xf32>, vector<192x576xf32>, vector<20x576xf32> -> vector<20x576xf32>
    %c0_20 = arith.constant 0 : index
    %c0_21 = arith.constant 0 : index
    %c0_22 = arith.constant 0 : index
    %34 = vector.load %arg9[%c0_20, %c0_21, %c0_22] : memref<1x1x576xf32, #tpu.memory_space<vmem>>, vector<1x1x576xf32>
    %35 = vector.shape_cast %34 : vector<1x1x576xf32> to vector<1x576xf32>
    %36 = vector.broadcast %35 : vector<1x576xf32> to vector<20x576xf32>
    %37 = arith.addf %33, %36 : vector<20x576xf32>
    %c0_23 = arith.constant 0 : index
    %c0_24 = arith.constant 0 : index
    %c0_25 = arith.constant 0 : index
    %38 = vector.load %arg11[%c0_23, %c0_24, %c0_25] : memref<1x1x192xf32, #tpu.memory_space<vmem>>, vector<1x1x192xf32>
    %39 = vector.shape_cast %38 : vector<1x1x192xf32> to vector<1x192xf32>
    %40 = vector.broadcast %39 : vector<1x192xf32> to vector<20x192xf32>
    %41 = arith.addf %4, %40 : vector<20x192xf32>
    %42 = vector.extract_strided_slice %37 {offsets = [0, 0], sizes = [20, 32], strides = [1, 1]} : vector<20x576xf32> to vector<20x32xf32>
    %43 = vector.extract_strided_slice %37 {offsets = [0, 192], sizes = [20, 32], strides = [1, 1]} : vector<20x576xf32> to vector<20x32xf32>
    %44 = vector.extract_strided_slice %37 {offsets = [0, 384], sizes = [20, 32], strides = [1, 1]} : vector<20x576xf32> to vector<20x32xf32>
    %cst_26 = arith.constant dense<0.000000e+00> : vector<20x20xf32>
    %45 = tpu.matmul %42, %43, %cst_26 {dimension_numbers = #tpu.dot_dimension_numbers<[1], [1], [0], [0], [0, 0, 1, 0], [], []>} : vector<20x32xf32>, vector<20x32xf32>, vector<20x20xf32> -> vector<20x20xf32>
    %cst_27 = arith.constant 0.176776692 : f32
    %46 = vector.broadcast %cst_27 : f32 to vector<20x20xf32>
    %47 = arith.mulf %45, %46 : vector<20x20xf32>
    %48 = vector.broadcast %6 : vector<1x20xf32> to vector<20x20xf32>
    %49 = arith.addf %47, %48 : vector<20x20xf32>
    %cst_28 = arith.constant dense<0xFF800000> : vector<20xf32>
    %50 = vector.multi_reduction <maximumf>, %49, %cst_28 [1] : vector<20x20xf32> to vector<20xf32>
    %51 = vector.shape_cast %50 : vector<20xf32> to vector<20x1xf32>
    %52 = vector.broadcast %51 : vector<20x1xf32> to vector<20x20xf32>
    %53 = arith.subf %49, %52 : vector<20x20xf32>
    %54 = math.exp %53 : vector<20x20xf32>
    %cst_29 = arith.constant dense<0.000000e+00> : vector<20x32xf32>
    %55 = tpu.matmul %54, %44, %cst_29 {dimension_numbers = #tpu.dot_dimension_numbers<[1], [0], [0], [1], [0, 0, 1, 1], [], []>} : vector<20x20xf32>, vector<20x32xf32>, vector<20x32xf32> -> vector<20x32xf32>
    %cst_30 = arith.constant dense<0.000000e+00> : vector<20xf32>
    %56 = vector.multi_reduction <add>, %54, %cst_30 [1] : vector<20x20xf32> to vector<20xf32>
    %57 = vector.shape_cast %56 : vector<20xf32> to vector<20x1xf32>
    %58 = vector.broadcast %57 : vector<20x1xf32> to vector<20x32xf32>
    %59 = arith.divf %55, %58 : vector<20x32xf32>
    %c0_31 = arith.constant 0 : index
    %c0_32 = arith.constant 0 : index
    %c0_33 = arith.constant 0 : index
    %60 = vector.load %arg10[%c0_31, %c0_32, %c0_33] : memref<1x192x192xf32, #tpu.memory_space<vmem>>, vector<1x32x192xf32>
    %61 = vector.shape_cast %60 : vector<1x32x192xf32> to vector<32x192xf32>
    %cst_34 = arith.constant dense<0.000000e+00> : vector<20x192xf32>
    %62 = tpu.matmul %59, %61, %cst_34 {dimension_numbers = #tpu.dot_dimension_numbers<[1], [0], [0], [1], [0, 0, 1, 1], [], []>} : vector<20x32xf32>, vector<32x192xf32>, vector<20x192xf32> -> vector<20x192xf32>
    %63 = arith.addf %41, %62 : vector<20x192xf32>
    %64 = vector.extract_strided_slice %37 {offsets = [0, 32], sizes = [20, 32], strides = [1, 1]} : vector<20x576xf32> to vector<20x32xf32>
    %65 = vector.extract_strided_slice %37 {offsets = [0, 224], sizes = [20, 32], strides = [1, 1]} : vector<20x576xf32> to vector<20x32xf32>
    %66 = vector.extract_strided_slice %37 {offsets = [0, 416], sizes = [20, 32], strides = [1, 1]} : vector<20x576xf32> to vector<20x32xf32>
    %cst_35 = arith.constant dense<0.000000e+00> : vector<20x20xf32>
    %67 = tpu.matmul %64, %65, %cst_35 {dimension_numbers = #tpu.dot_dimension_numbers<[1], [1], [0], [0], [0, 0, 1, 0], [], []>} : vector<20x32xf32>, vector<20x32xf32>, vector<20x20xf32> -> vector<20x20xf32>
    %cst_36 = arith.constant 0.176776692 : f32
    %68 = vector.broadcast %cst_36 : f32 to vector<20x20xf32>
    %69 = arith.mulf %67, %68 : vector<20x20xf32>
    %70 = vector.broadcast %6 : vector<1x20xf32> to vector<20x20xf32>
    %71 = arith.addf %69, %70 : vector<20x20xf32>
    %cst_37 = arith.constant dense<0xFF800000> : vector<20xf32>
    %72 = vector.multi_reduction <maximumf>, %71, %cst_37 [1] : vector<20x20xf32> to vector<20xf32>
    %73 = vector.shape_cast %72 : vector<20xf32> to vector<20x1xf32>
    %74 = vector.broadcast %73 : vector<20x1xf32> to vector<20x20xf32>
    %75 = arith.subf %71, %74 : vector<20x20xf32>
    %76 = math.exp %75 : vector<20x20xf32>
    %cst_38 = arith.constant dense<0.000000e+00> : vector<20x32xf32>
    %77 = tpu.matmul %76, %66, %cst_38 {dimension_numbers = #tpu.dot_dimension_numbers<[1], [0], [0], [1], [0, 0, 1, 1], [], []>} : vector<20x20xf32>, vector<20x32xf32>, vector<20x32xf32> -> vector<20x32xf32>
    %cst_39 = arith.constant dense<0.000000e+00> : vector<20xf32>
    %78 = vector.multi_reduction <add>, %76, %cst_39 [1] : vector<20x20xf32> to vector<20xf32>
    %79 = vector.shape_cast %78 : vector<20xf32> to vector<20x1xf32>
    %80 = vector.broadcast %79 : vector<20x1xf32> to vector<20x32xf32>
    %81 = arith.divf %77, %80 : vector<20x32xf32>
    %c0_40 = arith.constant 0 : index
    %c32 = arith.constant 32 : index
    %c0_41 = arith.constant 0 : index
    %82 = vector.load %arg10[%c0_40, %c32, %c0_41] : memref<1x192x192xf32, #tpu.memory_space<vmem>>, vector<1x32x192xf32>
    %83 = vector.shape_cast %82 : vector<1x32x192xf32> to vector<32x192xf32>
    %cst_42 = arith.constant dense<0.000000e+00> : vector<20x192xf32>
    %84 = tpu.matmul %81, %83, %cst_42 {dimension_numbers = #tpu.dot_dimension_numbers<[1], [0], [0], [1], [0, 0, 1, 1], [], []>} : vector<20x32xf32>, vector<32x192xf32>, vector<20x192xf32> -> vector<20x192xf32>
    %85 = arith.addf %63, %84 : vector<20x192xf32>
    %86 = vector.extract_strided_slice %37 {offsets = [0, 64], sizes = [20, 32], strides = [1, 1]} : vector<20x576xf32> to vector<20x32xf32>
    %87 = vector.extract_strided_slice %37 {offsets = [0, 256], sizes = [20, 32], strides = [1, 1]} : vector<20x576xf32> to vector<20x32xf32>
    %88 = vector.extract_strided_slice %37 {offsets = [0, 448], sizes = [20, 32], strides = [1, 1]} : vector<20x576xf32> to vector<20x32xf32>
    %cst_43 = arith.constant dense<0.000000e+00> : vector<20x20xf32>
    %89 = tpu.matmul %86, %87, %cst_43 {dimension_numbers = #tpu.dot_dimension_numbers<[1], [1], [0], [0], [0, 0, 1, 0], [], []>} : vector<20x32xf32>, vector<20x32xf32>, vector<20x20xf32> -> vector<20x20xf32>
    %cst_44 = arith.constant 0.176776692 : f32
    %90 = vector.broadcast %cst_44 : f32 to vector<20x20xf32>
    %91 = arith.mulf %89, %90 : vector<20x20xf32>
    %92 = vector.broadcast %6 : vector<1x20xf32> to vector<20x20xf32>
    %93 = arith.addf %91, %92 : vector<20x20xf32>
    %cst_45 = arith.constant dense<0xFF800000> : vector<20xf32>
    %94 = vector.multi_reduction <maximumf>, %93, %cst_45 [1] : vector<20x20xf32> to vector<20xf32>
    %95 = vector.shape_cast %94 : vector<20xf32> to vector<20x1xf32>
    %96 = vector.broadcast %95 : vector<20x1xf32> to vector<20x20xf32>
    %97 = arith.subf %93, %96 : vector<20x20xf32>
    %98 = math.exp %97 : vector<20x20xf32>
    %cst_46 = arith.constant dense<0.000000e+00> : vector<20x32xf32>
    %99 = tpu.matmul %98, %88, %cst_46 {dimension_numbers = #tpu.dot_dimension_numbers<[1], [0], [0], [1], [0, 0, 1, 1], [], []>} : vector<20x20xf32>, vector<20x32xf32>, vector<20x32xf32> -> vector<20x32xf32>
    %cst_47 = arith.constant dense<0.000000e+00> : vector<20xf32>
    %100 = vector.multi_reduction <add>, %98, %cst_47 [1] : vector<20x20xf32> to vector<20xf32>
    %101 = vector.shape_cast %100 : vector<20xf32> to vector<20x1xf32>
    %102 = vector.broadcast %101 : vector<20x1xf32> to vector<20x32xf32>
    %103 = arith.divf %99, %102 : vector<20x32xf32>
    %c0_48 = arith.constant 0 : index
    %c64 = arith.constant 64 : index
    %c0_49 = arith.constant 0 : index
    %104 = vector.load %arg10[%c0_48, %c64, %c0_49] : memref<1x192x192xf32, #tpu.memory_space<vmem>>, vector<1x32x192xf32>
    %105 = vector.shape_cast %104 : vector<1x32x192xf32> to vector<32x192xf32>
    %cst_50 = arith.constant dense<0.000000e+00> : vector<20x192xf32>
    %106 = tpu.matmul %103, %105, %cst_50 {dimension_numbers = #tpu.dot_dimension_numbers<[1], [0], [0], [1], [0, 0, 1, 1], [], []>} : vector<20x32xf32>, vector<32x192xf32>, vector<20x192xf32> -> vector<20x192xf32>
    %107 = arith.addf %85, %106 : vector<20x192xf32>
    %108 = vector.extract_strided_slice %37 {offsets = [0, 96], sizes = [20, 32], strides = [1, 1]} : vector<20x576xf32> to vector<20x32xf32>
    %109 = vector.extract_strided_slice %37 {offsets = [0, 288], sizes = [20, 32], strides = [1, 1]} : vector<20x576xf32> to vector<20x32xf32>
    %110 = vector.extract_strided_slice %37 {offsets = [0, 480], sizes = [20, 32], strides = [1, 1]} : vector<20x576xf32> to vector<20x32xf32>
    %cst_51 = arith.constant dense<0.000000e+00> : vector<20x20xf32>
    %111 = tpu.matmul %108, %109, %cst_51 {dimension_numbers = #tpu.dot_dimension_numbers<[1], [1], [0], [0], [0, 0, 1, 0], [], []>} : vector<20x32xf32>, vector<20x32xf32>, vector<20x20xf32> -> vector<20x20xf32>
    %cst_52 = arith.constant 0.176776692 : f32
    %112 = vector.broadcast %cst_52 : f32 to vector<20x20xf32>
    %113 = arith.mulf %111, %112 : vector<20x20xf32>
    %114 = vector.broadcast %6 : vector<1x20xf32> to vector<20x20xf32>
    %115 = arith.addf %113, %114 : vector<20x20xf32>
    %cst_53 = arith.constant dense<0xFF800000> : vector<20xf32>
    %116 = vector.multi_reduction <maximumf>, %115, %cst_53 [1] : vector<20x20xf32> to vector<20xf32>
    %117 = vector.shape_cast %116 : vector<20xf32> to vector<20x1xf32>
    %118 = vector.broadcast %117 : vector<20x1xf32> to vector<20x20xf32>
    %119 = arith.subf %115, %118 : vector<20x20xf32>
    %120 = math.exp %119 : vector<20x20xf32>
    %cst_54 = arith.constant dense<0.000000e+00> : vector<20x32xf32>
    %121 = tpu.matmul %120, %110, %cst_54 {dimension_numbers = #tpu.dot_dimension_numbers<[1], [0], [0], [1], [0, 0, 1, 1], [], []>} : vector<20x20xf32>, vector<20x32xf32>, vector<20x32xf32> -> vector<20x32xf32>
    %cst_55 = arith.constant dense<0.000000e+00> : vector<20xf32>
    %122 = vector.multi_reduction <add>, %120, %cst_55 [1] : vector<20x20xf32> to vector<20xf32>
    %123 = vector.shape_cast %122 : vector<20xf32> to vector<20x1xf32>
    %124 = vector.broadcast %123 : vector<20x1xf32> to vector<20x32xf32>
    %125 = arith.divf %121, %124 : vector<20x32xf32>
    %c0_56 = arith.constant 0 : index
    %c96 = arith.constant 96 : index
    %c0_57 = arith.constant 0 : index
    %126 = vector.load %arg10[%c0_56, %c96, %c0_57] : memref<1x192x192xf32, #tpu.memory_space<vmem>>, vector<1x32x192xf32>
    %127 = vector.shape_cast %126 : vector<1x32x192xf32> to vector<32x192xf32>
    %cst_58 = arith.constant dense<0.000000e+00> : vector<20x192xf32>
    %128 = tpu.matmul %125, %127, %cst_58 {dimension_numbers = #tpu.dot_dimension_numbers<[1], [0], [0], [1], [0, 0, 1, 1], [], []>} : vector<20x32xf32>, vector<32x192xf32>, vector<20x192xf32> -> vector<20x192xf32>
    %129 = arith.addf %107, %128 : vector<20x192xf32>
    %130 = vector.extract_strided_slice %37 {offsets = [0, 128], sizes = [20, 32], strides = [1, 1]} : vector<20x576xf32> to vector<20x32xf32>
    %131 = vector.extract_strided_slice %37 {offsets = [0, 320], sizes = [20, 32], strides = [1, 1]} : vector<20x576xf32> to vector<20x32xf32>
    %132 = vector.extract_strided_slice %37 {offsets = [0, 512], sizes = [20, 32], strides = [1, 1]} : vector<20x576xf32> to vector<20x32xf32>
    %cst_59 = arith.constant dense<0.000000e+00> : vector<20x20xf32>
    %133 = tpu.matmul %130, %131, %cst_59 {dimension_numbers = #tpu.dot_dimension_numbers<[1], [1], [0], [0], [0, 0, 1, 0], [], []>} : vector<20x32xf32>, vector<20x32xf32>, vector<20x20xf32> -> vector<20x20xf32>
    %cst_60 = arith.constant 0.176776692 : f32
    %134 = vector.broadcast %cst_60 : f32 to vector<20x20xf32>
    %135 = arith.mulf %133, %134 : vector<20x20xf32>
    %136 = vector.broadcast %6 : vector<1x20xf32> to vector<20x20xf32>
    %137 = arith.addf %135, %136 : vector<20x20xf32>
    %cst_61 = arith.constant dense<0xFF800000> : vector<20xf32>
    %138 = vector.multi_reduction <maximumf>, %137, %cst_61 [1] : vector<20x20xf32> to vector<20xf32>
    %139 = vector.shape_cast %138 : vector<20xf32> to vector<20x1xf32>
    %140 = vector.broadcast %139 : vector<20x1xf32> to vector<20x20xf32>
    %141 = arith.subf %137, %140 : vector<20x20xf32>
    %142 = math.exp %141 : vector<20x20xf32>
    %cst_62 = arith.constant dense<0.000000e+00> : vector<20x32xf32>
    %143 = tpu.matmul %142, %132, %cst_62 {dimension_numbers = #tpu.dot_dimension_numbers<[1], [0], [0], [1], [0, 0, 1, 1], [], []>} : vector<20x20xf32>, vector<20x32xf32>, vector<20x32xf32> -> vector<20x32xf32>
    %cst_63 = arith.constant dense<0.000000e+00> : vector<20xf32>
    %144 = vector.multi_reduction <add>, %142, %cst_63 [1] : vector<20x20xf32> to vector<20xf32>
    %145 = vector.shape_cast %144 : vector<20xf32> to vector<20x1xf32>
    %146 = vector.broadcast %145 : vector<20x1xf32> to vector<20x32xf32>
    %147 = arith.divf %143, %146 : vector<20x32xf32>
    %c0_64 = arith.constant 0 : index
    %c128 = arith.constant 128 : index
    %c0_65 = arith.constant 0 : index
    %148 = vector.load %arg10[%c0_64, %c128, %c0_65] : memref<1x192x192xf32, #tpu.memory_space<vmem>>, vector<1x32x192xf32>
    %149 = vector.shape_cast %148 : vector<1x32x192xf32> to vector<32x192xf32>
    %cst_66 = arith.constant dense<0.000000e+00> : vector<20x192xf32>
    %150 = tpu.matmul %147, %149, %cst_66 {dimension_numbers = #tpu.dot_dimension_numbers<[1], [0], [0], [1], [0, 0, 1, 1], [], []>} : vector<20x32xf32>, vector<32x192xf32>, vector<20x192xf32> -> vector<20x192xf32>
    %151 = arith.addf %129, %150 : vector<20x192xf32>
    %152 = vector.extract_strided_slice %37 {offsets = [0, 160], sizes = [20, 32], strides = [1, 1]} : vector<20x576xf32> to vector<20x32xf32>
    %153 = vector.extract_strided_slice %37 {offsets = [0, 352], sizes = [20, 32], strides = [1, 1]} : vector<20x576xf32> to vector<20x32xf32>
    %154 = vector.extract_strided_slice %37 {offsets = [0, 544], sizes = [20, 32], strides = [1, 1]} : vector<20x576xf32> to vector<20x32xf32>
    %cst_67 = arith.constant dense<0.000000e+00> : vector<20x20xf32>
    %155 = tpu.matmul %152, %153, %cst_67 {dimension_numbers = #tpu.dot_dimension_numbers<[1], [1], [0], [0], [0, 0, 1, 0], [], []>} : vector<20x32xf32>, vector<20x32xf32>, vector<20x20xf32> -> vector<20x20xf32>
    %cst_68 = arith.constant 0.176776692 : f32
    %156 = vector.broadcast %cst_68 : f32 to vector<20x20xf32>
    %157 = arith.mulf %155, %156 : vector<20x20xf32>
    %158 = vector.broadcast %6 : vector<1x20xf32> to vector<20x20xf32>
    %159 = arith.addf %157, %158 : vector<20x20xf32>
    %cst_69 = arith.constant dense<0xFF800000> : vector<20xf32>
    %160 = vector.multi_reduction <maximumf>, %159, %cst_69 [1] : vector<20x20xf32> to vector<20xf32>
    %161 = vector.shape_cast %160 : vector<20xf32> to vector<20x1xf32>
    %162 = vector.broadcast %161 : vector<20x1xf32> to vector<20x20xf32>
    %163 = arith.subf %159, %162 : vector<20x20xf32>
    %164 = math.exp %163 : vector<20x20xf32>
    %cst_70 = arith.constant dense<0.000000e+00> : vector<20x32xf32>
    %165 = tpu.matmul %164, %154, %cst_70 {dimension_numbers = #tpu.dot_dimension_numbers<[1], [0], [0], [1], [0, 0, 1, 1], [], []>} : vector<20x20xf32>, vector<20x32xf32>, vector<20x32xf32> -> vector<20x32xf32>
    %cst_71 = arith.constant dense<0.000000e+00> : vector<20xf32>
    %166 = vector.multi_reduction <add>, %164, %cst_71 [1] : vector<20x20xf32> to vector<20xf32>
    %167 = vector.shape_cast %166 : vector<20xf32> to vector<20x1xf32>
    %168 = vector.broadcast %167 : vector<20x1xf32> to vector<20x32xf32>
    %169 = arith.divf %165, %168 : vector<20x32xf32>
    %c0_72 = arith.constant 0 : index
    %c160 = arith.constant 160 : index
    %c0_73 = arith.constant 0 : index
    %170 = vector.load %arg10[%c0_72, %c160, %c0_73] : memref<1x192x192xf32, #tpu.memory_space<vmem>>, vector<1x32x192xf32>
    %171 = vector.shape_cast %170 : vector<1x32x192xf32> to vector<32x192xf32>
    %cst_74 = arith.constant dense<0.000000e+00> : vector<20x192xf32>
    %172 = tpu.matmul %169, %171, %cst_74 {dimension_numbers = #tpu.dot_dimension_numbers<[1], [0], [0], [1], [0, 0, 1, 1], [], []>} : vector<20x32xf32>, vector<32x192xf32>, vector<20x192xf32> -> vector<20x192xf32>
    %173 = arith.addf %151, %172 : vector<20x192xf32>
    %c0_75 = arith.constant 0 : index
    %c0_76 = arith.constant 0 : index
    %c0_77 = arith.constant 0 : index
    %174 = vector.load %arg12[%c0_75, %c0_76, %c0_77] : memref<1x1x192xf32, #tpu.memory_space<vmem>>, vector<1x1x192xf32>
    %175 = vector.shape_cast %174 : vector<1x1x192xf32> to vector<1x192xf32>
    %c0_78 = arith.constant 0 : index
    %c0_79 = arith.constant 0 : index
    %c0_80 = arith.constant 0 : index
    %176 = vector.load %arg13[%c0_78, %c0_79, %c0_80] : memref<1x1x192xf32, #tpu.memory_space<vmem>>, vector<1x1x192xf32>
    %177 = vector.shape_cast %176 : vector<1x1x192xf32> to vector<1x192xf32>
    %cst_81 = arith.constant dense<0.000000e+00> : vector<20xf32>
    %178 = vector.multi_reduction <add>, %173, %cst_81 [1] : vector<20x192xf32> to vector<20xf32>
    %179 = vector.shape_cast %178 : vector<20xf32> to vector<20x1xf32>
    %cst_82 = arith.constant 1.920000e+02 : f32
    %180 = vector.broadcast %cst_82 : f32 to vector<20x1xf32>
    %181 = arith.divf %179, %180 : vector<20x1xf32>
    %182 = vector.broadcast %181 : vector<20x1xf32> to vector<20x192xf32>
    %183 = arith.subf %173, %182 : vector<20x192xf32>
    %184 = arith.mulf %183, %183 : vector<20x192xf32>
    %cst_83 = arith.constant dense<0.000000e+00> : vector<20xf32>
    %185 = vector.multi_reduction <add>, %184, %cst_83 [1] : vector<20x192xf32> to vector<20xf32>
    %186 = vector.shape_cast %185 : vector<20xf32> to vector<20x1xf32>
    %cst_84 = arith.constant 1.920000e+02 : f32
    %187 = vector.broadcast %cst_84 : f32 to vector<20x1xf32>
    %188 = arith.divf %186, %187 : vector<20x1xf32>
    %cst_85 = arith.constant 9.99999974E-6 : f32
    %189 = vector.broadcast %cst_85 : f32 to vector<20x1xf32>
    %190 = arith.addf %188, %189 : vector<20x1xf32>
    %191 = math.rsqrt %190 : vector<20x1xf32>
    %192 = vector.broadcast %191 : vector<20x1xf32> to vector<20x192xf32>
    %193 = arith.mulf %183, %192 : vector<20x192xf32>
    %194 = vector.broadcast %175 : vector<1x192xf32> to vector<20x192xf32>
    %195 = arith.mulf %193, %194 : vector<20x192xf32>
    %196 = vector.broadcast %177 : vector<1x192xf32> to vector<20x192xf32>
    %197 = arith.addf %195, %196 : vector<20x192xf32>
    %c0_86 = arith.constant 0 : index
    %c0_87 = arith.constant 0 : index
    %c0_88 = arith.constant 0 : index
    %198 = vector.load %arg14[%c0_86, %c0_87, %c0_88] : memref<1x192x768xf32, #tpu.memory_space<vmem>>, vector<1x192x768xf32>
    %199 = vector.shape_cast %198 : vector<1x192x768xf32> to vector<192x768xf32>
    %cst_89 = arith.constant dense<0.000000e+00> : vector<20x768xf32>
    %200 = tpu.matmul %197, %199, %cst_89 {dimension_numbers = #tpu.dot_dimension_numbers<[1], [0], [0], [1], [0, 0, 1, 1], [], []>} : vector<20x192xf32>, vector<192x768xf32>, vector<20x768xf32> -> vector<20x768xf32>
    %c0_90 = arith.constant 0 : index
    %c0_91 = arith.constant 0 : index
    %c0_92 = arith.constant 0 : index
    %201 = vector.load %arg15[%c0_90, %c0_91, %c0_92] : memref<1x1x768xf32, #tpu.memory_space<vmem>>, vector<1x1x768xf32>
    %202 = vector.shape_cast %201 : vector<1x1x768xf32> to vector<1x768xf32>
    %203 = vector.broadcast %202 : vector<1x768xf32> to vector<20x768xf32>
    %204 = arith.addf %200, %203 : vector<20x768xf32>
    %cst_93 = arith.constant 5.000000e-01 : f32
    %205 = vector.broadcast %cst_93 : f32 to vector<20x768xf32>
    %206 = arith.mulf %205, %204 : vector<20x768xf32>
    %cst_94 = arith.constant 4.471500e-02 : f32
    %207 = vector.broadcast %cst_94 : f32 to vector<20x768xf32>
    %208 = arith.mulf %207, %204 : vector<20x768xf32>
    %209 = arith.mulf %208, %204 : vector<20x768xf32>
    %210 = arith.mulf %209, %204 : vector<20x768xf32>
    %211 = arith.addf %204, %210 : vector<20x768xf32>
    %cst_95 = arith.constant 0.797884583 : f32
    %212 = vector.broadcast %cst_95 : f32 to vector<20x768xf32>
    %213 = arith.mulf %212, %211 : vector<20x768xf32>
    %214 = math.tanh %213 : vector<20x768xf32>
    %cst_96 = arith.constant 1.000000e+00 : f32
    %215 = vector.broadcast %cst_96 : f32 to vector<20x768xf32>
    %216 = arith.addf %215, %214 : vector<20x768xf32>
    %217 = arith.mulf %206, %216 : vector<20x768xf32>
    %c0_97 = arith.constant 0 : index
    %c0_98 = arith.constant 0 : index
    %c0_99 = arith.constant 0 : index
    %218 = vector.load %arg16[%c0_97, %c0_98, %c0_99] : memref<1x768x192xf32, #tpu.memory_space<vmem>>, vector<1x768x192xf32>
    %219 = vector.shape_cast %218 : vector<1x768x192xf32> to vector<768x192xf32>
    %cst_100 = arith.constant dense<0.000000e+00> : vector<20x192xf32>
    %220 = tpu.matmul %217, %219, %cst_100 {dimension_numbers = #tpu.dot_dimension_numbers<[1], [0], [0], [1], [0, 0, 1, 1], [], []>} : vector<20x768xf32>, vector<768x192xf32>, vector<20x192xf32> -> vector<20x192xf32>
    %221 = arith.addf %173, %220 : vector<20x192xf32>
    %c0_101 = arith.constant 0 : index
    %c0_102 = arith.constant 0 : index
    %c0_103 = arith.constant 0 : index
    %222 = vector.load %arg17[%c0_101, %c0_102, %c0_103] : memref<1x1x192xf32, #tpu.memory_space<vmem>>, vector<1x1x192xf32>
    %223 = vector.shape_cast %222 : vector<1x1x192xf32> to vector<1x192xf32>
    %224 = vector.broadcast %223 : vector<1x192xf32> to vector<20x192xf32>
    %225 = arith.addf %221, %224 : vector<20x192xf32>
    %c0_104 = arith.constant 0 : index
    %c0_105 = arith.constant 0 : index
    %c0_106 = arith.constant 0 : index
    %226 = vector.load %arg18[%c0_104, %c0_105, %c0_106] : memref<1x20x192xf32, #tpu.memory_space<vmem>>, vector<1x20x192xf32>
    %227 = vector.shape_cast %226 : vector<1x20x192xf32> to vector<20x192xf32>
    %228 = vector.shape_cast %225 : vector<20x192xf32> to vector<1x20x192xf32>
    tpu.vector_store %arg18[%c0_104, %c0_105, %c0_106], %228 {strides = array<i32>} : memref<1x20x192xf32, #tpu.memory_space<vmem>>, vector<1x20x192xf32>,
    %c11_i32 = arith.constant 11 : i32
    %229 = arith.cmpi eq, %arg1, %c11_i32 : i32
    %230 = arith.extui %229 : i1 to i32
    %c0_i32_107 = arith.constant 0 : i32
    %231 = arith.cmpi ne, %230, %c0_i32_107 : i32
    scf.if %231 {
      %c0_108 = arith.constant 0 : index
      %c0_109 = arith.constant 0 : index
      %c0_110 = arith.constant 0 : index
      %232 = vector.load %arg18[%c0_108, %c0_109, %c0_110] : memref<1x20x192xf32, #tpu.memory_space<vmem>>, vector<1x20x192xf32>
      %233 = vector.shape_cast %232 : vector<1x20x192xf32> to vector<20x192xf32>
      %c0_111 = arith.constant 0 : index
      %c0_112 = arith.constant 0 : index
      %c0_113 = arith.constant 0 : index
      %234 = vector.load %arg5[%c0_111, %c0_112, %c0_113] : memref<1x20x1xf32, #tpu.memory_space<vmem>>, vector<1x20x1xf32>
      %235 = vector.shape_cast %234 : vector<1x20x1xf32> to vector<20x1xf32>
      %236 = vector.broadcast %235 : vector<20x1xf32> to vector<20x192xf32>
      %237 = arith.mulf %233, %236 : vector<20x192xf32>
      %c0_114 = arith.constant 0 : index
      %c0_115 = arith.constant 0 : index
      %c0_116 = arith.constant 0 : index
      %238 = vector.load %arg18[%c0_114, %c0_115, %c0_116] : memref<1x20x192xf32, #tpu.memory_space<vmem>>, vector<1x20x192xf32>
      %239 = vector.shape_cast %238 : vector<1x20x192xf32> to vector<20x192xf32>
      %240 = vector.shape_cast %237 : vector<20x192xf32> to vector<1x20x192xf32>
      tpu.vector_store %arg18[%c0_114, %c0_115, %c0_116], %240 {strides = array<i32>} : memref<1x20x192xf32, #tpu.memory_space<vmem>>, vector<1x20x192xf32>,
    } else {
    }
    return
  }
  func.func @transform_0(%arg0: i32, %arg1: i32) -> (i32, i32, i32) {
    %c0_i32 = arith.constant 0 : i32
    %c0_i32_0 = arith.constant 0 : i32
    %c0_i32_1 = arith.constant 0 : i32
    return %arg0, %c0_i32, %c0_i32_0 : i32, i32, i32
  }
  func.func @transform_1(%arg0: i32, %arg1: i32) -> (i32, i32, i32) {
    %c0_i32 = arith.constant 0 : i32
    %c0_i32_0 = arith.constant 0 : i32
    %c0_i32_1 = arith.constant 0 : i32
    %c0_i32_2 = arith.constant 0 : i32
    return %c0_i32, %c0_i32_0, %c0_i32_1 : i32, i32, i32
  }
  func.func @transform_2(%arg0: i32, %arg1: i32) -> (i32, i32, i32) {
    %c0_i32 = arith.constant 0 : i32
    %c0_i32_0 = arith.constant 0 : i32
    %c0_i32_1 = arith.constant 0 : i32
    return %arg0, %c0_i32, %c0_i32_0 : i32, i32, i32
  }
  func.func @transform_3(%arg0: i32, %arg1: i32) -> (i32, i32, i32) {
    %c0_i32 = arith.constant 0 : i32
    %c0_i32_0 = arith.constant 0 : i32
    %c0_i32_1 = arith.constant 0 : i32
    return %arg0, %c0_i32, %c0_i32_0 : i32, i32, i32
  }
  func.func @transform_4(%arg0: i32, %arg1: i32) -> (i32, i32, i32) {
    %c0_i32 = arith.constant 0 : i32
    %c0_i32_0 = arith.constant 0 : i32
    %c0_i32_1 = arith.constant 0 : i32
    return %arg1, %c0_i32, %c0_i32_0 : i32, i32, i32
  }
  func.func @transform_5(%arg0: i32, %arg1: i32) -> (i32, i32, i32) {
    %c0_i32 = arith.constant 0 : i32
    %c0_i32_0 = arith.constant 0 : i32
    %c0_i32_1 = arith.constant 0 : i32
    return %arg1, %c0_i32, %c0_i32_0 : i32, i32, i32
  }
  func.func @transform_6(%arg0: i32, %arg1: i32) -> (i32, i32, i32) {
    %c0_i32 = arith.constant 0 : i32
    %c0_i32_0 = arith.constant 0 : i32
    %c0_i32_1 = arith.constant 0 : i32
    return %arg1, %c0_i32, %c0_i32_0 : i32, i32, i32
  }
  func.func @transform_7(%arg0: i32, %arg1: i32) -> (i32, i32, i32) {
    %c0_i32 = arith.constant 0 : i32
    %c0_i32_0 = arith.constant 0 : i32
    %c0_i32_1 = arith.constant 0 : i32
    return %arg1, %c0_i32, %c0_i32_0 : i32, i32, i32
  }
  func.func @transform_8(%arg0: i32, %arg1: i32) -> (i32, i32, i32) {
    %c0_i32 = arith.constant 0 : i32
    %c0_i32_0 = arith.constant 0 : i32
    %c0_i32_1 = arith.constant 0 : i32
    return %arg1, %c0_i32, %c0_i32_0 : i32, i32, i32
  }
  func.func @transform_9(%arg0: i32, %arg1: i32) -> (i32, i32, i32) {
    %c0_i32 = arith.constant 0 : i32
    %c0_i32_0 = arith.constant 0 : i32
    %c0_i32_1 = arith.constant 0 : i32
    return %arg1, %c0_i32, %c0_i32_0 : i32, i32, i32
  }
  func.func @transform_10(%arg0: i32, %arg1: i32) -> (i32, i32, i32) {
    %c0_i32 = arith.constant 0 : i32
    %c0_i32_0 = arith.constant 0 : i32
    %c0_i32_1 = arith.constant 0 : i32
    return %arg1, %c0_i32, %c0_i32_0 : i32, i32, i32
  }
  func.func @transform_11(%arg0: i32, %arg1: i32) -> (i32, i32, i32) {
    %c0_i32 = arith.constant 0 : i32
    %c0_i32_0 = arith.constant 0 : i32
    %c0_i32_1 = arith.constant 0 : i32
    return %arg1, %c0_i32, %c0_i32_0 : i32, i32, i32
  }
  func.func @transform_12(%arg0: i32, %arg1: i32) -> (i32, i32, i32) {
    %c0_i32 = arith.constant 0 : i32
    %c0_i32_0 = arith.constant 0 : i32
    %c0_i32_1 = arith.constant 0 : i32
    return %arg1, %c0_i32, %c0_i32_0 : i32, i32, i32
  }
  func.func @transform_13(%arg0: i32, %arg1: i32) -> (i32, i32, i32) {
    %c0_i32 = arith.constant 0 : i32
    %c0_i32_0 = arith.constant 0 : i32
    %c0_i32_1 = arith.constant 0 : i32
    return %arg1, %c0_i32, %c0_i32_0 : i32, i32, i32
  }
  func.func @transform_14(%arg0: i32, %arg1: i32) -> (i32, i32, i32) {
    %c0_i32 = arith.constant 0 : i32
    %c0_i32_0 = arith.constant 0 : i32
    %c0_i32_1 = arith.constant 0 : i32
    return %arg1, %c0_i32, %c0_i32_0 : i32, i32, i32
  }
  func.func @transform_15(%arg0: i32, %arg1: i32) -> (i32, i32, i32) {
    %c0_i32 = arith.constant 0 : i32
    %c0_i32_0 = arith.constant 0 : i32
    %c0_i32_1 = arith.constant 0 : i32
    return %arg1, %c0_i32, %c0_i32_0 : i32, i32, i32
  }
  func.func @transform_16(%arg0: i32, %arg1: i32) -> (i32, i32, i32) {
    %c0_i32 = arith.constant 0 : i32
    %c0_i32_0 = arith.constant 0 : i32
    %c0_i32_1 = arith.constant 0 : i32
    return %arg0, %c0_i32, %c0_i32_0 : i32, i32, i32
  }
}

</mosaic_0001>

<bundles_post_ra>
// kernel: _encoder_call.1
= control target key start
LH: loop header
LB: loop body
LE: loop exit
PB: predicated region body
PF: predicated region fallthrough
CT: control target
= control target key end

     0   :  { %s6186_s21 = smov 0   ;;  %s6188_s22 = smov 0   ;;  %s7900_s0 = inlined_call_operand.vmem [shape: f32[2,20,192], index: 0, kind: input, shape index: {}]   ;;  %s7901_s1 = inlined_call_operand.vmem [shape: f32[1,20,192], index: 1, kind: input, shape index: {}]   ;;  %s7902_s2 = inlined_call_operand.vmem [shape: f32[2,1,20], index: 2, kind: input, shape index: {}]   ;;  %s7903_s3 = inlined_call_operand.vmem [shape: f32[2,20,1], index: 3, kind: input, shape index: {}]   ;;  %s7904_s4 = inlined_call_operand.vmem [shape: f32[12,1,192], index: 4, kind: input, shape index: {}]   ;;  %s7905_s5 = inlined_call_operand.vmem [shape: f32[12,1,192], index: 5, kind: input, shape index: {}]   ;;  %s7906_s6 = inlined_call_operand.vmem [shape: f32[12,192,576], index: 6, kind: input, shape index: {}]   ;;  %s7907_s7 = inlined_call_operand.vmem [shape: f32[12,1,576], index: 7, kind: input, shape index: {}]   ;;  %s7908_s8 = inlined_call_operand.vmem [shape: f32[12,192,192], index: 8, kind: input, shape index: {}]   ;;  %s7909_s9 = inlined_call_operand.vmem [shape: f32[12,1,192], index: 9, kind: input, shape index: {}]   ;;  %s7910_s10 = inlined_call_operand.vmem [shape: f32[12,1,192], index: 10, kind: input, shape index: {}]   ;;  %s7911_s11 = inlined_call_operand.vmem [shape: f32[12,1,192], index: 11, kind: input, shape index: {}]   ;;  %s7912_s12 = inlined_call_operand.vmem [shape: f32[12,192,768], index: 12, kind: input, shape index: {}]   ;;  %s7913_s13 = inlined_call_operand.vmem [shape: f32[12,1,768], index: 13, kind: input, shape index: {}]   ;;  %s7914_s14 = inlined_call_operand.vmem [shape: f32[12,768,192], index: 14, kind: input, shape index: {}]   ;;  %s7915_s15 = inlined_call_operand.vmem [shape: f32[12,1,192], index: 15, kind: input, shape index: {}]   ;;  %s7916_s16 = inlined_call_operand.vmem [shape: f32[2,20,192], index: 16, kind: output, shape index: {}]  }
   0x1   :  { %7925 = sst [smem:[#allocation11_spill]] %s7900_s0  ;;  %s6190_s23 = smov 0  }
   0x2   :  { %7926 = sst [smem:[#allocation12_spill]] %s7901_s1  ;;  %s6192_s24 = smov 0  }
   0x3   :  { %7927 = sst [smem:[#allocation13_spill]] %s7902_s2  ;;  %s6194_s25 = smov 0  }
   0x4   :  { %7928 = sst [smem:[#allocation14_spill]] %s7903_s3 }
   0x5   :  { %7929 = sst [smem:[#allocation15_spill]] %s7906_s6 }
   0x6   :  { %7930 = sst [smem:[#allocation16_spill]] %s7907_s7 }
   0x7   :  { %7931 = sst [smem:[#allocation17_spill]] %s7908_s8 }
   0x8   :  { %7932 = sst [smem:[#allocation18_spill]] %s7911_s11 }
   0x9   :  { %7933 = sst [smem:[#allocation19_spill]] %s7913_s13 }
   0xa   :  { %7934 = sst [smem:[#allocation20_spill]] %s7914_s14 }
   0xb   :  { %7935 = sst [smem:[#allocation21_spill]] %s7916_s16 }
   0xc LB: > { %7936 = sst [smem:[#allocation2_spill]] %s6076_s21  ;;  %s35_s26 = sadd.s32 1, %s6084_s23  ;;  %s6092_s25 = sphi %s6194_s25, %s26_s25   ;;  %s6088_s24 = sphi %s6192_s24, %s7980_s24   ;;  %s6084_s23 = sphi %s6190_s23, %s7979_s23   ;;  %s6080_s22 = sphi %s6188_s22, %s7978_s22   ;;  %s6076_s21 = sphi %s6186_s21, %s7977_s21  }
   0xd   : > { %7937 = sst [smem:[#allocation3_spill]] %s6084_s23  ;;  %s38_s27 = sadd.s32 1, %s6088_s24 }
   0xe   : > { %7938 = sst [smem:[#allocation4_spill]] %s6088_s24  ;;  %p36_p0 = scmp.ge.s32.totalorder %s35_s26, 12 }
   0xf   : > { %7939 = sst [smem:[#allocation5_spill]] %s6092_s25  ;;  %p4849_p1 = scmp.ge.s32.totalorder %s6092_s25, 1 }
  0x10   : > { %p604_p2 = scmp.lt.s32.totalorder %s6092_s25, 25  ;;  %s7982_s26 = smov (%p36_p0, %s35_s26), 0 }
  0x11   : > { %7940 = sst [smem:[#allocation6_spill]] %s7982_s26  ;;  %s7984_s27 = smov (!%p36_p0, %s38_s27), %s6088_s24 }
  0x12   : > { %p605_p3 = pnand %p4849_p1, %p604_p2  ;;  %p40_p4 = scmp.ge.s32.totalorder %s7984_s27, 2 }
  0x14   : > { %s7986_s27 = smov (%p40_p4, %s7984_s27), 0  ;;  %608 = sbr.rel (%p605_p3) target bundleno = 3929 (0xf59), region = 84 }
  0x15   : > { %7941 = sst [smem:[#allocation7_spill]] %s7986_s27 }
  0x1b   : > { %p714_p5 = scmp.lt.s32.totalorder %s6080_s22, 1  ;;  %p727_p6 = scmp.lt.s32.totalorder %s6076_s21, 11 }
  0x1c   : > { %s7944_s26 = sld [smem:[#allocation11_spill]]  ;;  %s7946_s3 = sld [smem:[#allocation14_spill]] }
  0x1d   : > { %s7988_s22 = smov (!%p714_p5, %s6080_s22), 1  ;;  %s7948_s6 = sld [smem:[#allocation15_spill]] }
  0x1e   : > { %7942 = sst [smem:[#allocation8_spill]] %s7988_s22  ;;  %s5826_s29 = smul.u32 48, %s7988_s22 }
  0x1f   : > { %s728_s28 = scalar_select %p727_p6, %s6076_s21, 11 }
  0x20   : > { %s5827_s18 = smul.u32 24, %s7988_s22  ;;  %s7949_s7 = sld [smem:[#allocation16_spill]] }
  0x21   : > { %s6228_s19 = sshll.u32 %s728_s28, 1  ;;  %s5828_s20 = smul.u32 960, %s728_s28 }
  0x22   : > { %s6233_s24 = scalar_lea.vmem %s7944_s26, %s5826_s29  ;;  %s6242_s17 = scalar_lea.vmem %s7946_s3, %s5827_s18 }
  0x23   : > { %7945 = sst [smem:[#allocation9_spill]] %s6233_s24  ;;  %s5829_s26 = smul.u32 5, %s728_s28 }
  0x24   : > { %7947 = sst [smem:[#allocation10_spill]] %s6242_s17  ;;  %s6259_s30 = scalar_lea.vmem %s7948_s6, %s5828_s20 }
  0x25   : > { %s5830_s18 = smul.u32 384, %s728_s28  ;;  %s7951_s8 = sld [smem:[#allocation17_spill]] }
  0x26   : > { %s6264_s2 = scalar_lea.vmem %s7949_s7, %s5829_s26  ;;  %s5831_s24 = smul.u32 1152, %s728_s28 }
  0x27   : > { %s5832_s23 = smul.u32 6, %s728_s28  ;;  %s7952_s22 = sld [smem:[#allocation19_spill]] }
  0x28   : > { %s6282_s3 = scalar_lea.vmem %s7912_s12, %s5831_s24  ;;  %s5833_s26 = smul.u32 1536, %s728_s28 }
  0x29   : > { %s7953_s21 = sld [smem:[#allocation21_spill]]  ;;  %s7954_s1 = sld [smem:[#allocation20_spill]] }
  0x2a   : > { %s7955_s25 = sld [smem:[#allocation2_spill]] }
  0x2b   : > { %s6273_s13 = scalar_lea.vmem %s7951_s8, %s5830_s18 }
  0x2d   : > { %s6287_s14 = scalar_lea.vmem %s7952_s22, %s5832_s23 }
  0x2f   : > { %s6292_s7 = scalar_lea.vmem %s7953_s21, %s5826_s29  ;;  %s6297_s20 = scalar_lea.vmem %s7954_s1, %s5833_s26 }
  0x30   : > { %p4863_p7 = scmp.ne.s32.totalorder %s7955_s25, 0 }
  0x31   : > { %s7956_s6 = sld [smem:[#allocation9_spill]] (!%p4863_p7)  ;;  %s7957_s23 = sld [smem:[#allocation12_spill]] (!%p4863_p7)  ;;  %vm807_vm0 = vcmask (!%p4863_p7), 523264   ;;  %vm812_vm1 = vcmask (!%p4863_p7), 519168  }
  0x32   : > { %787 = sbr.rel (%p4863_p7) target bundleno = 63 (0x3f), region = 88 }
  0x37   : > { %v788_v0 = vld [vmem:[%s7956_s6] sm:$0xff] (!%p4863_p7)  ;;  %s7958_s0 = smov (!%p4863_p7), %s7957_s23  ;;  %v789_v2 = vld [vmem:[%s7956_s6 + $0x8] sm:$0xff] (!%p4863_p7)  ;;  %v790_v5 = vld [vmem:[%s7956_s6 + $0x10] sm:$0xff] (!%p4863_p7) }
  0x38   : > { %v794_v1 = vld [vmem:[%s7957_s23] sm:$0xff] (!%p4863_p7)  ;;  %v795_v4 = vld [vmem:[%s7958_s0 + $0x8] sm:$0xff] (!%p4863_p7)  ;;  %v796_v6 = vld [vmem:[%s7958_s0 + $0x10] sm:$0xff] (!%p4863_p7) }
  0x39   : > { %v800_v3 = vadd.f32 %v794_v1, %v788_v0  ;;  %v801_v7 = vadd.f32 %v795_v4, %v789_v2  ;;  %v802_v8 = vadd.f32 %v796_v6, %v790_v5  ;;  %v791_v9 = vld [vmem:[%s7956_s6 + $0x18] sm:$0xff]  ;;  %v792_v11 = vld [vmem:[%s7956_s6 + $0x20] sm:$0xf]  ;;  %v793_v14 = vld [vmem:[%s7956_s6 + $0x28] sm:$0xf] }
  0x3a   : > { %v797_v10 = vld [vmem:[%s7958_s0 + $0x18] sm:$0xff]  ;;  %v798_v13 = vld [vmem:[%s7958_s0 + $0x20] sm:$0xf]  ;;  %v799_v15 = vld [vmem:[%s7958_s0 + $0x28] sm:$0xf] }
  0x3b   : > { %806 = vst [vmem:[%s6292_s7] sm:$0xff] %v800_v3  ;;  %v803_v12 = vadd.f32 %v797_v10, %v791_v9  ;;  %808 = vst.msk [vmem:[%s6292_s7 + $0x8] sm:$0xff] %vm807_vm0, %v801_v7  ;;  %v804_v16 = vadd.f32 %v798_v13, %v792_v11  ;;  %v805_v17 = vadd.f32 %v799_v15, %v793_v14 }
  0x3c   : > { %809 = vst [vmem:[%s6292_s7 + $0x10] sm:$0xff] %v802_v8 }
  0x3d   : > { %810 = vst.msk [vmem:[%s6292_s7 + $0x18] sm:$0xff] %vm807_vm0, %v803_v12  ;;  %811 = vst [vmem:[%s6292_s7 + $0x20] sm:$0xf] %v804_v16 }
  0x3e   : > { %813 = vst.msk [vmem:[%s6292_s7 + $0x28] sm:$0xf] %vm812_vm1, %v805_v17 }
  0x3f PF: > { %vm823_vm2 = vcmask 523264   ;;  %vm832_vm3 = vcmask 1043456   ;;  %vm834_vm4 = vcmask 519168   ;;  %v918_v31 = vld [vmem:[%s6259_s30 + $0x8] sm:$0xff]  ;;  %v923_v32 = vld [vmem:[%s6259_s30 + $0x30] sm:$0xff]  ;;  %v917_v33 = vld [vmem:[%s6259_s30] sm:$0xff]  ;;  %s7959_s6 = scalar_lea.vmem %s7904_s4, %s6228_s19  ;;  %s7960_s23 = scalar_lea.vmem %s7905_s5, %s6228_s19 }
  0x40   : > { %v5216_v34 = vpack.c.bf16 %v923_v32, %v918_v31  ;;  %v922_v35 = vld [vmem:[%s6259_s30 + $0x28] sm:$0xff]  ;;  %v920_v36 = vld [vmem:[%s6259_s30 + $0x18] sm:$0xff]  ;;  %v925_v37 = vld [vmem:[%s6259_s30 + $0x40] sm:$0xff]  ;;  %vm6096_vm5 = vmmov 0   ;;  %vm1346_vm6 = vcmask 261120   ;;  %s7964_s29 = sld [smem:[#allocation13_spill]]  ;;  %s7966_s22 = scalar_lea.vmem %s7909_s9, %s6228_s19 }
  0x41   : > { %v5218_v38 = vpack.c.bf16 %v922_v35, %v917_v33  ;;  %v5264_v39 = vpack.c.bf16 %v925_v37, %v920_v36  ;;  %v919_v40 = vld [vmem:[%s6259_s30 + $0x10] sm:$0xff]  ;;  %v924_v41 = vld [vmem:[%s6259_s30 + $0x38] sm:$0xff]  ;;  %v933_v44 = vld [vmem:[%s6259_s30 + $0x80] sm:$0xff]  ;;  %vm1454_vm8 = vcmask 162816   ;;  %vm1461_vm9 = vcmask 158720   ;;  %s6098_s25 = smov 32   ;;  %s7967_s21 = scalar_lea.vmem %s7910_s10, %s6228_s19 }
  0x42   : > { %v6333_v18 = vld [vmem:[%s6292_s7] sm:$0xff]  ;;  %v6336_v19 = vld [vmem:[%s6292_s7 + $0x8] sm:$0xff]  ;;  %v928_v42 = vld [vmem:[%s6259_s30 + $0x58] sm:$0xff]  ;;  %5217 = vmatprep.subr.bf16.mxu0 %v5216_v34  ;;  %v5266_v43 = vpack.c.bf16 %v924_v41, %v919_v40  ;;  %s6099_s26 = smov 96   ;;  %s7968_s28 = sld [smem:[#allocation18_spill]] }
  0x43   : > { %v824_v21 = vsel %vm823_vm2, %v6336_v19, 0.0  ;;  %v6349_v24 = vld [vmem:[%s6292_s7 + $0x10] sm:$0xff]  ;;  %v932_v46 = vld [vmem:[%s6259_s30 + $0x78] sm:$0xff]  ;;  %5219 = vmatpush1.bf16.msra.mxu0 %v5218_v38  ;;  %5265 = vmatprep.subr.bf16.mxu1 %v5264_v39  ;;  %v5220_v47 = vpack.c.bf16 %v933_v44, %v928_v42  ;;  %v930_v49 = vld [vmem:[%s6259_s30 + $0x68] sm:$0xff] }
  0x44   : > { %v6339_v20 = vld [vmem:[%s6292_s7 + $0x20] sm:$0xf]  ;;  %v825_v25 = vadd.f32 %v824_v21, %v6333_v18  ;;  %v6355_v27 = vld [vmem:[%s6292_s7 + $0x18] sm:$0xff]  ;;  %v927_v45 = vld [vmem:[%s6259_s30 + $0x50] sm:$0xff]  ;;  %5267 = vmatpush1.bf16.msra.mxu1 %v5266_v43 }
  0x45   : > { %v6344_v22 = vld [vmem:[%s6292_s7 + $0x28] sm:$0xf]  ;;  %v833_v23 = vsel %vm832_vm3, %v6339_v20, 0.0  ;;  %v828_v29 = vsel %vm823_vm2, %v6355_v27, 0.0  ;;  %v5222_v48 = vpack.c.bf16 %v932_v46, %v927_v45  ;;  %v935_v50 = vld [vmem:[%s6259_s30 + $0x90] sm:$0xff]  ;;  %v929_v51 = vld [vmem:[%s6259_s30 + $0x60] sm:$0xff]  ;;  %5221 = vmatprep.subr.bf16.mxu0 %v5220_v47 }
  0x46   : > { %v835_v26 = vsel %vm834_vm4, %v6344_v22, 0.0  ;;  %826 = vadd.xlane.f32.xlu0 %v825_v25  ;;  %v829_v30 = vadd.f32 %v828_v29, %v6349_v24  ;;  %v5268_v52 = vpack.c.bf16 %v935_v50, %v930_v49  ;;  %v934_v53 = vld [vmem:[%s6259_s30 + $0x88] sm:$0xff]  ;;  %v943_v55 = vld [vmem:[%s6259_s30 + $0xd0] sm:$0xff]  ;;  %v937_v58 = vld [vmem:[%s6259_s30 + $0xa0] sm:$0xff] }
  0x47   : > { %v836_v28 = vadd.f32 %v835_v26, %v833_v23  ;;  %v938_v54 = vld [vmem:[%s6259_s30 + $0xa8] sm:$0xff]  ;;  %v5270_v56 = vpack.c.bf16 %v934_v53, %v929_v51  ;;  %v940_v60 = vld [vmem:[%s6259_s30 + $0xb8] sm:$0xff]  ;;  %v945_v61 = vld [vmem:[%s6259_s30 + $0xe0] sm:$0xff]  ;;  %5223 = vmatpush1.bf16.msra.mxu0 %v5222_v48 }
  0x48   : > { %v5224_v57 = vpack.c.bf16 %v943_v55, %v938_v54  ;;  %v942_v59 = vld [vmem:[%s6259_s30 + $0xc8] sm:$0xff]  ;;  %5269 = vmatprep.subr.bf16.mxu1 %v5268_v52  ;;  %v939_v62 = vld [vmem:[%s6259_s30 + $0xb0] sm:$0xff]  ;;  %v944_v63 = vld [vmem:[%s6259_s30 + $0xd8] sm:$0xff]  ;;  %v5272_v1 = vpack.c.bf16 %v945_v61, %v940_v60  ;;  %s7969_s17 = scalar_lea.vmem %s7968_s28, %s6228_s19 }
  0x49   : > { %837 = vadd.xlane.f32.xlu1 %v836_v28  ;;  %v5226_v0 = vpack.c.bf16 %v942_v59, %v937_v58  ;;  %v948_v2 = vld [vmem:[%s6259_s30 + $0xf8] sm:$0xff]  ;;  %v953_v3 = vld [vmem:[%s6259_s30 + $0x120] sm:$0xff]  ;;  %v947_v4 = vld [vmem:[%s6259_s30 + $0xf0] sm:$0xff]  ;;  %5271 = vmatpush1.bf16.msra.mxu1 %v5270_v56  ;;  %v5274_v5 = vpack.c.bf16 %v944_v63, %v939_v62 }
  0x4a   : > { %830 = vadd.xlane.f32.xlu0 %v829_v30  ;;  %5225 = vmatprep.subr.bf16.mxu0 %v5224_v57  ;;  %v5228_v6 = vpack.c.bf16 %v953_v3, %v948_v2  ;;  %v952_v7 = vld [vmem:[%s6259_s30 + $0x118] sm:$0xff]  ;;  %v950_v8 = vld [vmem:[%s6259_s30 + $0x108] sm:$0xff]  ;;  %v955_v9 = vld [vmem:[%s6259_s30 + $0x130] sm:$0xff] }
  0x4b   : > { %5273 = vmatprep.subr.bf16.mxu1 %v5272_v1  ;;  %v5276_v10 = vpack.c.bf16 %v955_v9, %v950_v8  ;;  %v949_v11 = vld [vmem:[%s6259_s30 + $0x100] sm:$0xff]  ;;  %v954_v12 = vld [vmem:[%s6259_s30 + $0x128] sm:$0xff]  ;;  %v963_v14 = vld [vmem:[%s6259_s30 + $0x170] sm:$0xff]  ;;  %5227 = vmatpush1.bf16.msra.mxu0 %v5226_v0  ;;  %v5230_v15 = vpack.c.bf16 %v952_v7, %v947_v4 }
  0x4c   : > { %v958_v13 = vld [vmem:[%s6259_s30 + $0x148] sm:$0xff]  ;;  %v960_v16 = vld [vmem:[%s6259_s30 + $0x158] sm:$0xff]  ;;  %v965_v17 = vld [vmem:[%s6259_s30 + $0x180] sm:$0xff]  ;;  %5229 = vmatprep.subr.bf16.mxu0 %v5228_v6  ;;  %v5278_v21 = vpack.c.bf16 %v954_v12, %v949_v11 }
  0x4d   : > { %5275 = vmatpush1.bf16.msra.mxu1 %v5274_v5  ;;  %v5232_v23 = vpack.c.bf16 %v963_v14, %v958_v13  ;;  %v957_v25 = vld [vmem:[%s6259_s30 + $0x140] sm:$0xff]  ;;  %v962_v26 = vld [vmem:[%s6259_s30 + $0x168] sm:$0xff]  ;;  %v959_v28 = vld [vmem:[%s6259_s30 + $0x150] sm:$0xff]  ;;  %v5280_v29 = vpack.c.bf16 %v965_v17, %v960_v16 }
  0x4e   : > { %5277 = vmatprep.subr.bf16.mxu1 %v5276_v10  ;;  %v964_v30 = vld [vmem:[%s6259_s30 + $0x178] sm:$0xff]  ;;  %v973_v32 = vld [vmem:[%s6259_s30 + $0x1c0] sm:$0xff]  ;;  %v970_v33 = vld [vmem:[%s6259_s30 + $0x1a8] sm:$0xff]  ;;  %v5234_v35 = vpack.c.bf16 %v962_v26, %v957_v25 }
  0x4f   : > { %v968_v31 = vld [vmem:[%s6259_s30 + $0x198] sm:$0xff]  ;;  %v975_v34 = vld [vmem:[%s6259_s30 + $0x1d0] sm:$0xff]  ;;  %5231 = vmatpush1.bf16.msra.mxu0 %v5230_v15  ;;  %v5282_v36 = vpack.c.bf16 %v964_v30, %v959_v28  ;;  %v969_v40 = vld [vmem:[%s6259_s30 + $0x1a0] sm:$0xff] }
  0x50   : > { %5233 = vmatprep.subr.bf16.mxu0 %v5232_v23  ;;  %v5236_v37 = vpack.c.bf16 %v973_v32, %v968_v31  ;;  %v967_v38 = vld [vmem:[%s6259_s30 + $0x190] sm:$0xff]  ;;  %v972_v39 = vld [vmem:[%s6259_s30 + $0x1b8] sm:$0xff]  ;;  %v5284_v41 = vpack.c.bf16 %v975_v34, %v970_v33  ;;  %v974_v42 = vld [vmem:[%s6259_s30 + $0x1c8] sm:$0xff] }
  0x51   : > { %5279 = vmatpush1.bf16.msra.mxu1 %v5278_v21  ;;  %v978_v43 = vld [vmem:[%s6259_s30 + $0x1e8] sm:$0xff]  ;;  %v983_v44 = vld [vmem:[%s6259_s30 + $0x210] sm:$0xff]  ;;  %v980_v45 = vld [vmem:[%s6259_s30 + $0x1f8] sm:$0xff]  ;;  %v5238_v47 = vpack.c.bf16 %v972_v39, %v967_v38  ;;  %v5286_v48 = vpack.c.bf16 %v974_v42, %v969_v40 }
  0x52   : > { %5281 = vmatprep.subr.bf16.mxu1 %v5280_v29  ;;  %v985_v46 = vld [vmem:[%s6259_s30 + $0x220] sm:$0xff]  ;;  %v5240_v49 = vpack.c.bf16 %v983_v44, %v978_v43  ;;  %v982_v51 = vld [vmem:[%s6259_s30 + $0x208] sm:$0xff]  ;;  %v979_v53 = vld [vmem:[%s6259_s30 + $0x1f0] sm:$0xff] }
  0x53   : > { %5235 = vmatpush1.bf16.msra.mxu0 %v5234_v35  ;;  %v977_v50 = vld [vmem:[%s6259_s30 + $0x1e0] sm:$0xff]  ;;  %v5288_v52 = vpack.c.bf16 %v985_v46, %v980_v45  ;;  %v984_v54 = vld [vmem:[%s6259_s30 + $0x218] sm:$0xff]  ;;  %v987_v15 = vld [vmem:[%s6259_s30 + $0x230] sm:$0xff] }
  0x54   : > { %5237 = vmatprep.subr.bf16.mxu0 %v5236_v37  ;;  %v5242_v55 = vpack.c.bf16 %v982_v51, %v977_v50  ;;  %v5290_v56 = vpack.c.bf16 %v984_v54, %v979_v53  ;;  %v988_v12 = vld [vmem:[%s6259_s30 + $0x238] sm:$0xff]  ;;  %v993_v13 = vld [vmem:[%s6259_s30 + $0x260] sm:$0xff]  ;;  %v990_v17 = vld [vmem:[%s6259_s30 + $0x248] sm:$0xff] }
  0x55   : > { %5283 = vmatpush1.bf16.msra.mxu1 %v5282_v36  ;;  %v5244_v14 = vpack.c.bf16 %v993_v13, %v988_v12  ;;  %v992_v16 = vld [vmem:[%s6259_s30 + $0x258] sm:$0xff]  ;;  %v995_v23 = vld [vmem:[%s6259_s30 + $0x270] sm:$0xff]  ;;  %v989_v25 = vld [vmem:[%s6259_s30 + $0x240] sm:$0xff] }
  0x56   : > { %5285 = vmatprep.subr.bf16.mxu1 %v5284_v41  ;;  %v5246_v21 = vpack.c.bf16 %v992_v16, %v987_v15  ;;  %v994_v26 = vld [vmem:[%s6259_s30 + $0x268] sm:$0xff]  ;;  %v5292_v28 = vpack.c.bf16 %v995_v23, %v990_v17  ;;  %v1003_v31 = vld [vmem:[%s6259_s30 + $0x2b0] sm:$0xff]  ;;  %v997_v33 = vld [vmem:[%s6259_s30 + $0x280] sm:$0xff]  ;;  %v884_v17 = vlaneseq }
  0x57   : > { %5239 = vmatpush1.bf16.msra.mxu0 %v5238_v47  ;;  %v5294_v29 = vpack.c.bf16 %v994_v26, %v989_v25  ;;  %v998_v30 = vld [vmem:[%s6259_s30 + $0x288] sm:$0xff]  ;;  %v1000_v35 = vld [vmem:[%s6259_s30 + $0x298] sm:$0xff]  ;;  %v1005_v37 = vld [vmem:[%s6259_s30 + $0x2c0] sm:$0xff] }
  0x58   : > { %5241 = vmatprep.subr.bf16.mxu0 %v5240_v49  ;;  %v5248_v32 = vpack.c.bf16 %v1003_v31, %v998_v30  ;;  %v1002_v34 = vld [vmem:[%s6259_s30 + $0x2a8] sm:$0xff]  ;;  %v999_v38 = vld [vmem:[%s6259_s30 + $0x290] sm:$0xff]  ;;  %v1004_v39 = vld [vmem:[%s6259_s30 + $0x2b8] sm:$0xff]  ;;  %v5296_v40 = vpack.c.bf16 %v1005_v37, %v1000_v35 }
  0x59   : > { %5287 = vmatpush1.bf16.msra.mxu1 %v5286_v48  ;;  %v5250_v36 = vpack.c.bf16 %v1002_v34, %v997_v33  ;;  %v5298_v41 = vpack.c.bf16 %v1004_v39, %v999_v38  ;;  %v1008_v42 = vld [vmem:[%s6259_s30 + $0x2d8] sm:$0xff]  ;;  %v1013_v43 = vld [vmem:[%s6259_s30 + $0x300] sm:$0xff]  ;;  %v1007_v45 = vld [vmem:[%s6259_s30 + $0x2d0] sm:$0xff] }
  0x5a   : > { %5289 = vmatprep.subr.bf16.mxu1 %v5288_v52  ;;  %v5252_v44 = vpack.c.bf16 %v1013_v43, %v1008_v42  ;;  %v1012_v46 = vld [vmem:[%s6259_s30 + $0x2f8] sm:$0xff]  ;;  %v1010_v47 = vld [vmem:[%s6259_s30 + $0x2e8] sm:$0xff]  ;;  %v1015_v49 = vld [vmem:[%s6259_s30 + $0x310] sm:$0xff] }
  0x5b   : > { %5243 = vmatpush1.bf16.msra.mxu0 %v5242_v55  ;;  %v5254_v48 = vpack.c.bf16 %v1012_v46, %v1007_v45  ;;  %v1009_v50 = vld [vmem:[%s6259_s30 + $0x2e0] sm:$0xff]  ;;  %v1014_v51 = vld [vmem:[%s6259_s30 + $0x308] sm:$0xff]  ;;  %v5300_v52 = vpack.c.bf16 %v1015_v49, %v1010_v47  ;;  %v1023_v55 = vld [vmem:[%s6259_s30 + $0x350] sm:$0xff] }
  0x5c   : > { %5245 = vmatprep.subr.bf16.mxu0 %v5244_v14  ;;  %v5302_v53 = vpack.c.bf16 %v1014_v51, %v1009_v50  ;;  %v1018_v54 = vld [vmem:[%s6259_s30 + $0x328] sm:$0xff]  ;;  %v6094_v14 = vmov 0.0|0.0   ;;  %v821_v34 = vld [vmem:[%s7959_s6] sm:$0x3]  ;;  %vm6647_vm7 = vmpackc.low %vm1346_vm6, %vm1346_vm6 }
  0x5d   : > { %5291 = vmatpush1.bf16.msra.mxu1 %v5290_v56  ;;  %v1017_v56 = vld [vmem:[%s6259_s30 + $0x320] sm:$0xff]  ;;  %v1034_v12 = vld [vmem:[%s6259_s30 + $0x3a8] sm:$0xff] }
  0x5e   : > { %5293 = vmatprep.subr.bf16.mxu1 %v5292_v28  ;;  %v822_v35 = vld [vmem:[%s7960_s23] sm:$0x3] }
  0x5f   : > { %5247 = vmatpush1.bf16.msra.mxu0 %v5246_v21  ;;  %v921_v43 = vld [vmem:[%s6259_s30 + $0x20] sm:$0xff] }
  0x60   : > { %5249 = vmatprep.subr.bf16.mxu0 %v5248_v32 }
  0x61   : > { %5295 = vmatpush1.bf16.msra.mxu1 %v5294_v29  ;;  %v6492_v29 = vshrl.u32 %v884_v17, 7  ;;  %v1006_v17 = vld [vmem:[%s6259_s30 + $0x2c8] sm:$0xff] }
  0x62   : > { %5297 = vmatprep.subr.bf16.mxu1 %v5296_v40 }
  0x63   : > { %5251 = vmatpush1.bf16.msra.mxu0 %v5250_v36  ;;  %v6495_v32 = vsub.s32 1, %v6492_v29  ;;  %v6498_v33 = vsub.s32 0, %v6492_v29 }
  0x64   : > { %5253 = vmatprep.subr.bf16.mxu0 %v5252_v44  ;;  %v926_v44 = vld [vmem:[%s6259_s30 + $0x48] sm:$0xff] }
  0x65   : > { %5299 = vmatpush1.bf16.msra.mxu1 %v5298_v41  ;;  %v891_v36 = vrot.slane %v821_v34, %v6495_v32  ;;  %v887_v37 = vrot.slane %v821_v34, %v6498_v33  ;;  %v908_v40 = vrot.slane %v822_v35, %v6495_v32  ;;  %v904_v42 = vrot.slane %v822_v35, %v6498_v33  ;;  %v1031_v34 = vld [vmem:[%s6259_s30 + $0x390] sm:$0xff]  ;;  %v1036_v35 = vld [vmem:[%s6259_s30 + $0x3b8] sm:$0xff] }
  0x66   : > { %5301 = vmatprep.subr.bf16.mxu1 %v5300_v52  ;;  %v5313_v51 = vpack.c.bf16 %v926_v44, %v921_v43 }
  0x67   : > { %5255 = vmatpush1.bf16.msra.mxu0 %v5254_v48 }
  0x69   : > { %5303 = vmatpush1.bf16.msra.mxu1 %v5302_v53  ;;  %v931_v53 = vld [vmem:[%s6259_s30 + $0x70] sm:$0xff] }
  0xd3   : > { %v827_v57 = vpop.xlane.xlu0 %826 }
  0xd4   : > { %v840_v58 = vmul.f32 0.0052083335, %v827_v57  ;;  %v5256_v57 = vpack.c.bf16 %v1023_v55, %v1018_v54  ;;  %v936_v54 = vld [vmem:[%s6259_s30 + $0x98] sm:$0xff] }
  0xd6   : > { %v838_v59 = vpop.xlane.xlu1 %837  ;;  %v6417_v61 = vsub.f32 %v6333_v18, %v840_v58  ;;  %v6420_v62 = vsub.f32 %v6336_v19, %v840_v58  ;;  %v1022_v58 = vld [vmem:[%s6259_s30 + $0x348] sm:$0xff]  ;;  %5257 = vmatprep.subr.bf16.mxu0 %v5256_v57 }
  0xd7   : > { %v842_v60 = vmul.f32 0.0052083335, %v838_v59  ;;  %v831_v1 = vpop.xlane.xlu0 %830  ;;  %v1020_v59 = vld [vmem:[%s6259_s30 + $0x338] sm:$0xff] }
  0xd8   : > { %v841_v2 = vmul.f32 0.0052083335, %v831_v1  ;;  %v849_v3 = vmul.f32 %v6417_v61, %v6417_v61  ;;  %v850_v4 = vmul.f32 %v6420_v62, %v6420_v62  ;;  %v5258_v1 = vpack.c.bf16 %v1022_v58, %v1017_v56 }
  0xd9   : > { %v6423_v63 = vsub.f32 %v6339_v20, %v842_v60  ;;  %v6426_v0 = vsub.f32 %v6344_v22, %v842_v60  ;;  %v1025_v60 = vld [vmem:[%s6259_s30 + $0x360] sm:$0xff]  ;;  %v5316_v58 = vpack.c.bf16 %v936_v54, %v931_v53 }
  0xda   : > { %v6437_v20 = vsub.f32 %v6349_v24, %v841_v2  ;;  %v6440_v22 = vsub.f32 %v6355_v27, %v841_v2  ;;  %v855_v5 = vsel %vm823_vm2, %v850_v4, 0.0  ;;  %v5304_v2 = vpack.c.bf16 %v1025_v60, %v1020_v59  ;;  %v1024_v4 = vld [vmem:[%s6259_s30 + $0x358] sm:$0xff]  ;;  %5259 = vmatpush1.bf16.msra.mxu0 %v5258_v1  ;;  %v941_v60 = vld [vmem:[%s6259_s30 + $0xc0] sm:$0xff] }
  0xdb   : > { %v853_v18 = vmul.f32 %v6423_v63, %v6423_v63  ;;  %v854_v19 = vmul.f32 %v6426_v0, %v6426_v0  ;;  %v856_v6 = vadd.f32 %v855_v5, %v849_v3  ;;  %v1019_v3 = vld [vmem:[%s6259_s30 + $0x330] sm:$0xff]  ;;  %v1033_v5 = vld [vmem:[%s6259_s30 + $0x3a0] sm:$0xff] }
  0xdc   : > { %v851_v9 = vmul.f32 %v6437_v20, %v6437_v20  ;;  %v852_v24 = vmul.f32 %v6440_v22, %v6440_v22  ;;  %5305 = vmatprep.subr.bf16.mxu1 %v5304_v2 }
  0xdd   : > { %v863_v7 = vsel %vm832_vm3, %v853_v18, 0.0  ;;  %v864_v8 = vsel %vm834_vm4, %v854_v19, 0.0  ;;  %857 = vadd.xlane.f32.xlu1 %v856_v6  ;;  %v1028_v18 = vld [vmem:[%s6259_s30 + $0x378] sm:$0xff]  ;;  %v5306_v19 = vpack.c.bf16 %v1024_v4, %v1019_v3  ;;  %v1027_v6 = vld [vmem:[%s6259_s30 + $0x370] sm:$0xff] }
  0xde   : > { %v865_v27 = vadd.f32 %v864_v8, %v863_v7  ;;  %v859_v10 = vsel %vm823_vm2, %v852_v24, 0.0  ;;  %v1032_v7 = vld [vmem:[%s6259_s30 + $0x398] sm:$0xff]  ;;  %v5260_v8 = vpack.c.bf16 %v1033_v5, %v1028_v18  ;;  %v1035_v24 = vld [vmem:[%s6259_s30 + $0x3b0] sm:$0xff]  ;;  %v961_v5 = vld [vmem:[%s6259_s30 + $0x160] sm:$0xff] }
  0xdf   : > { %v860_v11 = vadd.f32 %v859_v10, %v851_v9  ;;  %v1030_v9 = vld [vmem:[%s6259_s30 + $0x388] sm:$0xff]  ;;  %v5262_v10 = vpack.c.bf16 %v1032_v7, %v1027_v6  ;;  %5307 = vmatpush1.bf16.msra.mxu1 %v5306_v19  ;;  %v951_v4 = vld [vmem:[%s6259_s30 + $0x110] sm:$0xff]  ;;  %v956_v18 = vld [vmem:[%s6259_s30 + $0x138] sm:$0xff] }
  0xe0   : > { %5261 = vmatprep.subr.bf16.mxu0 %v5260_v8  ;;  %v5322_v19 = vpack.c.bf16 %v956_v18, %v951_v4  ;;  %v966_v6 = vld [vmem:[%s6259_s30 + $0x188] sm:$0xff]  ;;  %v971_v8 = vld [vmem:[%s6259_s30 + $0x1b0] sm:$0xff] }
  0xe1   : > { %866 = vadd.xlane.f32.xlu1 %v865_v27  ;;  %861 = vadd.xlane.f32.xlu0 %v860_v11  ;;  %v1029_v27 = vld [vmem:[%s6259_s30 + $0x380] sm:$0xff]  ;;  %v5308_v11 = vpack.c.bf16 %v1035_v24, %v1030_v9  ;;  %v5325_v7 = vpack.c.bf16 %v966_v6, %v961_v5  ;;  %v976_v9 = vld [vmem:[%s6259_s30 + $0x1d8] sm:$0xff] }
  0xe2   : > { %v5310_v13 = vpack.c.bf16 %v1034_v12, %v1029_v27  ;;  %5263 = vmatpush1.bf16.msra.mxu0 %v5262_v10  ;;  %v5328_v24 = vpack.c.bf16 %v976_v9, %v971_v8  ;;  %v981_v27 = vld [vmem:[%s6259_s30 + $0x200] sm:$0xff]  ;;  %v986_v10 = vld [vmem:[%s6259_s30 + $0x228] sm:$0xff]  ;;  %v991_v12 = vld [vmem:[%s6259_s30 + $0x250] sm:$0xff] }
  0xe3   : > { %5309 = vmatprep.subr.bf16.mxu1 %v5308_v11  ;;  %5312 = vmatprep.subr.bf16.mxu0 %v6094_v14  ;;  %v5331_v11 = vpack.c.bf16 %v986_v10, %v981_v27 }
  0xe4   : > { %5311 = vmatpush1.bf16.msra.mxu1 %v5310_v13  ;;  %v996_v13 = vld [vmem:[%s6259_s30 + $0x278] sm:$0xff] }
  0xe5   : > { %5774 = vmatprep.subr.bf16.mxu1 %v6094_v14 }
 0x16a   : > { %v858_v15 = vpop.xlane.xlu1 %857 }
 0x16b   : > { %v868_v16 = vmul.f32 0.0052083335, %v858_v15  ;;  %v5334_v15 = vpack.c.bf16 %v996_v13, %v991_v12 }
 0x16d   : > { %v871_v21 = vadd.f32 1e-05, %v868_v16  ;;  %v1001_v16 = vld [vmem:[%s6259_s30 + $0x2a0] sm:$0xff] }
 0x16e   : > { %v867_v23 = vpop.xlane.xlu1 %866  ;;  %v862_v25 = vpop.xlane.xlu0 %861 }
 0x16f   : > { %5926 = vrsqrt.f32 %v871_v21  ;;  %v870_v26 = vmul.f32 0.0052083335, %v867_v23  ;;  %v869_v28 = vmul.f32 0.0052083335, %v862_v25  ;;  %v5337_v21 = vpack.c.bf16 %v1006_v17, %v1001_v16  ;;  %v1011_v23 = vld [vmem:[%s6259_s30 + $0x2f0] sm:$0xff]  ;;  %v1016_v25 = vld [vmem:[%s6259_s30 + $0x318] sm:$0xff] }
 0x171   : > { %v873_v30 = vadd.f32 1e-05, %v870_v26  ;;  %v872_v31 = vadd.f32 1e-05, %v869_v28  ;;  %v5340_v26 = vpack.c.bf16 %v1016_v25, %v1011_v23  ;;  %v1021_v28 = vld [vmem:[%s6259_s30 + $0x340] sm:$0xff] }
 0x173   : > { %5928 = vrsqrt.f32 %v873_v30  ;;  %v1026_v30 = vld [vmem:[%s6259_s30 + $0x368] sm:$0xff] }
 0x174   : > { %5930 = vrsqrt.f32 %v872_v31  ;;  %v5343_v31 = vpack.c.bf16 %v1026_v30, %v1021_v28 }
 0x179   : > { %v5927_v38 = vpop.eup %5926 }
 0x17a   : > { %v878_v39 = vmul.f32 %v5927_v38, %v6420_v62  ;;  %v877_v41 = vmul.f32 %v5927_v38, %v6417_v61  ;;  %v1037_v38 = vld [vmem:[%s6264_s2] sm:$0x1f]  ;;  %s7963_s2 = sld [smem:[#allocation8_spill]] }
 0x17b   : > { %v1042_v16 = vrot.slane %v1037_v38, %v6498_v33 }
 0x17c   : > { %v895_v45 = vmul.f32 %v891_v36, %v878_v39  ;;  %v894_v46 = vmul.f32 %v887_v37, %v877_v41  ;;  %v1053_v39 = vsub.s32 3, %v6492_v29 }
 0x17d   : > { %v5929_v47 = vpop.eup %5928 }
 0x17e   : > { %v5931_v48 = vpop.eup %5930  ;;  %v912_v49 = vadd.f32 %v908_v40, %v895_v45  ;;  %v6518_v50 = vadd.f32 %v904_v42, %v894_v46  ;;  %v882_v62 = vmul.f32 %v5929_v47, %v6426_v0  ;;  %v881_v55 = vmul.f32 %v5929_v47, %v6423_v63  ;;  %v946_v63 = vld [vmem:[%s6259_s30 + $0xe8] sm:$0xff]  ;;  %s6095_s30 = smov 64  }
 0x17f   : > { %v880_v52 = vmul.f32 %v5931_v48, %v6440_v22  ;;  %v879_v61 = vmul.f32 %v5931_v48, %v6437_v20  ;;  %v5319_v2 = vpack.c.bf16 %v946_v63, %v941_v60  ;;  %v1046_v45 = vrot.slane %v1037_v38, %v6495_v32 }
 0x180   : > { %4864 = vmatprep.mubr.msk.f32.mxu0 %vm823_vm2, %v912_v49  ;;  %4867 = vmatprep.mubr.msk.f32.mxu1 %vm823_vm2, %v912_v49  ;;  %v899_v57 = vmul.f32 %v891_v36, %v882_v62  ;;  %v898_v59 = vmul.f32 %v887_v37, %v881_v55  ;;  %v6590_v46 = vrot.slane %v1037_v38, %v1053_v39  ;;  %s7965_s24 = scalar_lea.vmem %s7964_s29, %s7963_s2 }
 0x181   : > { %1138 = vmatmul.mubr.f32.vlgmr.msra.gmra.mrb[0].mxu0 %v6518_v50  ;;  %1221 = vmatmul.mubr.f32.vlgmr.msra.gmra.mrb[0].mxu1 %v6518_v50  ;;  %v897_v56 = vmul.f32 %v891_v36, %v880_v52  ;;  %v896_v0 = vmul.f32 %v887_v37, %v879_v61  ;;  %v5346_v36 = vpack.c.bf16 %v1036_v35, %v1031_v34  ;;  %v1049_v37 = vsub.s32 2, %v6492_v29 }
 0x182   : > { %5314 = vmatpush1.bf16.msra.mxu0 %v5313_v51  ;;  %v916_v1 = vadd.f32 %v908_v40, %v899_v57  ;;  %v915_v3 = vadd.f32 %v904_v42, %v898_v59 }
 0x183   : > { %v6530_v22 = vadd.f32 %v908_v40, %v897_v56  ;;  %5315 = vmatprep.subr.bf16.mxu0 %v6094_v14  ;;  %v6533_v20 = vadd.f32 %v904_v42, %v896_v0  ;;  %v6585_v44 = vrot.slane %v1037_v38, %v1049_v37 }
 0x185   : > { %4865 = vmatprep.mubr.msk.f32.mxu0 %vm823_vm2, %v6530_v22  ;;  %4868 = vmatprep.mubr.msk.f32.mxu1 %vm823_vm2, %v6530_v22 }
 0x186   : > { %1144 = vmatmul.mubr.f32.gmra.mrb[2].mxu0 %v6533_v20  ;;  %1227 = vmatmul.mubr.f32.gmra.mrb[2].mxu1 %v6533_v20 }
 0x187   : > { %5317 = vmatpush1.bf16.msra.mxu0 %v5316_v58  ;;  %4866 = vmatprep.mubr.msk.f32.mxu0 %vm823_vm2, %v916_v1 }
 0x188   : > { %4869 = vmatprep.mubr.msk.f32.mxu1 %vm823_vm2, %v916_v1  ;;  %5318 = vmatprep.subr.bf16.mxu0 %v6094_v14 }
 0x18a   : > { %1150 = vmatmul.mubr.f32.gmra.mrb[4].mxu0 %v915_v3  ;;  %1233 = vmatmul.mubr.f32.gmra.mrb[4].mxu1 %v915_v3 }
 0x18b   : > { %5320 = vmatpush1.bf16.msra.mxu0 %v5319_v2  ;;  %4870 = vmatprep.mubr.msk.f32.mxu0 %vm823_vm2, %v912_v49  ;;  %v1057_v2 = vsub.s32 4, %v6492_v29 }
 0x18c   : > { %5321 = vmatprep.subr.bf16.mxu0 %v6094_v14 }
 0x18d   : > { %v6631_v4 = vrot.slane %v1037_v38, %v1057_v2 }
 0x18f   : > { %5323 = vmatpush1.bf16.msra.mxu0 %v5322_v19 }
 0x190   : > { %5324 = vmatprep.subr.bf16.mxu0 %v6094_v14 }
 0x193   : > { %5326 = vmatpush1.bf16.msra.mxu0 %v5325_v7 }
 0x194   : > { %5327 = vmatprep.subr.bf16.mxu0 %v6094_v14 }
 0x197   : > { %5329 = vmatpush1.bf16.msra.mxu0 %v5328_v24 }
 0x198   : > { %5330 = vmatprep.subr.bf16.mxu0 %v6094_v14 }
 0x19b   : > { %5332 = vmatpush1.bf16.msra.mxu0 %v5331_v11 }
 0x19c   : > { %5333 = vmatprep.subr.bf16.mxu0 %v6094_v14 }
 0x19f   : > { %5335 = vmatpush1.bf16.msra.mxu0 %v5334_v15 }
 0x1a0   : > { %5336 = vmatprep.subr.bf16.mxu0 %v6094_v14 }
 0x1a3   : > { %5338 = vmatpush1.bf16.msra.mxu0 %v5337_v21 }
 0x1a4   : > { %5339 = vmatprep.subr.bf16.mxu0 %v6094_v14 }
 0x1a7   : > { %5341 = vmatpush1.bf16.msra.mxu0 %v5340_v26 }
 0x1a8   : > { %5342 = vmatprep.subr.bf16.mxu0 %v6094_v14 }
 0x1ab   : > { %5344 = vmatpush1.bf16.msra.mxu0 %v5343_v31  ;;  %v6691_v31 = vld [vmem:[%s7965_s24] ss:$0 sm:$0xff] }
 0x1ac   : > { %5345 = vmatprep.subr.bf16.mxu0 %v6094_v14 }
 0x1af   : > { %5347 = vmatpush1.bf16.msra.mxu0 %v5346_v36 }
 0x1b0   : > { %5348 = vmatprep.subr.bf16.mxu0 %v6094_v14 }
 0x1b2   : > { %1304 = vmatmul.mubr.f32.vlgmr.msra.gmra.mrb[6].mxu0 %v6518_v50 }
 0x1b3   : > { %4871 = vmatprep.mubr.msk.f32.mxu0 %vm823_vm2, %v6530_v22 }
 0x1b6   : > { %1309 = vmatmul.mubr.f32.gmra.mrb[8].mxu0 %v6533_v20 }
 0x1b7   : > { %4872 = vmatprep.mubr.msk.f32.mxu0 %vm823_vm2, %v916_v1  ;;  %v6097_v1 = vmov 0.0  }
 0x1b8   : > { %5048 = vmatprep.mubr.msk.f32.mxu1 %vm6096_vm5, %v6097_v1 }
 0x1ba   : > { %1314 = vmatmul.mubr.f32.gmra.mrb[10].mxu0 %v915_v3 }
 0x1bb   : > { %5042 = vmatprep.mubr.msk.f32.mxu0 %vm6096_vm5, %v6097_v1 }
 0x254   : > { %v1139_v40 = vpop.f32.mrb[0].mxu0  ;;  %v1222_v41 = vpop.f32.mrb[0].mxu1 }
 0x255   : > { %v1141_v42 = vpop.f32.mrb[1].mxu0  ;;  %v1224_v43 = vpop.f32.mrb[1].mxu1  ;;  %v6593_v49 = vadd.f32 %v1222_v41, %v6585_v44  ;;  %v6660_v21 = vadd.f32 %v1139_v40, %v1042_v16 }
 0x256   : > { %v6598_v52 = vadd.f32 %v1141_v42, %v1046_v45  ;;  %v1225_v61 = vadd.f32 %v1224_v43, %v6590_v46 }
 0x259   : > { %v1145_v47 = vpop.f32.mrb[2].mxu0  ;;  %v1228_v48 = vpop.f32.mrb[2].mxu1 }
 0x25a   : > { %v6596_v50 = vadd.f32 %v1228_v48, %v6585_v44  ;;  %v1147_v51 = vpop.f32.mrb[3].mxu0  ;;  %v1230_v62 = vpop.f32.mrb[3].mxu1  ;;  %v6672_v25 = vadd.f32 %v1145_v47, %v1042_v16 }
 0x25b   : > { %v6601_v53 = vadd.f32 %v1147_v51, %v1046_v45  ;;  %v1231_v54 = vadd.f32 %v1230_v62, %v6590_v46 }
 0x25c   : > { %v5379_v55 = vpack.c.bf16 %v6596_v50, %v6593_v49  ;;  %v6608_v56 = vpack.i.bf16 %v6596_v50, %v6593_v49 }
 0x25d   : > { %v1151_v0 = vpop.f32.mrb[4].mxu0  ;;  %v6610_v57 = vpop.f32.mrb[4].mxu1  ;;  %v6614_v22 = vpack.i.bf16 %v6601_v53, %v6598_v52  ;;  %v5353_v20 = vpack.c.bf16 %v1231_v54, %v1225_v61  ;;  %v6616_v58 = vpack.i.bf16 %v1231_v54, %v1225_v61 }
 0x25e   : > { %v1153_v59 = vpop.f32.mrb[5].mxu0  ;;  %v1236_v60 = vpop.f32.mrb[5].mxu1  ;;  %v6662_v23 = vadd.f32 %v1151_v0, %v1042_v16  ;;  %v1584_v16 = vld [vmem:[%s6273_s13 + $0x18] sm:$0xff] }
 0x25f   : > { %v6618_v63 = vadd.f32 %v1153_v59, %v1046_v45  ;;  %5882 = vrot.lane.b32.xlu0 %v6614_v22, %s6095_s30  ;;  %v6678_v26 = vadd.f32 %v1236_v60, %v6590_v46 }
 0x261   : > { %1344 = vrot.lane.b32.xlu1 %v6618_v63, %s6095_s30 }
 0x285   : > { %v1305_v3 = vpop.f32.mrb[6].mxu0 }
 0x286   : > { %v1307_v18 = vpop.f32.mrb[7].mxu0  ;;  %v6634_v5 = vadd.f32 %v1305_v3, %v6631_v4 }
 0x289   : > { %v1310_v19 = vpop.f32.mrb[8].mxu0 }
 0x28a   : > { %v6637_v6 = vadd.f32 %v1310_v19, %v6631_v4  ;;  %v1312_v7 = vpop.f32.mrb[9].mxu0 }
 0x28c   : > { %v5921_v8 = vpack.i.bf16 %v6637_v6, %v6634_v5  ;;  %v5413_v9 = vpack.c.bf16 %v6637_v6, %v6634_v5 }
 0x28d   : > { %v6643_v24 = vpop.f32.mrb[10].mxu0 }
 0x28e   : > { %v1317_v27 = vpop.f32.mrb[11].mxu0 }
 0x2d1   : > { %v5883_v10 = vpop.permute.xlu0 %5882 }
 0x2d2   : > { %v5885_v11 = vunpack.i.h.bf16 %v5883_v10  ;;  %v5884_v12 = vunpack.i.l.bf16 %v5883_v10 }
 0x2d3   : > { %v1345_v17 = vpop.permute.xlu1 %1344 }
 0x2d4   : > { %v5349_v15 = vpack.c.bf16 %v5885_v11, %v5884_v12 }
 0x2d6   : > { %5351 = vmatpush3.bf16.xpose.msk.msra.mxu0 %vm6647_vm7, %v5349_v15  ;;  %5776 = vmatpush3.bf16.xpose.msk.msra.mxu1 %vm6647_vm7, %v5349_v15  ;;  %v1582_v15 = vld [vmem:[%s6273_s13 + $0x8] sm:$0xff] }
 0x2d7   : > { %5040 = vmatprep.subr.mxu0 %v6097_v1  ;;  %5775 = vmatprep.subr.mxu1 %v6097_v1 }
 0x2de   : > { %5041 = vmatpush3.xpose.msk.msra.mxu0 %vm1346_vm6, %v1345_v17  ;;  %5777 = vmatpush3.xpose.msk.msra.mxu1 %vm1346_vm6, %v1345_v17  ;;  %v1581_v17 = vld [vmem:[%s6273_s13] sm:$0xff] }
 0x2df   : > { %5352 = vmatprep.subr.bf16.mxu1 %v6094_v14  ;;  %5367 = vmatprep.subr.bf16.mxu0 %v6094_v14 }
 0x2e1   : > { %5043 = vmatmul.mubr.msk.f32.vlgmr.msra.gmra.mrb[12].mxu0 %vm1346_vm6, %v6660_v21  ;;  %5049 = vmatmul.mubr.msk.f32.vlgmr.msra.gmra.mrb[6].mxu1 %vm1346_vm6, %v6662_v23 }
 0x2e2   : > { %5354 = vmatpush3.bf16.msra.mxu1 %v5353_v20  ;;  %5045 = vmatprep.mubr.msk.f32.mxu0 %vm6096_vm5, %v6097_v1 }
 0x2e3   : > { %5055 = vmatprep.subr.mxu1 %v6097_v1  ;;  %5057 = vmatprep.mubr.msk.f32.mxu1 %vm6096_vm5, %v6097_v1 }
 0x2e5   : > { %5046 = vmatmul.mubr.msk.f32.gmra.mrb[14].mxu0 %vm1346_vm6, %v6672_v25 }
 0x2e6   : > { %5056 = vmatpush3.msk.msra.mxu1 %vm832_vm3, %v6678_v26  ;;  %5087 = vmatprep.mubr.msk.f32.mxu0 %vm6096_vm5, %v6097_v1 }
 0x3b4   : > { %v1428_v28 = vpop.f32.mrb[12].mxu0  ;;  %v1438_v30 = vpop.f32.mrb[6].mxu1 }
 0x3b5   : > { %v1442_v34 = vmul.f32 0.17677669, %v1428_v28  ;;  %v5044_v35 = vpop.f32.mrb[13].mxu0  ;;  %v5050_v36 = vpop.f32.mrb[7].mxu1  ;;  %v1444_v41 = vmul.f32 0.17677669, %v1438_v30  ;;  %v5355_v28 = vpack.c.bf16 %v1584_v16, %v1582_v15 }
 0x3b6   : > { %v1583_v30 = vld [vmem:[%s6273_s13 + $0x10] sm:$0xff]  ;;  %v1588_v35 = vld [vmem:[%s6273_s13 + $0x38] sm:$0xff] }
 0x3b7   : > { %v1451_v38 = vadd.f32 %v6691_v31, %v1442_v34  ;;  %v1453_v48 = vadd.f32 %v6691_v31, %v1444_v41  ;;  %v1586_v34 = vld [vmem:[%s6273_s13 + $0x28] sm:$0xff]  ;;  %v5357_v36 = vpack.c.bf16 %v1583_v30, %v1581_v17  ;;  %5356 = vmatprep.subr.bf16.mxu1 %v5355_v28 }
 0x3b8   : > { %v1433_v40 = vpop.f32.mrb[14].mxu0 }
 0x3b9   : > { %v1443_v42 = vmul.f32 0.17677669, %v1433_v40  ;;  %v5047_v43 = vpop.f32.mrb[15].mxu0  ;;  %v1455_v45 = vsel %vm1454_vm8, %v1451_v38, -inf  ;;  %v1462_v51 = vsel %vm1461_vm9, %v1453_v48, -inf  ;;  %v1587_v40 = vld [vmem:[%s6273_s13 + $0x30] sm:$0xff] }
 0x3ba   : > { %1456 = vmax.xlane.f32.xlu1 %v1455_v45 }
 0x3bb   : > { %v1452_v46 = vadd.f32 %v6691_v31, %v1443_v42 }
 0x3bd   : > { %v1458_v47 = vsel %vm1454_vm8, %v1452_v46, -inf }
 0x3be   : > { %1459 = vmax.xlane.f32.xlu0 %v1458_v47 }
 0x3c2   : > { %1463 = vmax.xlane.f32.xlu0 %v1462_v51 }
 0x447   : > { %v1457_v62 = vpop.xlane.xlu1 %1456 }
 0x448   : > { %v1465_v61 = vsub.f32 %v1451_v38, %v1457_v62  ;;  %v5359_v38 = vpack.c.bf16 %v1588_v35, %v1586_v34 }
 0x44a   : > { %v1468_v54 = vmul.f32 1.442695, %v1465_v61 }
 0x44b   : > { %v1460_v0 = vpop.xlane.xlu0 %1459 }
 0x44c   : > { %5932 = vpow2.f32 %v1468_v54  ;;  %v1466_v20 = vsub.f32 %v1452_v46, %v1460_v0 }
 0x44e   : > { %v1470_v59 = vmul.f32 1.442695, %v1466_v20 }
 0x44f   : > { %v1464_v60 = vpop.xlane.xlu0 %1463 }
 0x450   : > { %5934 = vpow2.f32 %v1470_v59  ;;  %v1467_v3 = vsub.f32 %v1453_v48, %v1464_v60 }
 0x452   : > { %v1472_v18 = vmul.f32 1.442695, %v1467_v3 }
 0x454   : > { %5936 = vpow2.f32 %v1472_v18 }
 0x456   : > { %v5933_v19 = vpop.eup %5932 }
 0x457   : > { %5058 = vmatmul.mubr.msk.f32.vlgmr.msra.gmra.mrb[8].mxu1 %vm1454_vm8, %v5933_v19  ;;  %v1566_v7 = vsel %vm1454_vm8, %v5933_v19, 0.0 }
 0x458   : > { %1567 = vadd.xlane.f32.xlu1 %v1566_v7  ;;  %5060 = vmatprep.mubr.msk.f32.mxu1 %vm6096_vm5, %v6097_v1 }
 0x459   : > { %5358 = vmatpush1.bf16.msra.mxu1 %v5357_v36 }
 0x45a   : > { %v5935_v27 = vpop.eup %5934  ;;  %5360 = vmatprep.subr.bf16.mxu1 %v5359_v38 }
 0x45b   : > { %5061 = vmatmul.mubr.msk.f32.gmra.mrb[10].mxu1 %vm1454_vm8, %v5935_v27  ;;  %v1569_v10 = vsel %vm1454_vm8, %v5935_v27, 0.0 }
 0x45c   : > { %1570 = vadd.xlane.f32.xlu0 %v1569_v10  ;;  %5063 = vmatprep.mubr.msk.f32.mxu1 %vm6096_vm5, %v6097_v1 }
 0x45e   : > { %v5937_v11 = vpop.eup %5936 }
 0x45f   : > { %5064 = vmatmul.mubr.msk.f32.gmra.mrb[12].mxu1 %vm1454_vm8, %v5937_v11  ;;  %v1572_v12 = vsel %vm1461_vm9, %v5937_v11, 0.0 }
 0x460   : > { %1573 = vadd.xlane.f32.xlu1 %v1572_v12  ;;  %1662 = vmatprep.mubr.f32.mxu1 %v6097_v1 }
 0x471   : > { %1697 = vrot.lane.b32.xlu1 %v6618_v63, %s6098_s25 }
 0x472   : > { %5887 = vrot.lane.b32.xlu0 %v6614_v22, %s6098_s25  ;;  %v1585_v22 = vld [vmem:[%s6273_s13 + $0x20] sm:$0xff] }
 0x473   : > { %v5361_v41 = vpack.c.bf16 %v1587_v40, %v1585_v22 }
 0x475   : > { %1687 = vrot.lane.b32.xlu1 %v6660_v21, %s6099_s26  ;;  %5362 = vmatpush1.bf16.msra.mxu1 %v5361_v41 }
 0x476   : > { %1691 = vrot.lane.b32.xlu0 %v6662_v23, %s6099_s26  ;;  %5363 = vmatprep.subr.bf16.mxu1 %v6094_v14 }
 0x479   : > { %1689 = vrot.lane.b32.xlu1 %v6672_v25, %s6099_s26 }
 0x4e5   : > { %v1568_v42 = vpop.xlane.xlu1 %1567 }
 0x4e6   : > { %5938 = vrcp.f32 %v1568_v42 }
 0x4e9   : > { %v1571_v43 = vpop.xlane.xlu0 %1570 }
 0x4ea   : > { %5940 = vrcp.f32 %v1571_v43 }
 0x4ed   : > { %v1574_v45 = vpop.xlane.xlu1 %1573  ;;  %v5888_v46 = vpop.permute.xlu0 %5887 }
 0x4ee   : > { %5942 = vrcp.f32 %v1574_v45  ;;  %v5890_v47 = vunpack.i.h.bf16 %v5888_v46  ;;  %v5889_v48 = vunpack.i.l.bf16 %v5888_v46 }
 0x4f0   : > { %v5939_v51 = vpop.eup %5938  ;;  %v5364_v0 = vpack.c.bf16 %v5890_v47, %v5889_v48  ;;  %v6770_v47 = vadd.f32 %v6610_v57, %v6585_v44 }
 0x4f1   : > { %v1698_v18 = vpop.permute.xlu1 %1697  ;;  %v1692_v15 = vpop.permute.xlu0 %1691 }
 0x4f4   : > { %v5941_v20 = vpop.eup %5940 }
 0x4f5   : > { %v1688_v11 = vpop.permute.xlu1 %1687 }
 0x4f8   : > { %v5943_v19 = vpop.eup %5942 }
 0x4f9   : > { %v1690_v12 = vpop.permute.xlu1 %1689 }
 0x52a   : > { %v1552_v62 = vpop.f32.mrb[8].mxu1 }
 0x52b   : > { %v1576_v61 = vmul.f32 %v5939_v51, %v1552_v62  ;;  %v5059_v54 = vpop.f32.mrb[9].mxu1 }
 0x52d   : > { %4884 = vmatmul.mubr.msk.f32.vlgmr.msra.gmra.mrb[14].mxu1 %vm1346_vm6, %v1576_v61 }
 0x52e   : > { %5366 = vmatpush3.bf16.xpose.msk.msra.mxu1 %vm6647_vm7, %v5364_v0  ;;  %v1557_v59 = vpop.f32.mrb[10].mxu1  ;;  %1668 = vmatprep.mubr.f32.mxu1 %v6097_v1 }
 0x52f   : > { %v1578_v60 = vmul.f32 %v5941_v20, %v1557_v59  ;;  %v5062_v3 = vpop.f32.mrb[11].mxu1  ;;  %5070 = vmatprep.subr.mxu1 %v6097_v1 }
 0x531   : > { %4885 = vmatmul.mubr.msk.f32.gmra.mrb[16].mxu1 %vm1346_vm6, %v1578_v60 }
 0x532   : > { %v1562_v7 = vpop.f32.mrb[12].mxu1  ;;  %1674 = vmatprep.mubr.f32.mxu1 %v6097_v1 }
 0x533   : > { %v1580_v27 = vmul.f32 %v5943_v19, %v1562_v7  ;;  %v5065_v10 = vpop.f32.mrb[13].mxu1 }
 0x535   : > { %4886 = vmatmul.mubr.msk.f32.gmra.mrb[18].mxu1 %vm1346_vm6, %v1580_v27 }
 0x536   : > { %5071 = vmatpush3.xpose.msk.msra.mxu1 %vm1346_vm6, %v1698_v18  ;;  %5072 = vmatprep.mubr.msk.f32.mxu1 %vm6096_vm5, %v6097_v1 }
 0x539   : > { %5073 = vmatmul.mubr.msk.f32.vlgmr.msra.gmra.mrb[20].mxu1 %vm1346_vm6, %v1688_v11 }
 0x53a   : > { %5075 = vmatprep.mubr.msk.f32.mxu1 %vm6096_vm5, %v6097_v1 }
 0x53d   : > { %5076 = vmatmul.mubr.msk.f32.gmra.mrb[22].mxu1 %vm1346_vm6, %v1690_v12 }
 0x53e   : > { %5078 = vmatprep.mubr.msk.f32.mxu1 %vm6096_vm5, %v6097_v1 }
 0x541   : > { %5079 = vmatmul.mubr.msk.f32.gmra.mrb[24].mxu1 %vm1346_vm6, %v1692_v15 }
 0x542   : > { %2012 = vmatprep.mubr.f32.mxu1 %v6097_v1 }
 0x60c   : > { %v1777_v16 = vpop.f32.mrb[20].mxu1 }
 0x60d   : > { %v1791_v17 = vmul.f32 0.17677669, %v1777_v16  ;;  %v5074_v28 = vpop.f32.mrb[21].mxu1 }
 0x60f   : > { %v1794_v30 = vadd.f32 %v6691_v31, %v1791_v17 }
 0x610   : > { %v1782_v34 = vpop.f32.mrb[22].mxu1 }
 0x611   : > { %v1792_v35 = vmul.f32 0.17677669, %v1782_v34  ;;  %v5077_v36 = vpop.f32.mrb[23].mxu1  ;;  %v1797_v38 = vsel %vm1454_vm8, %v1794_v30, -inf }
 0x612   : > { %1798 = vmax.xlane.f32.xlu1 %v1797_v38 }
 0x613   : > { %v1795_v22 = vadd.f32 %v6691_v31, %v1792_v35 }
 0x614   : > { %v1787_v40 = vpop.f32.mrb[24].mxu1 }
 0x615   : > { %v1793_v41 = vmul.f32 0.17677669, %v1787_v40  ;;  %v5080_v42 = vpop.f32.mrb[25].mxu1  ;;  %v1800_v43 = vsel %vm1454_vm8, %v1795_v22, -inf }
 0x616   : > { %1801 = vmax.xlane.f32.xlu0 %v1800_v43 }
 0x617   : > { %v1796_v45 = vadd.f32 %v6691_v31, %v1793_v41 }
 0x619   : > { %v1803_v46 = vsel %vm1461_vm9, %v1796_v45, -inf }
 0x61a   : > { %1804 = vmax.xlane.f32.xlu0 %v1803_v46 }
 0x623   : > { %1821 = vrot.lane.b32.xlu1 %v6678_v26, %s6099_s26 }
 0x627   : > { %5897 = vrot.lane.b32.xlu1 %v6608_v56, %s6099_s26 }
 0x62b   : > { %2037 = vrot.lane.b32.xlu1 %v6660_v21, %s6095_s30 }
 0x62f   : > { %2041 = vrot.lane.b32.xlu1 %v6662_v23, %s6095_s30 }
 0x630   : > { %5892 = vrot.lane.b32.xlu0 %v6616_v58, %s6099_s26 }
 0x633   : > { %2382 = vrot.lane.b32.xlu1 %v6660_v21, %s6098_s25 }
 0x634   : > { %2039 = vrot.lane.b32.xlu0 %v6672_v25, %s6095_s30 }
 0x637   : > { %2386 = vrot.lane.b32.xlu1 %v6662_v23, %s6098_s25 }
 0x638   : > { %2392 = vrot.lane.b32.xlu0 %v6770_v47, %s6099_s26 }
 0x63b   : > { %2514 = vrot.lane.b32.xlu1 %v6678_v26, %s6098_s25 }
 0x63c   : > { %2384 = vrot.lane.b32.xlu0 %v6672_v25, %s6098_s25 }
 0x63f   : > { %5907 = vrot.lane.b32.xlu1 %v6608_v56, %s6095_s30 }
 0x640   : > { %5902 = vrot.lane.b32.xlu0 %v6616_v58, %s6098_s25 }
 0x644   : > { %2734 = vrot.lane.b32.xlu0 %v6770_v47, %s6095_s30 }
 0x69f   : > { %v1799_v44 = vpop.xlane.xlu1 %1798 }
 0x6a0   : > { %v1806_v57 = vsub.f32 %v1794_v30, %v1799_v44 }
 0x6a2   : > { %v1809_v23 = vmul.f32 1.442695, %v1806_v57 }
 0x6a3   : > { %v1802_v21 = vpop.xlane.xlu0 %1801  ;;  %v1822_v60 = vpop.permute.xlu1 %1821 }
 0x6a4   : > { %v1807_v48 = vsub.f32 %v1795_v22, %v1802_v21  ;;  %5944 = vpow2.f32 %v1809_v23 }
 0x6a6   : > { %v1811_v62 = vmul.f32 1.442695, %v1807_v48 }
 0x6a7   : > { %v1805_v51 = vpop.xlane.xlu0 %1804  ;;  %v5898_v19 = vpop.permute.xlu1 %5897 }
 0x6a8   : > { %v1808_v61 = vsub.f32 %v1796_v45, %v1805_v51  ;;  %5946 = vpow2.f32 %v1811_v62  ;;  %v5900_v12 = vunpack.i.h.bf16 %v5898_v19  ;;  %v5899_v15 = vunpack.i.l.bf16 %v5898_v19 }
 0x6aa   : > { %v1813_v20 = vmul.f32 1.442695, %v1808_v61 }
 0x6ab   : > { %v5893_v54 = vpop.permute.xlu0 %5892  ;;  %v2038_v10 = vpop.permute.xlu1 %2037 }
 0x6ac   : > { %v5895_v25 = vunpack.i.h.bf16 %v5893_v54  ;;  %v5894_v0 = vunpack.i.l.bf16 %v5893_v54  ;;  %5948 = vpow2.f32 %v1813_v20 }
 0x6ae   : > { %v5368_v59 = vpack.c.bf16 %v5895_v25, %v5894_v0  ;;  %v6787_v3 = vpop.eup %5944 }
 0x6af   : > { %v2040_v7 = vpop.permute.xlu0 %2039  ;;  %v2042_v49 = vpop.permute.xlu1 %2041 }
 0x6b0   : > { %5369 = vmatpush3.bf16.msra.mxu0 %v5368_v59 }
 0x6b1   : > { %5085 = vmatprep.subr.mxu0 %v6097_v1 }
 0x6b2   : > { %v6795_v18 = vpop.eup %5946 }
 0x6b3   : > { %v2393_v11 = vpop.permute.xlu0 %2392  ;;  %v2383_v16 = vpop.permute.xlu1 %2382 }
 0x6b4   : > { %5086 = vmatpush3.msk.msra.mxu0 %vm832_vm3, %v1822_v60 }
 0x6b5   : > { %5088 = vmatmul.mubr.msk.f32.vlgmr.msra.gmra.mrb[16].mxu0 %vm1454_vm8, %v6787_v3  ;;  %5378 = vmatprep.subr.bf16.mxu0 %v6094_v14 }
 0x6b6   : > { %5090 = vmatprep.mubr.msk.f32.mxu0 %vm6096_vm5, %v6097_v1  ;;  %v6806_v27 = vpop.eup %5948 }
 0x6b7   : > { %v2385_v50 = vpop.permute.xlu0 %2384  ;;  %v2387_v34 = vpop.permute.xlu1 %2386 }
 0x6b9   : > { %5091 = vmatmul.mubr.msk.f32.gmra.mrb[18].mxu0 %vm1454_vm8, %v6795_v18 }
 0x6ba   : > { %5093 = vmatprep.mubr.msk.f32.mxu0 %vm6096_vm5, %v6097_v1 }
 0x6bb   : > { %5381 = vmatpush3.bf16.xpose.msk.msra.mxu0 %vm6647_vm7, %v5379_v55  ;;  %v5394_v55 = vpack.c.bf16 %v5900_v12, %v5899_v15  ;;  %v5903_v17 = vpop.permute.xlu0 %5902  ;;  %v2515_v36 = vpop.permute.xlu1 %2514 }
 0x6bc   : > { %5100 = vmatprep.subr.mxu0 %v6097_v1  ;;  %v5905_v28 = vunpack.i.h.bf16 %v5903_v17  ;;  %v5904_v30 = vunpack.i.l.bf16 %v5903_v17  ;;  %v1922_v17 = vsel %vm1461_vm9, %v6806_v27, 0.0 }
 0x6bd   : > { %5094 = vmatmul.mubr.msk.f32.gmra.mrb[20].mxu0 %vm1454_vm8, %v6806_v27  ;;  %v1932_v27 = vld [vmem:[%s6273_s13 + $0x48] sm:$0xff] }
 0x6be   : > { %5102 = vmatprep.mubr.msk.f32.mxu0 %vm6096_vm5, %v6097_v1  ;;  %v5398_v35 = vpack.c.bf16 %v5905_v28, %v5904_v30 }
 0x6c3   : > { %5101 = vmatpush3.xpose.msk.msra.mxu0 %vm1346_vm6, %v6770_v47 }
 0x6c4   : > { %5393 = vmatprep.subr.bf16.mxu0 %v6094_v14 }
 0x6c6   : > { %5103 = vmatmul.mubr.msk.f32.vlgmr.msra.gmra.mrb[22].mxu0 %vm1346_vm6, %v2038_v10 }
 0x6c7   : > { %5396 = vmatpush3.bf16.xpose.msk.msra.mxu0 %vm6647_vm7, %v5394_v55  ;;  %5105 = vmatprep.mubr.msk.f32.mxu0 %vm6096_vm5, %v6097_v1  ;;  %v1916_v55 = vsel %vm1454_vm8, %v6787_v3, 0.0 }
 0x6c8   : > { %5130 = vmatprep.subr.mxu0 %v6097_v1 }
 0x6ca   : > { %5106 = vmatmul.mubr.msk.f32.gmra.mrb[24].mxu0 %vm1346_vm6, %v2040_v7 }
 0x6cb   : > { %5108 = vmatprep.mubr.msk.f32.mxu0 %vm6096_vm5, %v6097_v1 }
 0x6ce   : > { %5109 = vmatmul.mubr.msk.f32.gmra.mrb[26].mxu0 %vm1346_vm6, %v2042_v49 }
 0x6cf   : > { %5131 = vmatpush3.xpose.msk.msra.mxu0 %vm1346_vm6, %v2393_v11  ;;  %5132 = vmatprep.mubr.msk.f32.mxu0 %vm6096_vm5, %v6097_v1 }
 0x6d0   : > { %5397 = vmatprep.subr.bf16.mxu0 %v6094_v14 }
 0x6d2   : > { %5133 = vmatmul.mubr.msk.f32.vlgmr.msra.gmra.mrb[28].mxu0 %vm1346_vm6, %v2383_v16 }
 0x6d3   : > { %5399 = vmatpush3.bf16.msra.mxu0 %v5398_v35  ;;  %5135 = vmatprep.mubr.msk.f32.mxu0 %vm6096_vm5, %v6097_v1 }
 0x6d4   : > { %5145 = vmatprep.subr.mxu0 %v6097_v1 }
 0x6d6   : > { %5136 = vmatmul.mubr.msk.f32.gmra.mrb[30].mxu0 %vm1346_vm6, %v2385_v50  ;;  %v1919_v50 = vsel %vm1454_vm8, %v6795_v18, 0.0 }
 0x6d7   : > { %5146 = vmatpush3.msk.msra.mxu0 %vm832_vm3, %v2515_v36  ;;  %5138 = vmatprep.mubr.msk.f32.mxu0 %vm6096_vm5, %v6097_v1  ;;  %v1931_v36 = vld [vmem:[%s6273_s13 + $0x40] sm:$0xff] }
 0x6d8   : > { %5408 = vmatprep.subr.bf16.mxu0 %v6094_v14 }
 0x6da   : > { %5139 = vmatmul.mubr.msk.f32.gmra.mrb[32].mxu0 %vm1346_vm6, %v2387_v34  ;;  %v1934_v34 = vld [vmem:[%s6273_s13 + $0x58] sm:$0xff] }
 0x6db   : > { %5147 = vmatprep.mubr.msk.f32.mxu0 %vm6096_vm5, %v6097_v1  ;;  %v5370_v35 = vpack.c.bf16 %v1934_v34, %v1932_v27 }
 0x6dd   : > { %5371 = vmatprep.subr.bf16.mxu1 %v5370_v35 }
 0x788   : > { %v6842_v38 = vpop.f32.mrb[16].mxu0 }
 0x789   : > { %v5089_v22 = vpop.f32.mrb[17].mxu0 }
 0x78a   : > { %v1933_v22 = vld [vmem:[%s6273_s13 + $0x50] sm:$0xff] }
 0x78c   : > { %v6844_v40 = vpop.f32.mrb[18].mxu0 }
 0x78d   : > { %v5092_v41 = vpop.f32.mrb[19].mxu0 }
 0x78e   : > { %v5372_v41 = vpack.c.bf16 %v1933_v22, %v1931_v36 }
 0x790   : > { %v6846_v42 = vpop.f32.mrb[20].mxu0  ;;  %5373 = vmatpush1.bf16.msra.mxu1 %v5372_v41 }
 0x791   : > { %v5095_v43 = vpop.f32.mrb[21].mxu0 }
 0x792   : > { %v1936_v43 = vld [vmem:[%s6273_s13 + $0x68] sm:$0xff] }
 0x799   : > { %v2124_v45 = vpop.f32.mrb[22].mxu0 }
 0x79a   : > { %v5104_v46 = vpop.f32.mrb[23].mxu0  ;;  %v2138_v49 = vmul.f32 0.17677669, %v2124_v45  ;;  %v1938_v45 = vld [vmem:[%s6273_s13 + $0x78] sm:$0xff] }
 0x79b   : > { %v5374_v46 = vpack.c.bf16 %v1938_v45, %v1936_v43 }
 0x79c   : > { %v6872_v18 = vadd.f32 %v6691_v31, %v2138_v49 }
 0x79d   : > { %v2129_v44 = vpop.f32.mrb[24].mxu0  ;;  %5375 = vmatprep.subr.bf16.mxu1 %v5374_v46 }
 0x79e   : > { %v5107_v57 = vpop.f32.mrb[25].mxu0  ;;  %v2144_v3 = vsel %vm1454_vm8, %v6872_v18, -inf }
 0x79f   : > { %v1937_v57 = vld [vmem:[%s6273_s13 + $0x70] sm:$0xff] }
 0x7a1   : > { %v2134_v21 = vpop.f32.mrb[26].mxu0 }
 0x7a2   : > { %v5110_v23 = vpop.f32.mrb[27].mxu0  ;;  %v2140_v15 = vmul.f32 0.17677669, %v2134_v21 }
 0x7a3   : > { %v5908_v23 = vpop.permute.xlu1 %5907 }
 0x7a4   : > { %v6865_v16 = vadd.f32 %v6691_v31, %v2140_v15 }
 0x7a5   : > { %v2472_v48 = vpop.f32.mrb[28].mxu0 }
 0x7a6   : > { %v2486_v51 = vmul.f32 0.17677669, %v2472_v48  ;;  %v5134_v62 = vpop.f32.mrb[29].mxu0 }
 0x7a8   : > { %v2489_v61 = vadd.f32 %v6691_v31, %v2486_v51 }
 0x7a9   : > { %v2477_v54 = vpop.f32.mrb[30].mxu0 }
 0x7aa   : > { %v2487_v25 = vmul.f32 0.17677669, %v2477_v54  ;;  %v5137_v0 = vpop.f32.mrb[31].mxu0  ;;  %v2492_v20 = vsel %vm1454_vm8, %v2489_v61, -inf }
 0x7ab   : > { %2493 = vmax.xlane.f32.xlu0 %v2492_v20 }
 0x7ac   : > { %v2490_v59 = vadd.f32 %v6691_v31, %v2487_v25 }
 0x7ad   : > { %v2482_v60 = vpop.f32.mrb[32].mxu0 }
 0x7ae   : > { %v2488_v19 = vmul.f32 0.17677669, %v2482_v60  ;;  %v5140_v7 = vpop.f32.mrb[33].mxu0  ;;  %v2495_v10 = vsel %vm1454_vm8, %v2490_v59, -inf }
 0x7af   : > { %2496 = vmax.xlane.f32.xlu1 %v2495_v10  ;;  %v5909_v7 = vunpack.i.l.bf16 %v5908_v23 }
 0x7b0   : > { %v2491_v11 = vadd.f32 %v6691_v31, %v2488_v19  ;;  %v5910_v19 = vunpack.i.h.bf16 %v5908_v23 }
 0x7b2   : > { %v2498_v12 = vsel %vm1461_vm9, %v2491_v11, -inf  ;;  %v5409_v15 = vpack.c.bf16 %v5910_v19, %v5909_v7  ;;  %v2276_v19 = vld [vmem:[%s6273_s13 + $0x80] sm:$0xff] }
 0x7b3   : > { %2499 = vmax.xlane.f32.xlu0 %v2498_v12 }
 0x7c0   : > { %5912 = vrot.lane.b32.xlu1 %v6608_v56, %s6098_s25  ;;  %v2139_v56 = vmul.f32 0.17677669, %v2129_v44  ;;  %v1935_v44 = vld [vmem:[%s6273_s13 + $0x60] sm:$0xff] }
 0x7c1   : > { %v5376_v21 = vpack.c.bf16 %v1937_v57, %v1935_v44 }
 0x7c2   : > { %v6877_v28 = vadd.f32 %v6691_v31, %v2139_v56 }
 0x7c3   : > { %5377 = vmatpush1.bf16.msra.mxu1 %v5376_v21 }
 0x7c4   : > { %3065 = vrot.lane.b32.xlu1 %v6598_v52, %s6099_s26  ;;  %v2147_v30 = vsel %vm1454_vm8, %v6877_v28, -inf  ;;  %5382 = vmatprep.subr.bf16.mxu1 %v6094_v14 }
 0x7c9   : > { %3075 = vrot.lane.b32.xlu0 %v6770_v47, %s6098_s25  ;;  %v2150_v47 = vsel %vm1461_vm9, %v6865_v16, -inf }
 0x7e8   : > { %1920 = vadd.xlane.f32.xlu1 %v1919_v50  ;;  %1917 = vadd.xlane.f32.xlu0 %v1916_v55 }
 0x7ec   : > { %2151 = vmax.xlane.f32.xlu1 %v2150_v47  ;;  %1923 = vadd.xlane.f32.xlu0 %v1922_v17 }
 0x7f0   : > { %2145 = vmax.xlane.f32.xlu0 %v2144_v3 }
 0x7f4   : > { %2148 = vmax.xlane.f32.xlu0 %v2147_v30 }
 0x7fd   : > { %2166 = vrot.lane.b32.xlu1 %v6678_v26, %s6095_s30  ;;  %v2735_v26 = vpop.permute.xlu0 %2734 }
 0x801   : > { %3067 = vrot.lane.b32.xlu1 %v6601_v53, %s6099_s26 }
 0x805   : > { %3069 = vrot.lane.b32.xlu1 %v6618_v63, %s6099_s26 }
 0x80a   : > { %5917 = vrot.lane.b32.xlu0 %v6616_v58, %s6095_s30 }
 0x838   : > { %v2494_v48 = vpop.xlane.xlu0 %2493 }
 0x839   : > { %v2501_v51 = vsub.f32 %v2489_v61, %v2494_v48 }
 0x83b   : > { %v2504_v62 = vmul.f32 1.442695, %v2501_v51 }
 0x83c   : > { %v2497_v54 = vpop.xlane.xlu1 %2496 }
 0x83d   : > { %5950 = vpow2.f32 %v2504_v62  ;;  %v2502_v25 = vsub.f32 %v2490_v59, %v2497_v54 }
 0x83f   : > { %v2506_v0 = vmul.f32 1.442695, %v2502_v25 }
 0x840   : > { %v2500_v20 = vpop.xlane.xlu0 %2499  ;;  %v5913_v61 = vpop.permute.xlu1 %5912 }
 0x841   : > { %5952 = vpow2.f32 %v2506_v0  ;;  %v2503_v60 = vsub.f32 %v2491_v11, %v2500_v20  ;;  %v5915_v11 = vunpack.i.h.bf16 %v5913_v61  ;;  %v5914_v49 = vunpack.i.l.bf16 %v5913_v61  ;;  %v2277_v20 = vld [vmem:[%s6273_s13 + $0x88] sm:$0xff] }
 0x843   : > { %v2508_v10 = vmul.f32 1.442695, %v2503_v60  ;;  %v5424_v50 = vpack.c.bf16 %v5915_v11, %v5914_v49  ;;  %v2279_v60 = vld [vmem:[%s6273_s13 + $0x98] sm:$0xff]  ;;  %v2280_v11 = vld [vmem:[%s6273_s13 + $0xa0] sm:$0xff] }
 0x844   : > { %v3076_v55 = vpop.permute.xlu0 %3075  ;;  %v5385_v7 = vpack.c.bf16 %v2279_v60, %v2277_v20  ;;  %v2626_v20 = vld [vmem:[%s6273_s13 + $0xd0] sm:$0xff] }
 0x845   : > { %5954 = vpow2.f32 %v2508_v10  ;;  %v2278_v10 = vld [vmem:[%s6273_s13 + $0x90] sm:$0xff] }
 0x846   : > { %v5387_v61 = vpack.c.bf16 %v2278_v10, %v2276_v19  ;;  %v2629_v19 = vld [vmem:[%s6273_s13 + $0xe8] sm:$0xff] }
 0x847   : > { %v6898_v12 = vpop.eup %5950 }
 0x848   : > { %5148 = vmatmul.mubr.msk.f32.vlgmr.msra.gmra.mrb[34].mxu0 %vm1454_vm8, %v6898_v12  ;;  %v2609_v54 = vsel %vm1454_vm8, %v6898_v12, 0.0  ;;  %v2281_v12 = vld [vmem:[%s6273_s13 + $0xa8] sm:$0xff] }
 0x849   : > { %5411 = vmatpush3.bf16.xpose.msk.msra.mxu0 %vm6647_vm7, %v5409_v15  ;;  %5150 = vmatprep.mubr.msk.f32.mxu0 %vm6096_vm5, %v6097_v1  ;;  %v2283_v15 = vld [vmem:[%s6273_s13 + $0xb8] sm:$0xff] }
 0x84a   : > { %5160 = vmatprep.subr.mxu0 %v6097_v1 }
 0x84b   : > { %v6907_v58 = vpop.eup %5952 }
 0x84c   : > { %5151 = vmatmul.mubr.msk.f32.gmra.mrb[36].mxu0 %vm1454_vm8, %v6907_v58  ;;  %v2612_v0 = vsel %vm1454_vm8, %v6907_v58, 0.0  ;;  %v2282_v58 = vld [vmem:[%s6273_s13 + $0xb0] sm:$0xff] }
 0x84d   : > { %5153 = vmatprep.mubr.msk.f32.mxu0 %vm6096_vm5, %v6097_v1  ;;  %v5391_v49 = vpack.c.bf16 %v2282_v58, %v2280_v11  ;;  %v2628_v58 = vld [vmem:[%s6273_s13 + $0xe0] sm:$0xff] }
 0x84f   : > { %v6913_v59 = vpop.eup %5954 }
 0x850   : > { %5154 = vmatmul.mubr.msk.f32.gmra.mrb[38].mxu0 %vm1454_vm8, %v6913_v59  ;;  %v2615_v25 = vsel %vm1461_vm9, %v6913_v59, 0.0  ;;  %v5389_v59 = vpack.c.bf16 %v2283_v15, %v2281_v12 }
 0x851   : > { %5161 = vmatpush3.xpose.msk.msra.mxu0 %vm1346_vm6, %v2735_v26  ;;  %5162 = vmatprep.mubr.msk.f32.mxu0 %vm6096_vm5, %v6097_v1 }
 0x852   : > { %5423 = vmatprep.subr.bf16.mxu0 %v6094_v14 }
 0x854   : > { %5163 = vmatmul.mubr.msk.f32.vlgmr.msra.gmra.mrb[40].mxu0 %vm1346_vm6, %v6598_v52  ;;  %v3066_v52 = vpop.permute.xlu1 %3065 }
 0x855   : > { %5426 = vmatpush3.bf16.xpose.msk.msra.mxu0 %vm6647_vm7, %v5424_v50  ;;  %5165 = vmatprep.mubr.msk.f32.mxu0 %vm6096_vm5, %v6097_v1  ;;  %v2625_v50 = vld [vmem:[%s6273_s13 + $0xc8] sm:$0xff] }
 0x856   : > { %5190 = vmatprep.subr.mxu0 %v6097_v1 }
 0x858   : > { %5166 = vmatmul.mubr.msk.f32.gmra.mrb[42].mxu0 %vm1346_vm6, %v6601_v53 }
 0x859   : > { %5168 = vmatprep.mubr.msk.f32.mxu0 %vm6096_vm5, %v6097_v1 }
 0x85c   : > { %5169 = vmatmul.mubr.msk.f32.gmra.mrb[44].mxu0 %vm1346_vm6, %v6618_v63 }
 0x85d   : > { %5191 = vmatpush3.xpose.msk.msra.mxu0 %vm1346_vm6, %v3076_v55  ;;  %5192 = vmatprep.mubr.msk.f32.mxu0 %vm6096_vm5, %v6097_v1  ;;  %v2627_v55 = vld [vmem:[%s6273_s13 + $0xd8] sm:$0xff] }
 0x85e   : > { %5427 = vmatprep.subr.bf16.mxu0 %v6094_v14 }
 0x860   : > { %5193 = vmatmul.mubr.msk.f32.vlgmr.msra.gmra.mrb[46].mxu0 %vm1346_vm6, %v3066_v52  ;;  %v5400_v52 = vpack.c.bf16 %v2627_v55, %v2625_v50 }
 0x861   : > { %5195 = vmatprep.mubr.msk.f32.mxu0 %vm6096_vm5, %v6097_v1 }
 0x875   : > { %v1921_v53 = vpop.xlane.xlu1 %1920  ;;  %v1918_v13 = vpop.xlane.xlu0 %1917 }
 0x876   : > { %5956 = vrcp.f32 %v1918_v13 }
 0x877   : > { %5958 = vrcp.f32 %v1921_v53 }
 0x879   : > { %v2152_v56 = vpop.xlane.xlu1 %2151  ;;  %v1924_v47 = vpop.xlane.xlu0 %1923 }
 0x87a   : > { %v2155_v63 = vsub.f32 %v6865_v16, %v2152_v56  ;;  %5960 = vrcp.f32 %v1924_v47 }
 0x87c   : > { %v2160_v27 = vmul.f32 1.442695, %v2155_v63 }
 0x87d   : > { %v2167_v17 = vpop.permute.xlu1 %2166  ;;  %v2146_v3 = vpop.xlane.xlu0 %2145 }
 0x87e   : > { %v2153_v30 = vsub.f32 %v6872_v18, %v2146_v3 }
 0x880   : > { %v2156_v34 = vmul.f32 1.442695, %v2153_v30  ;;  %v5957_v35 = vpop.eup %5956 }
 0x881   : > { %v3068_v36 = vpop.permute.xlu1 %3067  ;;  %v2149_v22 = vpop.xlane.xlu0 %2148  ;;  %v1926_v41 = vmul.f32 %v5957_v35, %v6842_v38 }
 0x882   : > { %5962 = vpow2.f32 %v2156_v34  ;;  %v2154_v43 = vsub.f32 %v6877_v28, %v2149_v22  ;;  %5196 = vmatmul.mubr.msk.f32.gmra.mrb[48].mxu0 %vm1346_vm6, %v3068_v36  ;;  %v5959_v45 = vpop.eup %5958 }
 0x883   : > { %5198 = vmatprep.mubr.msk.f32.mxu0 %vm6096_vm5, %v6097_v1  ;;  %5964 = vpow2.f32 %v2160_v27  ;;  %4897 = vmatmul.mubr.msk.f32.vlgmr.msra.gmra.mrb[14].mxu1 %vm1346_vm6, %v1926_v41  ;;  %v1928_v28 = vmul.f32 %v5959_v45, %v6844_v40 }
 0x884   : > { %v2158_v16 = vmul.f32 1.442695, %v2154_v43  ;;  %2018 = vmatprep.mubr.f32.mxu1 %v6097_v1  ;;  %v5961_v57 = vpop.eup %5960 }
 0x885   : > { %v3070_v18 = vpop.permute.xlu1 %3069  ;;  %v5918_v46 = vpop.permute.xlu0 %5917  ;;  %v1930_v26 = vmul.f32 %v5961_v57, %v6846_v42 }
 0x886   : > { %5966 = vpow2.f32 %v2158_v16  ;;  %v5920_v44 = vunpack.i.h.bf16 %v5918_v46  ;;  %v5919_v38 = vunpack.i.l.bf16 %v5918_v46  ;;  %5199 = vmatmul.mubr.msk.f32.gmra.mrb[50].mxu0 %vm1346_vm6, %v3070_v18 }
 0x887   : > { %5207 = vmatprep.mubr.msk.f32.mxu0 %vm6096_vm5, %v6097_v1  ;;  %4898 = vmatmul.mubr.msk.f32.gmra.mrb[16].mxu1 %vm1346_vm6, %v1928_v28 }
 0x888   : > { %v5383_v21 = vpack.c.bf16 %v5920_v44, %v5919_v38  ;;  %2024 = vmatprep.mubr.f32.mxu1 %v6097_v1 }
 0x88a   : > { %5384 = vmatpush3.bf16.msra.mxu1 %v5383_v21 }
 0x88b   : > { %5115 = vmatprep.subr.mxu1 %v6097_v1  ;;  %4899 = vmatmul.mubr.msk.f32.gmra.mrb[18].mxu1 %vm1346_vm6, %v1930_v26 }
 0x88c   : > { %v5963_v23 = vpop.eup %5962  ;;  %5117 = vmatprep.mubr.msk.f32.mxu1 %vm6096_vm5, %v6097_v1 }
 0x88d   : > { %v2261_v40 = vsel %vm1454_vm8, %v5963_v23, 0.0  ;;  %v5965_v48 = vpop.eup %5964 }
 0x88e   : > { %2262 = vadd.xlane.f32.xlu0 %v2261_v40  ;;  %5116 = vmatpush3.msk.msra.mxu1 %vm832_vm3, %v2167_v17  ;;  %v2267_v42 = vsel %vm1461_vm9, %v5965_v48, 0.0  ;;  %v7017_v40 = vadd.f32 %v6643_v24, %v6631_v4  ;;  %v2624_v24 = vld [vmem:[%s6273_s13 + $0xc0] sm:$0xff] }
 0x88f   : > { %5118 = vmatmul.mubr.msk.f32.vlgmr.msra.gmra.mrb[26].mxu1 %vm1454_vm8, %v5963_v23  ;;  %5386 = vmatprep.subr.bf16.mxu1 %v5385_v7  ;;  %v2631_v7 = vld [vmem:[%s6273_s13 + $0xf8] sm:$0xff]  ;;  %v5402_v12 = vpack.c.bf16 %v2626_v20, %v2624_v24 }
 0x890   : > { %v5967_v51 = vpop.eup %5966  ;;  %5120 = vmatprep.mubr.msk.f32.mxu1 %vm6096_vm5, %v6097_v1  ;;  %5388 = vmatpush1.bf16.msra.mxu1 %v5387_v61  ;;  %v5404_v11 = vpack.c.bf16 %v2631_v7, %v2629_v19 }
 0x891   : > { %v2264_v62 = vsel %vm1454_vm8, %v5967_v51, 0.0  ;;  %5390 = vmatprep.subr.bf16.mxu1 %v5389_v59 }
 0x892   : > { %2268 = vadd.xlane.f32.xlu0 %v2267_v42  ;;  %2265 = vadd.xlane.f32.xlu1 %v2264_v62 }
 0x893   : > { %5121 = vmatmul.mubr.msk.f32.gmra.mrb[28].mxu1 %vm1454_vm8, %v5967_v51 }
 0x894   : > { %5123 = vmatprep.mubr.msk.f32.mxu1 %vm6096_vm5, %v6097_v1  ;;  %5392 = vmatpush1.bf16.msra.mxu1 %v5391_v49  ;;  %v2630_v49 = vld [vmem:[%s6273_s13 + $0xf0] sm:$0xff] }
 0x895   : > { %5401 = vmatprep.subr.bf16.mxu1 %v5400_v52 }
 0x896   : > { %2610 = vadd.xlane.f32.xlu0 %v2609_v54  ;;  %2616 = vadd.xlane.f32.xlu1 %v2615_v25 }
 0x897   : > { %5124 = vmatmul.mubr.msk.f32.gmra.mrb[30].mxu1 %vm1454_vm8, %v5965_v48 }
 0x898   : > { %2357 = vmatprep.mubr.f32.mxu1 %v6097_v1 }
 0x89a   : > { %2613 = vadd.xlane.f32.xlu0 %v2612_v0 }
 0x91b   : > { %v6989_v53 = vpop.f32.mrb[34].mxu0  ;;  %v2263_v48 = vpop.xlane.xlu0 %2262 }
 0x91c   : > { %v5149_v13 = vpop.f32.mrb[35].mxu0  ;;  %5968 = vrcp.f32 %v2263_v48 }
 0x91f   : > { %v6991_v56 = vpop.f32.mrb[36].mxu0  ;;  %v2269_v62 = vpop.xlane.xlu0 %2268 }
 0x920   : > { %v5152_v47 = vpop.f32.mrb[37].mxu0  ;;  %v2266_v25 = vpop.xlane.xlu1 %2265 }
 0x921   : > { %5970 = vrcp.f32 %v2266_v25  ;;  %v5406_v47 = vpack.c.bf16 %v2630_v49, %v2628_v58  ;;  %v2960_v49 = vld [vmem:[%s6273_s13 + $0x108] sm:$0xff] }
 0x922   : > { %5972 = vrcp.f32 %v2269_v62 }
 0x923   : > { %v6993_v63 = vpop.f32.mrb[38].mxu0  ;;  %v2611_v4 = vpop.xlane.xlu0 %2610 }
 0x924   : > { %v5155_v17 = vpop.f32.mrb[39].mxu0  ;;  %5974 = vrcp.f32 %v2611_v4 }
 0x925   : > { %v2617_v17 = vpop.xlane.xlu1 %2616 }
 0x927   : > { %v2814_v3 = vpop.f32.mrb[40].mxu0  ;;  %v2614_v15 = vpop.xlane.xlu0 %2613 }
 0x928   : > { %v2828_v30 = vmul.f32 0.17677669, %v2814_v3  ;;  %v5164_v27 = vpop.f32.mrb[41].mxu0  ;;  %5976 = vrcp.f32 %v2614_v15 }
 0x929   : > { %5978 = vrcp.f32 %v2617_v17  ;;  %v2964_v17 = vld [vmem:[%s6273_s13 + $0x128] sm:$0xff] }
 0x92a   : > { %v6996_v34 = vadd.f32 %v6691_v31, %v2828_v30 }
 0x92b   : > { %v2819_v35 = vpop.f32.mrb[42].mxu0 }
 0x92c   : > { %v2829_v36 = vmul.f32 0.17677669, %v2819_v35  ;;  %v5167_v22 = vpop.f32.mrb[43].mxu0  ;;  %v2834_v41 = vsel %vm1454_vm8, %v6996_v34, -inf }
 0x92d   : > { %2835 = vmax.xlane.f32.xlu0 %v2834_v41 }
 0x92e   : > { %v7001_v43 = vadd.f32 %v6691_v31, %v2829_v36 }
 0x92f   : > { %v2824_v45 = vpop.f32.mrb[44].mxu0 }
 0x930   : > { %v2830_v16 = vmul.f32 0.17677669, %v2824_v45  ;;  %v5170_v18 = vpop.f32.mrb[45].mxu0  ;;  %v2837_v46 = vsel %vm1454_vm8, %v7001_v43, -inf }
 0x931   : > { %2838 = vmax.xlane.f32.xlu1 %v2837_v46 }
 0x932   : > { %v7006_v44 = vadd.f32 %v6691_v31, %v2830_v16 }
 0x933   : > { %v3155_v38 = vpop.f32.mrb[46].mxu0 }
 0x934   : > { %v3169_v28 = vmul.f32 0.17677669, %v3155_v38  ;;  %v5194_v57 = vpop.f32.mrb[47].mxu0  ;;  %v2840_v21 = vsel %vm1461_vm9, %v7006_v44, -inf }
 0x935   : > { %2841 = vmax.xlane.f32.xlu0 %v2840_v21 }
 0x936   : > { %v7011_v26 = vadd.f32 %v6691_v31, %v3169_v28 }
 0x938   : > { %v3175_v23 = vsel %vm1454_vm8, %v7011_v26, -inf }
 0x939   : > { %3176 = vmax.xlane.f32.xlu1 %v3175_v23 }
 0x94a   : > { %3199 = vrot.lane.b32.xlu1 %v7017_v40, %s6099_s26 }
 0x94b   : > { %5922 = vrot.lane.b32.xlu0 %v5921_v8, %s6099_s26  ;;  %v5969_v8 = vpop.eup %5968 }
 0x94c   : > { %v5971_v52 = vpop.eup %5970 }
 0x94d   : > { %v5973_v36 = vpop.eup %5972 }
 0x94e   : > { %v5975_v16 = vpop.eup %5974 }
 0x94f   : > { %v5977_v46 = vpop.eup %5976 }
 0x950   : > { %v5979_v38 = vpop.eup %5978 }
 0x955   : > { %v3160_v51 = vpop.f32.mrb[48].mxu0 }
 0x956   : > { %v5197_v42 = vpop.f32.mrb[49].mxu0  ;;  %v3170_v50 = vmul.f32 0.17677669, %v3160_v51 }
 0x958   : > { %v7039_v35 = vadd.f32 %v6691_v31, %v3170_v50  ;;  %v2962_v50 = vld [vmem:[%s6273_s13 + $0x118] sm:$0xff] }
 0x959   : > { %v3165_v54 = vpop.f32.mrb[50].mxu0 }
 0x95a   : > { %v5200_v0 = vpop.f32.mrb[51].mxu0  ;;  %v3171_v60 = vmul.f32 0.17677669, %v3165_v54  ;;  %v3178_v18 = vsel %vm1454_vm8, %v7039_v35, -inf }
 0x95c   : > { %v7032_v55 = vadd.f32 %v6691_v31, %v3171_v60  ;;  %v2619_v31 = vmul.f32 %v5975_v16, %v6989_v53  ;;  %v2623_v53 = vmul.f32 %v5979_v38, %v6993_v63  ;;  %v3314_v38 = vld [vmem:[%s6273_s13 + $0x168] sm:$0xff] }
 0x95e   : > { %v3181_v27 = vsel %vm1461_vm9, %v7032_v55, -inf }
 0x962   : > { %v2247_v10 = vpop.f32.mrb[26].mxu1 }
 0x963   : > { %v2271_v61 = vmul.f32 %v5969_v8, %v2247_v10  ;;  %v5119_v59 = vpop.f32.mrb[27].mxu1 }
 0x965   : > { %4910 = vmatmul.mubr.msk.f32.vlgmr.msra.gmra.mrb[14].mxu1 %vm1346_vm6, %v2271_v61 }
 0x966   : > { %v2252_v13 = vpop.f32.mrb[28].mxu1  ;;  %2363 = vmatprep.mubr.f32.mxu1 %v6097_v1  ;;  %5403 = vmatpush1.bf16.msra.mxu1 %v5402_v12 }
 0x967   : > { %v2273_v3 = vmul.f32 %v5971_v52, %v2252_v13  ;;  %v5122_v30 = vpop.f32.mrb[29].mxu1  ;;  %5405 = vmatprep.subr.bf16.mxu1 %v5404_v11  ;;  %v5415_v52 = vpack.c.bf16 %v2962_v50, %v2960_v49  ;;  %v2961_v13 = vld [vmem:[%s6273_s13 + $0x110] sm:$0xff]  ;;  %v6046_v49 = vld [vmem:[%s6292_s7 + $0x8] sm:$0xff] }
 0x969   : > { %4911 = vmatmul.mubr.msk.f32.gmra.mrb[16].mxu1 %vm1346_vm6, %v2273_v3  ;;  %v2966_v3 = vld [vmem:[%s6273_s13 + $0x138] sm:$0xff] }
 0x96a   : > { %3182 = vmax.xlane.f32.xlu0 %v3181_v27  ;;  %v2257_v22 = vpop.f32.mrb[30].mxu1  ;;  %2369 = vmatprep.mubr.f32.mxu1 %v6097_v1  ;;  %v5419_v30 = vpack.c.bf16 %v2966_v3, %v2964_v17  ;;  %v2963_v27 = vld [vmem:[%s6273_s13 + $0x120] sm:$0xff] }
 0x96b   : > { %5407 = vmatpush1.bf16.msra.mxu1 %v5406_v47  ;;  %v2275_v41 = vmul.f32 %v5973_v36, %v2257_v22  ;;  %v5125_v45 = vpop.f32.mrb[31].mxu1  ;;  %v3310_v22 = vld [vmem:[%s6273_s13 + $0x148] sm:$0xff] }
 0x96c   : > { %5412 = vmatprep.subr.bf16.mxu1 %v6094_v14  ;;  %v2621_v14 = vmul.f32 %v5977_v46, %v6991_v56  ;;  %v3309_v46 = vld [vmem:[%s6273_s13 + $0x140] sm:$0xff] }
 0x96d   : > { %4912 = vmatmul.mubr.msk.f32.gmra.mrb[18].mxu1 %vm1346_vm6, %v2275_v41  ;;  %v3312_v41 = vld [vmem:[%s6273_s13 + $0x158] sm:$0xff] }
 0x96e   : > { %3179 = vmax.xlane.f32.xlu1 %v3178_v18  ;;  %2705 = vmatprep.mubr.f32.mxu1 %v6097_v1  ;;  %v5430_v45 = vpack.c.bf16 %v3312_v41, %v3310_v22 }
 0x971   : > { %4923 = vmatmul.mubr.msk.f32.vlgmr.msra.gmra.mrb[14].mxu1 %vm1346_vm6, %v2619_v31 }
 0x972   : > { %5414 = vmatpush3.bf16.msra.mxu1 %v5413_v9  ;;  %2711 = vmatprep.mubr.f32.mxu1 %v6097_v1 }
 0x973   : > { %5175 = vmatprep.subr.mxu1 %v6097_v1 }
 0x975   : > { %4924 = vmatmul.mubr.msk.f32.gmra.mrb[16].mxu1 %vm1346_vm6, %v2621_v14  ;;  %v3311_v14 = vld [vmem:[%s6273_s13 + $0x150] sm:$0xff] }
 0x976   : > { %5176 = vmatpush3.msk.msra.mxu1 %vm832_vm3, %v7017_v40  ;;  %2717 = vmatprep.mubr.f32.mxu1 %v6097_v1 }
 0x977   : > { %5416 = vmatprep.subr.bf16.mxu1 %v5415_v52 }
 0x979   : > { %4925 = vmatmul.mubr.msk.f32.gmra.mrb[18].mxu1 %vm1346_vm6, %v2623_v53  ;;  %v3316_v53 = vld [vmem:[%s6273_s13 + $0x178] sm:$0xff] }
 0x97a   : > { %5177 = vmatprep.mubr.msk.f32.mxu1 %vm6096_vm5, %v6097_v1 }
 0x9ba   : > { %v2836_v5 = vpop.xlane.xlu0 %2835 }
 0x9bb   : > { %v2843_v6 = vsub.f32 %v6996_v34, %v2836_v5 }
 0x9bd   : > { %v2846_v9 = vmul.f32 1.442695, %v2843_v6 }
 0x9be   : > { %v2839_v56 = vpop.xlane.xlu1 %2838 }
 0x9bf   : > { %5980 = vpow2.f32 %v2846_v9  ;;  %v2844_v28 = vsub.f32 %v7001_v43, %v2839_v56  ;;  %v5432_v56 = vpack.c.bf16 %v3311_v14, %v3309_v46  ;;  %v6051_v46 = vld [vmem:[%s6292_s7 + $0x28] sm:$0xf] }
 0x9c1   : > { %v2848_v57 = vmul.f32 1.442695, %v2844_v28 }
 0x9c2   : > { %v2842_v21 = vpop.xlane.xlu0 %2841 }
 0x9c3   : > { %5982 = vpow2.f32 %v2848_v57  ;;  %v2845_v23 = vsub.f32 %v7006_v44, %v2842_v21  ;;  %v5434_v21 = vpack.c.bf16 %v3316_v53, %v3314_v38 }
 0x9c5   : > { %v2850_v40 = vmul.f32 1.442695, %v2845_v23  ;;  %v3313_v23 = vld [vmem:[%s6273_s13 + $0x160] sm:$0xff] }
 0x9c6   : > { %v5923_v63 = vpop.permute.xlu0 %5922  ;;  %v3177_v48 = vpop.xlane.xlu1 %3176 }
 0x9c7   : > { %5984 = vpow2.f32 %v2850_v40  ;;  %v5925_v51 = vunpack.i.h.bf16 %v5923_v63  ;;  %v5924_v42 = vunpack.i.l.bf16 %v5923_v63  ;;  %v3184_v62 = vsub.f32 %v7011_v26, %v3177_v48  ;;  %v3315_v40 = vld [vmem:[%s6273_s13 + $0x170] sm:$0xff] }
 0x9c9   : > { %v5981_v54 = vpop.eup %5980  ;;  %v5428_v34 = vpack.c.bf16 %v5925_v51, %v5924_v42  ;;  %v3187_v25 = vmul.f32 1.442695, %v3184_v62  ;;  %v5436_v51 = vpack.c.bf16 %v3315_v40, %v3313_v23  ;;  %v3508_v40 = vld [vmem:[%s6282_s3 + $0x8] sm:$0xff] }
 0x9ca   : > { %5178 = vmatmul.mubr.msk.f32.vlgmr.msra.gmra.mrb[32].mxu1 %vm1454_vm8, %v5981_v54  ;;  %v2944_v43 = vsel %vm1454_vm8, %v5981_v54, 0.0  ;;  %v3200_v0 = vpop.permute.xlu1 %3199 }
 0x9cb   : > { %5986 = vpow2.f32 %v3187_v25  ;;  %5429 = vmatpush3.bf16.msra.mxu0 %v5428_v34  ;;  %2945 = vadd.xlane.f32.xlu0 %v2944_v43 }
 0x9cc   : > { %5180 = vmatprep.mubr.msk.f32.mxu1 %vm6096_vm5, %v6097_v1  ;;  %5205 = vmatprep.subr.mxu0 %v6097_v1 }
 0x9cd   : > { %v5983_v44 = vpop.eup %5982 }
 0x9ce   : > { %5181 = vmatmul.mubr.msk.f32.gmra.mrb[34].mxu1 %vm1454_vm8, %v5983_v44  ;;  %v2947_v26 = vsel %vm1454_vm8, %v5983_v44, 0.0 }
 0x9cf   : > { %5206 = vmatpush3.msk.msra.mxu0 %vm832_vm3, %v3200_v0  ;;  %2948 = vadd.xlane.f32.xlu1 %v2947_v26 }
 0x9d0   : > { %5183 = vmatprep.mubr.msk.f32.mxu1 %vm6096_vm5, %v6097_v1 }
 0x9d1   : > { %v5985_v4 = vpop.eup %5984 }
 0x9d2   : > { %5184 = vmatmul.mubr.msk.f32.gmra.mrb[36].mxu1 %vm1454_vm8, %v5985_v4  ;;  %v2950_v24 = vsel %vm1461_vm9, %v5985_v4, 0.0 }
 0x9d3   : > { %2951 = vadd.xlane.f32.xlu0 %v2950_v24  ;;  %3040 = vmatprep.mubr.f32.mxu1 %v6097_v1 }
 0x9d5   : > { %v5987_v20 = vpop.eup %5986 }
 0x9d6   : > { %5208 = vmatmul.mubr.msk.f32.vlgmr.msra.gmra.mrb[52].mxu0 %vm1454_vm8, %v5987_v20  ;;  %v3294_v60 = vsel %vm1454_vm8, %v5987_v20, 0.0 }
 0x9d7   : > { %3295 = vadd.xlane.f32.xlu1 %v3294_v60  ;;  %5210 = vmatprep.mubr.msk.f32.mxu0 %vm6096_vm5, %v6097_v1 }
 0x9f7   : > { %v3183_v19 = vpop.xlane.xlu0 %3182 }
 0x9f8   : > { %v3186_v7 = vsub.f32 %v7032_v55, %v3183_v19  ;;  %v2959_v55 = vld [vmem:[%s6273_s13 + $0x100] sm:$0xff] }
 0x9f9   : > { %v5417_v47 = vpack.c.bf16 %v2961_v13, %v2959_v55  ;;  %v6047_v55 = vld [vmem:[%s6292_s7] sm:$0xff] }
 0x9fa   : > { %v3191_v8 = vmul.f32 1.442695, %v3186_v7 }
 0x9fb   : > { %v3180_v10 = vpop.xlane.xlu1 %3179  ;;  %5418 = vmatpush1.bf16.msra.mxu1 %v5417_v47 }
 0x9fc   : > { %5988 = vpow2.f32 %v3191_v8  ;;  %v3185_v12 = vsub.f32 %v7039_v35, %v3180_v10  ;;  %v2965_v35 = vld [vmem:[%s6273_s13 + $0x130] sm:$0xff]  ;;  %5420 = vmatprep.subr.bf16.mxu1 %v5419_v30 }
 0x9fd   : > { %v5421_v36 = vpack.c.bf16 %v2965_v35, %v2963_v27  ;;  %v6048_v27 = vld [vmem:[%s6292_s7 + $0x18] sm:$0xff] }
 0x9fe   : > { %v3189_v15 = vmul.f32 1.442695, %v3185_v12 }
 0x9ff   : > { %5422 = vmatpush1.bf16.msra.mxu1 %v5421_v36  ;;  %v6049_v36 = vld [vmem:[%s6292_s7 + $0x10] sm:$0xff] }
 0xa00   : > { %5990 = vpow2.f32 %v3189_v15  ;;  %5431 = vmatprep.subr.bf16.mxu1 %v5430_v45 }
 0xa06   : > { %v5989_v61 = vpop.eup %5988 }
 0xa07   : > { %v3300_v59 = vsel %vm1461_vm9, %v5989_v61, 0.0 }
 0xa08   : > { %3301 = vadd.xlane.f32.xlu1 %v3300_v59  ;;  %v1319_v59 = vld [vmem:[%s7966_s22] sm:$0x3] }
 0xa0a   : > { %v5991_v11 = vpop.eup %5990 }
 0xa0b   : > { %5211 = vmatmul.mubr.msk.f32.gmra.mrb[54].mxu0 %vm1454_vm8, %v5991_v11  ;;  %v3297_v58 = vsel %vm1454_vm8, %v5991_v11, 0.0  ;;  %v1328_v11 = vrot.slane %v1319_v59, %v6495_v32 }
 0xa0c   : > { %3298 = vadd.xlane.f32.xlu0 %v3297_v58  ;;  %5213 = vmatprep.mubr.msk.f32.mxu0 %vm6096_vm5, %v6097_v1  ;;  %v1324_v58 = vrot.slane %v1319_v59, %v6498_v33  ;;  %v3538_v59 = vld [vmem:[%s6282_s3 + $0xf8] sm:$0xff] }
 0xa0d   : > { %v1332_v50 = vadd.f32 %v6046_v49, %v1328_v11  ;;  %v1334_v35 = vadd.f32 %v6048_v27, %v1328_v11  ;;  %v1336_v14 = vadd.f32 %v6051_v46, %v1328_v11  ;;  %v3534_v49 = vld [vmem:[%s6282_s3 + $0xd8] sm:$0xff]  ;;  %v3544_v27 = vld [vmem:[%s6282_s3 + $0x128] sm:$0xff] }
 0xa0e   : > { %v1333_v22 = vadd.f32 %v6049_v36, %v1324_v58  ;;  %v3546_v36 = vld [vmem:[%s6282_s3 + $0x138] sm:$0xff] }
 0xa0f   : > { %5214 = vmatmul.mubr.msk.f32.gmra.mrb[56].mxu0 %vm1454_vm8, %v5989_v61 }
 0xa58   : > { %v2946_v16 = vpop.xlane.xlu0 %2945 }
 0xa59   : > { %5992 = vrcp.f32 %v2946_v16  ;;  %v6050_v16 = vld [vmem:[%s6292_s7 + $0x20] sm:$0xf] }
 0xa5c   : > { %v2949_v18 = vpop.xlane.xlu1 %2948 }
 0xa5d   : > { %5994 = vrcp.f32 %v2949_v18  ;;  %v1335_v18 = vadd.f32 %v6050_v16, %v1324_v58  ;;  %v3543_v16 = vld [vmem:[%s6282_s3 + $0x120] sm:$0xff] }
 0xa60   : > { %v2952_v31 = vpop.xlane.xlu0 %2951 }
 0xa61   : > { %5996 = vrcp.f32 %v2952_v31 }
 0xa63   : > { %v5993_v6 = vpop.eup %5992 }
 0xa64   : > { %v3296_v5 = vpop.xlane.xlu1 %3295 }
 0xa65   : > { %5998 = vrcp.f32 %v3296_v5 }
 0xa67   : > { %v5995_v63 = vpop.eup %5994 }
 0xa6b   : > { %v5997_v54 = vpop.eup %5996 }
 0xa6f   : > { %v5999_v44 = vpop.eup %5998 }
 0xa95   : > { %v3302_v20 = vpop.xlane.xlu1 %3301 }
 0xa99   : > { %v3299_v24 = vpop.xlane.xlu0 %3298 }
 0xa9a   : > { %6000 = vrcp.f32 %v3299_v24  ;;  %v3522_v24 = vld [vmem:[%s6282_s3 + $0x78] sm:$0xff] }
 0xa9b   : > { %6002 = vrcp.f32 %v3302_v20  ;;  %v3528_v20 = vld [vmem:[%s6282_s3 + $0xa8] sm:$0xff] }
 0xa9d   : > { %v2930_v9 = vpop.f32.mrb[32].mxu1 }
 0xa9e   : > { %v2954_v28 = vmul.f32 %v5993_v6, %v2930_v9  ;;  %v5179_v57 = vpop.f32.mrb[33].mxu1 }
 0xaa0   : > { %4936 = vmatmul.mubr.msk.f32.vlgmr.msra.gmra.mrb[14].mxu1 %vm1346_vm6, %v2954_v28 }
 0xaa1   : > { %v2935_v48 = vpop.f32.mrb[34].mxu1  ;;  %3046 = vmatprep.mubr.f32.mxu1 %v6097_v1  ;;  %5433 = vmatpush1.bf16.msra.mxu1 %v5432_v56 }
 0xaa2   : > { %v2956_v42 = vmul.f32 %v5995_v63, %v2935_v48  ;;  %v5182_v62 = vpop.f32.mrb[35].mxu1  ;;  %5435 = vmatprep.subr.bf16.mxu1 %v5434_v21  ;;  %v3514_v63 = vld [vmem:[%s6282_s3 + $0x38] sm:$0xff] }
 0xaa3   : > { %v3510_v48 = vld [vmem:[%s6282_s3 + $0x18] sm:$0xff]  ;;  %v3507_v62 = vld [vmem:[%s6282_s3] sm:$0xff] }
 0xaa4   : > { %4937 = vmatmul.mubr.msk.f32.gmra.mrb[16].mxu1 %vm1346_vm6, %v2956_v42  ;;  %v6001_v60 = vpop.eup %6000  ;;  %v3516_v42 = vld [vmem:[%s6282_s3 + $0x48] sm:$0xff] }
 0xaa5   : > { %v2940_v34 = vpop.f32.mrb[36].mxu1  ;;  %3052 = vmatprep.mubr.f32.mxu1 %v6097_v1  ;;  %5437 = vmatpush1.bf16.msra.mxu1 %v5436_v51  ;;  %v6003_v10 = vpop.eup %6002  ;;  %v5438_v51 = vpack.c.bf16 %v3514_v63, %v3508_v40  ;;  %v3555_v63 = vld [vmem:[%s6282_s3 + $0x180] sm:$0xff] }
 0xaa6   : > { %v2958_v25 = vmul.f32 %v5997_v54, %v2940_v34  ;;  %v5185_v43 = vpop.f32.mrb[37].mxu1  ;;  %v3513_v54 = vld [vmem:[%s6282_s3 + $0x30] sm:$0xff]  ;;  %v5486_v34 = vpack.c.bf16 %v3516_v42, %v3510_v48 }
 0xaa7   : > { %v3509_v43 = vld [vmem:[%s6282_s3 + $0x10] sm:$0xff]  ;;  %5439 = vmatprep.subr.bf16.mxu0 %v5438_v51 }
 0xaa8   : > { %4938 = vmatmul.mubr.msk.f32.gmra.mrb[18].mxu1 %vm1346_vm6, %v2958_v25  ;;  %v5440_v25 = vpack.c.bf16 %v3513_v54, %v3507_v62  ;;  %5487 = vmatprep.subr.bf16.mxu1 %v5486_v34  ;;  %v3561_v48 = vld [vmem:[%s6282_s3 + $0x1b0] sm:$0xff]  ;;  %v3563_v62 = vld [vmem:[%s6282_s3 + $0x1c0] sm:$0xff]  ;;  %v3568_v54 = vld [vmem:[%s6282_s3 + $0x1e8] sm:$0xff] }
 0xaa9   : > { %v3280_v0 = vpop.f32.mrb[52].mxu0  ;;  %3390 = vmatprep.mubr.f32.mxu1 %v6097_v1  ;;  %v3557_v51 = vld [vmem:[%s6282_s3 + $0x190] sm:$0xff]  ;;  %v3574_v34 = vld [vmem:[%s6282_s3 + $0x218] sm:$0xff] }
 0xaaa   : > { %v3304_v26 = vmul.f32 %v5999_v44, %v3280_v0  ;;  %v5209_v4 = vpop.f32.mrb[53].mxu0  ;;  %v3515_v44 = vld [vmem:[%s6282_s3 + $0x40] sm:$0xff]  ;;  %v3520_v0 = vld [vmem:[%s6282_s3 + $0x68] sm:$0xff]  ;;  %5441 = vmatpush1.bf16.msra.mxu0 %v5440_v25  ;;  %v3570_v25 = vld [vmem:[%s6282_s3 + $0x1f8] sm:$0xff] }
 0xaab   : > { %v3526_v4 = vld [vmem:[%s6282_s3 + $0x98] sm:$0xff] }
 0xaac   : > { %4949 = vmatmul.mubr.msk.f32.vlgmr.msra.gmra.mrb[14].mxu1 %vm1346_vm6, %v3304_v26  ;;  %v5488_v26 = vpack.c.bf16 %v3515_v44, %v3509_v43  ;;  %v3576_v43 = vld [vmem:[%s6282_s3 + $0x228] sm:$0xff]  ;;  %v5456_v44 = vpack.c.bf16 %v3561_v48, %v3555_v63  ;;  %v3610_v63 = vld [vmem:[%s6282_s3 + $0x338] sm:$0xff] }
 0xaad   : > { %3396 = vmatprep.mubr.f32.mxu1 %v6097_v1  ;;  %v3606_v48 = vld [vmem:[%s6282_s3 + $0x318] sm:$0xff] }
 0xaae   : > { %5489 = vmatpush1.bf16.msra.mxu1 %v5488_v26  ;;  %v5458_v26 = vpack.c.bf16 %v3574_v34, %v3568_v54  ;;  %v3609_v54 = vld [vmem:[%s6282_s3 + $0x330] sm:$0xff] }
 0xade   : > { %v3285_v19 = vpop.f32.mrb[54].mxu0 }
 0xadf   : > { %v3306_v7 = vmul.f32 %v6001_v60, %v3285_v19  ;;  %v5212_v8 = vpop.f32.mrb[55].mxu0  ;;  %v5442_v60 = vpack.c.bf16 %v3526_v4, %v3520_v0  ;;  %v5490_v19 = vpack.c.bf16 %v3528_v20, %v3522_v24  ;;  %v5504_v0 = vpack.c.bf16 %v3563_v62, %v3557_v51  ;;  %v3567_v4 = vld [vmem:[%s6282_s3 + $0x1e0] sm:$0xff]  ;;  %v3573_v24 = vld [vmem:[%s6282_s3 + $0x210] sm:$0xff] }
 0xae0   : > { %v3525_v8 = vld [vmem:[%s6282_s3 + $0x90] sm:$0xff]  ;;  %v3603_v62 = vld [vmem:[%s6282_s3 + $0x300] sm:$0xff] }
 0xae1   : > { %4950 = vmatmul.mubr.msk.f32.gmra.mrb[16].mxu1 %vm1346_vm6, %v3306_v7  ;;  %v3519_v7 = vld [vmem:[%s6282_s3 + $0x60] sm:$0xff]  ;;  %5443 = vmatprep.subr.bf16.mxu0 %v5442_v60  ;;  %v3569_v20 = vld [vmem:[%s6282_s3 + $0x1f0] sm:$0xff]  ;;  %v5506_v60 = vpack.c.bf16 %v3576_v43, %v3570_v25  ;;  %v5472_v25 = vpack.c.bf16 %v3609_v54, %v3603_v62 }
 0xae2   : > { %v3290_v12 = vpop.f32.mrb[56].mxu0  ;;  %3402 = vmatprep.mubr.f32.mxu1 %v6097_v1  ;;  %v1331_v1 = vadd.f32 %v6047_v55, %v1324_v58  ;;  %5491 = vmatprep.subr.bf16.mxu1 %v5490_v19  ;;  %v3531_v55 = vld [vmem:[%s6282_s3 + $0xc0] sm:$0xff]  ;;  %v3605_v43 = vld [vmem:[%s6282_s3 + $0x310] sm:$0xff] }
 0xae3   : > { %v3308_v15 = vmul.f32 %v6003_v10, %v3290_v12  ;;  %v5215_v61 = vpop.f32.mrb[57].mxu0  ;;  %v3521_v10 = vld [vmem:[%s6282_s3 + $0x70] sm:$0xff]  ;;  %v5444_v12 = vpack.c.bf16 %v3525_v8, %v3519_v7  ;;  %v3575_v19 = vld [vmem:[%s6282_s3 + $0x220] sm:$0xff]  ;;  %v3580_v7 = vld [vmem:[%s6282_s3 + $0x248] sm:$0xff] }
 0xae4   : > { %v3532_v61 = vld [vmem:[%s6282_s3 + $0xc8] sm:$0xff]  ;;  %v3586_v8 = vld [vmem:[%s6282_s3 + $0x278] sm:$0xff] }
 0xae5   : > { %4951 = vmatmul.mubr.msk.f32.gmra.mrb[18].mxu1 %vm1346_vm6, %v3308_v15  ;;  %v3527_v15 = vld [vmem:[%s6282_s3 + $0xa0] sm:$0xff]  ;;  %v5446_v58 = vpack.c.bf16 %v3538_v59, %v3532_v61  ;;  %5445 = vmatpush1.bf16.msra.mxu0 %v5444_v12  ;;  %v3588_v12 = vld [vmem:[%s6282_s3 + $0x288] sm:$0xff]  ;;  %v5508_v61 = vpack.c.bf16 %v3575_v19, %v3569_v20  ;;  %v5462_v59 = vpack.c.bf16 %v3586_v8, %v3580_v7  ;;  %v3621_v7 = vld [vmem:[%s6282_s3 + $0x390] sm:$0xff] }
 0xae6   : > { %v5492_v11 = vpack.c.bf16 %v3527_v15, %v3521_v10  ;;  %v3582_v10 = vld [vmem:[%s6282_s3 + $0x258] sm:$0xff]  ;;  %v5460_v15 = vpack.c.bf16 %v3573_v24, %v3567_v4  ;;  %v3615_v19 = vld [vmem:[%s6282_s3 + $0x360] sm:$0xff] }
 0xae7   : > { %5447 = vmatprep.subr.bf16.mxu0 %v5446_v58  ;;  %v3585_v58 = vld [vmem:[%s6282_s3 + $0x270] sm:$0xff]  ;;  %v3622_v4 = vld [vmem:[%s6282_s3 + $0x398] sm:$0xff] }
 0xae8   : > { %5493 = vmatpush1.bf16.msra.mxu1 %v5492_v11  ;;  %v3579_v11 = vld [vmem:[%s6282_s3 + $0x240] sm:$0xff]  ;;  %v3618_v24 = vld [vmem:[%s6282_s3 + $0x378] sm:$0xff] }
 0xb7f   : > { %v3392_v52 = vpop.f32.mrb[14].mxu1 }
 0xb80   : > { %v3394_v13 = vpop.f32.mrb[15].mxu1  ;;  %v7131_v17 = vadd.f32 %v3392_v52, %v1331_v1  ;;  %v3537_v52 = vld [vmem:[%s6282_s3 + $0xf0] sm:$0xff] }
 0xb81   : > { %v7129_v47 = vadd.f32 %v3394_v13, %v1332_v50  ;;  %v3540_v50 = vld [vmem:[%s6282_s3 + $0x108] sm:$0xff]  ;;  %v3533_v13 = vld [vmem:[%s6282_s3 + $0xd0] sm:$0xff] }
 0xb82   : > { %v5494_v1 = vpack.c.bf16 %v3540_v50, %v3534_v49  ;;  %v5510_v49 = vpack.c.bf16 %v3588_v12, %v3582_v10  ;;  %v3581_v50 = vld [vmem:[%s6282_s3 + $0x250] sm:$0xff]  ;;  %v5476_v10 = vpack.c.bf16 %v3621_v7, %v3615_v19  ;;  %v4168_v7 = vld [vmem:[%s6297_s20 + $0x208] sm:$0xff] }
 0xb83   : > { %v3417_v3 = vsel %vm823_vm2, %v7129_v47, 0.0  ;;  %v3617_v12 = vld [vmem:[%s6282_s3 + $0x370] sm:$0xff] }
 0xb84   : > { %v3418_v30 = vadd.f32 %v7131_v17, %v3417_v3  ;;  %v3539_v3 = vld [vmem:[%s6282_s3 + $0x100] sm:$0xff]  ;;  %5495 = vmatprep.subr.bf16.mxu1 %v5494_v1  ;;  %v5464_v1 = vpack.c.bf16 %v3585_v58, %v3579_v11  ;;  %v3634_v11 = vld [vmem:[%s6282_s3 + $0x3f8] sm:$0xff] }
 0xb85   : > { %v3630_v58 = vld [vmem:[%s6282_s3 + $0x3d8] sm:$0xff] }
 0xb86   : > { %3419 = vadd.xlane.f32.xlu0 %v3418_v30  ;;  %v5448_v30 = vpack.c.bf16 %v3537_v52, %v3531_v55  ;;  %v3587_v55 = vld [vmem:[%s6282_s3 + $0x280] sm:$0xff] }
 0xb87   : > { %v5512_v52 = vpack.c.bf16 %v3587_v55, %v3581_v50  ;;  %v3636_v50 = vld [vmem:[%s6282_s3 + $0x408] sm:$0xff]  ;;  %v3627_v55 = vld [vmem:[%s6282_s3 + $0x3c0] sm:$0xff] }
 0xb88   : > { %5449 = vmatpush1.bf16.msra.mxu0 %v5448_v30 }
 0xbb4   : > { %v3398_v41 = vpop.f32.mrb[16].mxu1 }
 0xbb5   : > { %v3400_v45 = vpop.f32.mrb[17].mxu1  ;;  %v7142_v38 = vadd.f32 %v3398_v41, %v1333_v22  ;;  %v5496_v22 = vpack.c.bf16 %v3539_v3, %v3533_v13 }
 0xbb6   : > { %v7139_v31 = vadd.f32 %v3400_v45, %v1334_v35  ;;  %v3550_v35 = vld [vmem:[%s6282_s3 + $0x158] sm:$0xff]  ;;  %v3552_v45 = vld [vmem:[%s6282_s3 + $0x168] sm:$0xff] }
 0xbb7   : > { %v5450_v41 = vpack.c.bf16 %v3550_v35, %v3544_v27  ;;  %v5498_v46 = vpack.c.bf16 %v3552_v45, %v3546_v36  ;;  %5497 = vmatpush1.bf16.msra.mxu1 %v5496_v22  ;;  %v3592_v45 = vld [vmem:[%s6282_s3 + $0x2a8] sm:$0xff] }
 0xbb8   : > { %v3404_v53 = vpop.f32.mrb[18].mxu1  ;;  %v3421_v5 = vsel %vm823_vm2, %v7139_v31, 0.0 }
 0xbb9   : > { %v7146_v6 = vadd.f32 %v3404_v53, %v1335_v18  ;;  %v3406_v9 = vpop.f32.mrb[19].mxu1  ;;  %v3422_v56 = vadd.f32 %v7142_v38, %v3421_v5  ;;  %v3549_v18 = vld [vmem:[%s6282_s3 + $0x150] sm:$0xff]  ;;  %v3551_v53 = vld [vmem:[%s6282_s3 + $0x160] sm:$0xff]  ;;  %v3556_v5 = vld [vmem:[%s6282_s3 + $0x188] sm:$0xff]  ;;  %5451 = vmatprep.subr.bf16.mxu0 %v5450_v41  ;;  %5499 = vmatprep.subr.bf16.mxu1 %v5498_v46 }
 0xbba   : > { %v7149_v28 = vadd.f32 %v3406_v9, %v1336_v14  ;;  %v3545_v14 = vld [vmem:[%s6282_s3 + $0x130] sm:$0xff]  ;;  %v3562_v9 = vld [vmem:[%s6282_s3 + $0x1b8] sm:$0xff] }
 0xbbb   : > { %3423 = vadd.xlane.f32.xlu1 %v3422_v56  ;;  %v3425_v57 = vsel %vm832_vm3, %v7146_v6, 0.0  ;;  %v3558_v56 = vld [vmem:[%s6282_s3 + $0x198] sm:$0xff]  ;;  %v5454_v40 = vpack.c.bf16 %v3562_v9, %v3556_v5  ;;  %v3597_v5 = vld [vmem:[%s6282_s3 + $0x2d0] sm:$0xff] }
 0xbbc   : > { %v3426_v21 = vsel %vm834_vm4, %v7149_v28, 0.0 }
 0xbbd   : > { %v3427_v23 = vadd.f32 %v3426_v21, %v3425_v57  ;;  %v3564_v57 = vld [vmem:[%s6282_s3 + $0x1c8] sm:$0xff]  ;;  %v5452_v21 = vpack.c.bf16 %v3549_v18, %v3543_v16  ;;  %v3598_v16 = vld [vmem:[%s6282_s3 + $0x2d8] sm:$0xff] }
 0xbbe   : > { %v5502_v42 = vpack.c.bf16 %v3564_v57, %v3558_v56  ;;  %v3594_v18 = vld [vmem:[%s6282_s3 + $0x2b8] sm:$0xff]  ;;  %v5466_v46 = vpack.c.bf16 %v3598_v16, %v3592_v45  ;;  %v3593_v57 = vld [vmem:[%s6282_s3 + $0x2b0] sm:$0xff]  ;;  %v3648_v16 = vld [vmem:[%s6282_s3 + $0x468] sm:$0xff] }
 0xbbf   : > { %3428 = vadd.xlane.f32.xlu0 %v3427_v23  ;;  %v5500_v23 = vpack.c.bf16 %v3551_v53, %v3545_v14  ;;  %5453 = vmatpush1.bf16.msra.mxu0 %v5452_v21  ;;  %v3600_v14 = vld [vmem:[%s6282_s3 + $0x2e8] sm:$0xff]  ;;  %v3591_v53 = vld [vmem:[%s6282_s3 + $0x2a0] sm:$0xff]  ;;  %v3642_v45 = vld [vmem:[%s6282_s3 + $0x438] sm:$0xff] }
 0xbc0   : > { %5455 = vmatprep.subr.bf16.mxu0 %v5454_v40  ;;  %v5514_v9 = vpack.c.bf16 %v3600_v14, %v3594_v18  ;;  %v5468_v56 = vpack.c.bf16 %v3597_v5, %v3591_v53  ;;  %v3599_v21 = vld [vmem:[%s6282_s3 + $0x2e0] sm:$0xff]  ;;  %v3604_v40 = vld [vmem:[%s6282_s3 + $0x308] sm:$0xff]  ;;  %v3645_v53 = vld [vmem:[%s6282_s3 + $0x450] sm:$0xff] }
 0xbc1   : > { %5501 = vmatpush1.bf16.msra.mxu1 %v5500_v23  ;;  %v5516_v23 = vpack.c.bf16 %v3599_v21, %v3593_v57  ;;  %v5470_v51 = vpack.c.bf16 %v3610_v63, %v3604_v40  ;;  %v3639_v14 = vld [vmem:[%s6282_s3 + $0x420] sm:$0xff]  ;;  %v3641_v5 = vld [vmem:[%s6282_s3 + $0x430] sm:$0xff]  ;;  %v3512_v21 = vld [vmem:[%s6282_s3 + $0x28] sm:$0xff] }
 0xbc2   : > { %5503 = vmatprep.subr.bf16.mxu1 %v5502_v42  ;;  %v3612_v42 = vld [vmem:[%s6282_s3 + $0x348] sm:$0xff] }
 0xbc3   : > { %5457 = vmatpush1.bf16.msra.mxu0 %v5456_v44  ;;  %v5518_v34 = vpack.c.bf16 %v3612_v42, %v3606_v48  ;;  %v3611_v44 = vld [vmem:[%s6282_s3 + $0x340] sm:$0xff] }
 0xbc4   : > { %5459 = vmatprep.subr.bf16.mxu0 %v5458_v26  ;;  %v3616_v26 = vld [vmem:[%s6282_s3 + $0x368] sm:$0xff] }
 0xbc5   : > { %5505 = vmatpush1.bf16.msra.mxu1 %v5504_v0  ;;  %v5520_v0 = vpack.c.bf16 %v3611_v44, %v3605_v43  ;;  %v5474_v20 = vpack.c.bf16 %v3622_v4, %v3616_v26 }
 0xbc6   : > { %5507 = vmatprep.subr.bf16.mxu1 %v5506_v60  ;;  %v3624_v60 = vld [vmem:[%s6282_s3 + $0x3a8] sm:$0xff] }
 0xbc7   : > { %5461 = vmatpush1.bf16.msra.mxu0 %v5460_v15  ;;  %v5522_v8 = vpack.c.bf16 %v3624_v60, %v3618_v24  ;;  %v3623_v15 = vld [vmem:[%s6282_s3 + $0x3a0] sm:$0xff] }
 0xbc8   : > { %5463 = vmatprep.subr.bf16.mxu0 %v5462_v59  ;;  %v3628_v59 = vld [vmem:[%s6282_s3 + $0x3c8] sm:$0xff] }
 0xbc9   : > { %5509 = vmatpush1.bf16.msra.mxu1 %v5508_v61  ;;  %v5524_v61 = vpack.c.bf16 %v3623_v15, %v3617_v12 }
 0xbca   : > { %5511 = vmatprep.subr.bf16.mxu1 %v5510_v49  ;;  %v5478_v49 = vpack.c.bf16 %v3634_v11, %v3628_v59  ;;  %v3415_v59 = vld [vmem:[%s7967_s21] sm:$0x3] }
 0xbcb   : > { %5465 = vmatpush1.bf16.msra.mxu0 %v5464_v1  ;;  %v3633_v1 = vld [vmem:[%s6282_s3 + $0x3f0] sm:$0xff]  ;;  %v3416_v11 = vld [vmem:[%s7969_s17] sm:$0x3] }
 0xbcc   : > { %5467 = vmatprep.subr.bf16.mxu0 %v5466_v46  ;;  %v5530_v46 = vpack.c.bf16 %v3648_v16, %v3642_v45  ;;  %v3530_v45 = vld [vmem:[%s6282_s3 + $0xb8] sm:$0xff]  ;;  %v4172_v16 = vld [vmem:[%s6297_s20 + $0x228] sm:$0xff] }
 0xbcd   : > { %5513 = vmatpush1.bf16.msra.mxu1 %v5512_v52  ;;  %v5526_v52 = vpack.c.bf16 %v3636_v50, %v3630_v58  ;;  %v7300_v58 = vrot.slane %v3415_v59, %v6498_v33 }
 0xbce   : > { %5515 = vmatprep.subr.bf16.mxu1 %v5514_v9  ;;  %v5484_v9 = vpack.c.bf16 %v3645_v53, %v3639_v14 }
 0xbcf   : > { %5469 = vmatpush1.bf16.msra.mxu0 %v5468_v56  ;;  %v3647_v56 = vld [vmem:[%s6282_s3 + $0x460] sm:$0xff] }
 0xbd0   : > { %5471 = vmatprep.subr.bf16.mxu0 %v5470_v51  ;;  %v5532_v57 = vpack.c.bf16 %v3647_v56, %v3641_v5  ;;  %v3523_v5 = vld [vmem:[%s6282_s3 + $0x80] sm:$0xff] }
 0xbd1   : > { %5517 = vmatpush1.bf16.msra.mxu1 %v5516_v23  ;;  %v3518_v23 = vld [vmem:[%s6282_s3 + $0x58] sm:$0xff] }
 0xbd2   : > { %5519 = vmatprep.subr.bf16.mxu1 %v5518_v34  ;;  %v5534_v40 = vpack.c.bf16 %v3518_v23, %v3512_v21  ;;  %v3536_v21 = vld [vmem:[%s6282_s3 + $0xe8] sm:$0xff] }
 0xbd3   : > { %5473 = vmatpush1.bf16.msra.mxu0 %v5472_v25 }
 0xbd4   : > { %5475 = vmatprep.subr.bf16.mxu0 %v5474_v20 }
 0xbd5   : > { %5521 = vmatpush1.bf16.msra.mxu1 %v5520_v0 }
 0xbd6   : > { %5523 = vmatprep.subr.bf16.mxu1 %v5522_v8  ;;  %v4170_v8 = vld [vmem:[%s6297_s20 + $0x218] sm:$0xff] }
 0xbd7   : > { %5477 = vmatpush1.bf16.msra.mxu0 %v5476_v10  ;;  %v5646_v10 = vpack.c.bf16 %v4170_v8, %v4168_v7  ;;  %v3554_v7 = vld [vmem:[%s6282_s3 + $0x178] sm:$0xff]  ;;  %v4180_v8 = vld [vmem:[%s6297_s20 + $0x268] sm:$0xff] }
 0xbd8   : > { %5479 = vmatprep.subr.bf16.mxu0 %v5478_v49  ;;  %v7303_v49 = vrot.slane %v3415_v59, %v6495_v32 }
 0xbd9   : > { %5525 = vmatpush1.bf16.msra.mxu1 %v5524_v61 }
 0xbda   : > { %5527 = vmatprep.subr.bf16.mxu1 %v5526_v52  ;;  %v7308_v52 = vrot.slane %v3416_v11, %v6498_v33 }
 0xc13   : > { %v3420_v13 = vpop.xlane.xlu0 %3419 }
 0xc14   : > { %v3430_v3 = vmul.f32 0.0052083335, %v3420_v13  ;;  %v5480_v13 = vpack.c.bf16 %v3633_v1, %v3627_v55 }
 0xc16   : > { %v7212_v30 = vsub.f32 %v7131_v17, %v3430_v3  ;;  %v7215_v27 = vsub.f32 %v7129_v47, %v3430_v3  ;;  %v3629_v3 = vld [vmem:[%s6282_s3 + $0x3d0] sm:$0xff]  ;;  %5481 = vmatpush1.bf16.msra.mxu0 %v5480_v13  ;;  %v7311_v13 = vrot.slane %v3416_v11, %v6495_v32 }
 0xc18   : > { %v3439_v35 = vmul.f32 %v7212_v30, %v7212_v30  ;;  %v3440_v36 = vmul.f32 %v7215_v27, %v7215_v27 }
 0xc1a   : > { %v3445_v22 = vsel %vm823_vm2, %v3440_v36, 0.0  ;;  %v3640_v36 = vld [vmem:[%s6282_s3 + $0x428] sm:$0xff] }
 0xc1b   : > { %v3446_v41 = vadd.f32 %v3445_v22, %v3439_v35  ;;  %v3635_v35 = vld [vmem:[%s6282_s3 + $0x400] sm:$0xff] }
 0xc1c   : > { %v5528_v22 = vpack.c.bf16 %v3635_v35, %v3629_v3  ;;  %v3511_v3 = vld [vmem:[%s6282_s3 + $0x20] sm:$0xff]  ;;  %v3517_v35 = vld [vmem:[%s6282_s3 + $0x50] sm:$0xff] }
 0xc1d   : > { %3447 = vadd.xlane.f32.xlu1 %v3446_v41  ;;  %v3646_v41 = vld [vmem:[%s6282_s3 + $0x458] sm:$0xff]  ;;  %v5536_v53 = vpack.c.bf16 %v3517_v35, %v3511_v3  ;;  %v4181_v3 = vld [vmem:[%s6297_s20 + $0x270] sm:$0xff] }
 0xc1e   : > { %v5482_v18 = vpack.c.bf16 %v3646_v41, %v3640_v36  ;;  %5529 = vmatpush1.bf16.msra.mxu1 %v5528_v22  ;;  %v3524_v36 = vld [vmem:[%s6282_s3 + $0x88] sm:$0xff]  ;;  %v4167_v22 = vld [vmem:[%s6297_s20 + $0x200] sm:$0xff]  ;;  %v4169_v41 = vld [vmem:[%s6297_s20 + $0x210] sm:$0xff] }
 0xc1f   : > { %5531 = vmatprep.subr.bf16.mxu1 %v5530_v46  ;;  %v5648_v56 = vpack.c.bf16 %v4169_v41, %v4167_v22  ;;  %v3566_v35 = vld [vmem:[%s6282_s3 + $0x1d8] sm:$0xff] }
 0xc20   : > { %5483 = vmatprep.subr.bf16.mxu0 %v5482_v18  ;;  %v4174_v18 = vld [vmem:[%s6297_s20 + $0x238] sm:$0xff] }
 0xc21   : > { %5485 = vmatpush1.bf16.msra.mxu0 %v5484_v9  ;;  %v3529_v9 = vld [vmem:[%s6282_s3 + $0xb0] sm:$0xff]  ;;  %v5650_v23 = vpack.c.bf16 %v4174_v18, %v4172_v16  ;;  %v4186_v22 = vld [vmem:[%s6297_s20 + $0x298] sm:$0xff]  ;;  %v3572_v18 = vld [vmem:[%s6282_s3 + $0x208] sm:$0xff] }
 0xc22   : > { %5533 = vmatpush1.bf16.msra.mxu1 %v5532_v57  ;;  %5535 = vmatprep.subr.bf16.mxu0 %v5534_v40  ;;  %v5538_v57 = vpack.c.bf16 %v3530_v45, %v3524_v36  ;;  %v4171_v40 = vld [vmem:[%s6297_s20 + $0x220] sm:$0xff]  ;;  %v4184_v36 = vld [vmem:[%s6297_s20 + $0x288] sm:$0xff] }
 0xc23   : > { %5647 = vmatprep.subr.bf16.mxu1 %v5646_v10  ;;  %v4182_v10 = vld [vmem:[%s6297_s20 + $0x278] sm:$0xff] }
 0xc48   : > { %v3424_v63 = vpop.xlane.xlu1 %3423 }
 0xc49   : > { %v3431_v48 = vmul.f32 0.0052083335, %v3424_v63  ;;  %v4173_v63 = vld [vmem:[%s6297_s20 + $0x230] sm:$0xff] }
 0xc4b   : > { %v7265_v51 = vsub.f32 %v7142_v38, %v3431_v48  ;;  %v7268_v42 = vsub.f32 %v7139_v31, %v3431_v48  ;;  %v3542_v48 = vld [vmem:[%s6282_s3 + $0x118] sm:$0xff] }
 0xc4c   : > { %v3429_v62 = vpop.xlane.xlu0 %3428 }
 0xc4d   : > { %v3432_v54 = vmul.f32 0.0052083335, %v3429_v62  ;;  %v3441_v34 = vmul.f32 %v7265_v51, %v7265_v51  ;;  %v3442_v25 = vmul.f32 %v7268_v42, %v7268_v42  ;;  %v4176_v62 = vld [vmem:[%s6297_s20 + $0x248] sm:$0xff] }
 0xc4f   : > { %v7275_v43 = vsub.f32 %v7146_v6, %v3432_v54  ;;  %v7278_v44 = vsub.f32 %v7149_v28, %v3432_v54  ;;  %v3449_v0 = vsel %vm823_vm2, %v3442_v25, 0.0  ;;  %v4178_v54 = vld [vmem:[%s6297_s20 + $0x258] sm:$0xff]  ;;  %v3535_v25 = vld [vmem:[%s6282_s3 + $0xe0] sm:$0xff] }
 0xc50   : > { %v3450_v26 = vadd.f32 %v3449_v0, %v3441_v34  ;;  %v5540_v34 = vpack.c.bf16 %v3529_v9, %v3523_v5  ;;  %v3541_v0 = vld [vmem:[%s6282_s3 + $0x110] sm:$0xff]  ;;  %v4183_v5 = vld [vmem:[%s6297_s20 + $0x280] sm:$0xff] }
 0xc51   : > { %v3443_v4 = vmul.f32 %v7275_v43, %v7275_v43  ;;  %v3444_v24 = vmul.f32 %v7278_v44, %v7278_v44  ;;  %v4185_v9 = vld [vmem:[%s6297_s20 + $0x290] sm:$0xff] }
 0xc52   : > { %3451 = vadd.xlane.f32.xlu0 %v3450_v26  ;;  %v5652_v26 = vpack.c.bf16 %v4173_v63, %v4171_v40  ;;  %v3571_v40 = vld [vmem:[%s6282_s3 + $0x200] sm:$0xff]  ;;  %v3577_v63 = vld [vmem:[%s6282_s3 + $0x230] sm:$0xff] }
 0xc53   : > { %v3453_v20 = vsel %vm832_vm3, %v3443_v4, 0.0  ;;  %v3454_v60 = vsel %vm834_vm4, %v3444_v24, 0.0  ;;  %v5542_v4 = vpack.c.bf16 %v3542_v48, %v3536_v21  ;;  %v3548_v24 = vld [vmem:[%s6282_s3 + $0x148] sm:$0xff]  ;;  %v4190_v21 = vld [vmem:[%s6297_s20 + $0x2b8] sm:$0xff]  ;;  %v5664_v48 = vpack.c.bf16 %v4185_v9, %v4183_v5  ;;  %v3607_v5 = vld [vmem:[%s6282_s3 + $0x320] sm:$0xff] }
 0xc54   : > { %v3455_v19 = vadd.f32 %v3454_v60, %v3453_v20  ;;  %v5654_v20 = vpack.c.bf16 %v4178_v54, %v4176_v62  ;;  %v4175_v60 = vld [vmem:[%s6297_s20 + $0x240] sm:$0xff]  ;;  %v5546_v11 = vpack.c.bf16 %v3554_v7, %v3548_v24  ;;  %v3584_v54 = vld [vmem:[%s6282_s3 + $0x268] sm:$0xff]  ;;  %v4194_v24 = vld [vmem:[%s6297_s20 + $0x2d8] sm:$0xff] }
 0xc56   : > { %3456 = vadd.xlane.f32.xlu1 %v3455_v19  ;;  %v4177_v19 = vld [vmem:[%s6297_s20 + $0x250] sm:$0xff] }
 0xc57   : > { %v5656_v59 = vpack.c.bf16 %v4177_v19, %v4175_v60  ;;  %v3583_v60 = vld [vmem:[%s6282_s3 + $0x260] sm:$0xff]  ;;  %v3589_v19 = vld [vmem:[%s6282_s3 + $0x290] sm:$0xff] }
 0xcaa   : > { %v3448_v12 = vpop.xlane.xlu1 %3447 }
 0xcab   : > { %v3458_v15 = vmul.f32 0.0052083335, %v3448_v12  ;;  %v5544_v12 = vpack.c.bf16 %v3541_v0, %v3535_v25  ;;  %v4187_v25 = vld [vmem:[%s6297_s20 + $0x2a0] sm:$0xff]  ;;  %v4189_v0 = vld [vmem:[%s6297_s20 + $0x2b0] sm:$0xff] }
 0xcac   : > { %v5668_v7 = vpack.c.bf16 %v4189_v0, %v4187_v25  ;;  %v3619_v0 = vld [vmem:[%s6282_s3 + $0x380] sm:$0xff] }
 0xcad   : > { %v3461_v61 = vadd.f32 1e-05, %v3458_v15  ;;  %v3547_v15 = vld [vmem:[%s6282_s3 + $0x140] sm:$0xff] }
 0xcaf   : > { %6004 = vrsqrt.f32 %v3461_v61  ;;  %v3553_v61 = vld [vmem:[%s6282_s3 + $0x170] sm:$0xff] }
 0xcb0   : > { %v5548_v41 = vpack.c.bf16 %v3553_v61, %v3547_v15  ;;  %v4191_v15 = vld [vmem:[%s6297_s20 + $0x2c0] sm:$0xff]  ;;  %v4193_v61 = vld [vmem:[%s6297_s20 + $0x2d0] sm:$0xff] }
 0xcb9   : > { %v6005_v50 = vpop.eup %6004 }
 0xcba   : > { %v3467_v55 = vmul.f32 %v6005_v50, %v7212_v30  ;;  %v3468_v1 = vmul.f32 %v6005_v50, %v7215_v27  ;;  %v3560_v50 = vld [vmem:[%s6282_s3 + $0x1a8] sm:$0xff] }
 0xcbb   : > { %v5550_v16 = vpack.c.bf16 %v3566_v35, %v3560_v50  ;;  %v4198_v50 = vld [vmem:[%s6297_s20 + $0x2f8] sm:$0xff]  ;;  %v5672_v35 = vpack.c.bf16 %v4193_v61, %v4191_v15  ;;  %v3644_v61 = vld [vmem:[%s6282_s3 + $0x448] sm:$0xff] }
 0xcbc   : > { %v3485_v30 = vmul.f32 %v7303_v49, %v3468_v1  ;;  %v3484_v27 = vmul.f32 %v7300_v58, %v3467_v55  ;;  %v5658_v55 = vpack.c.bf16 %v4182_v10, %v4180_v8  ;;  %v4179_v1 = vld [vmem:[%s6297_s20 + $0x260] sm:$0xff]  ;;  %v3596_v10 = vld [vmem:[%s6282_s3 + $0x2c8] sm:$0xff] }
 0xcbd   : > { %v5660_v45 = vpack.c.bf16 %v4181_v3, %v4179_v1  ;;  %v3595_v1 = vld [vmem:[%s6282_s3 + $0x2c0] sm:$0xff]  ;;  %v3601_v3 = vld [vmem:[%s6282_s3 + $0x2f0] sm:$0xff] }
 0xcbe   : > { %v7324_v46 = vadd.f32 %v7311_v13, %v3485_v30  ;;  %v7327_v14 = vadd.f32 %v7308_v52, %v3484_v27  ;;  %v3559_v30 = vld [vmem:[%s6282_s3 + $0x1a0] sm:$0xff]  ;;  %v3565_v27 = vld [vmem:[%s6282_s3 + $0x1d0] sm:$0xff] }
 0xcc0   : > { %4952 = vmatprep.mubr.msk.f32.mxu0 %vm823_vm2, %v7324_v46  ;;  %4955 = vmatprep.mubr.msk.f32.mxu1 %vm823_vm2, %v7324_v46 }
 0xcc1   : > { %3757 = vmatmul.mubr.f32.vlgmr.msra.gmra.mrb[58].mxu0 %v7327_v14  ;;  %3840 = vmatmul.mubr.f32.vlgmr.msra.gmra.mrb[38].mxu1 %v7327_v14 }
 0xcc2   : > { %5537 = vmatpush1.bf16.msra.mxu0 %v5536_v53  ;;  %5649 = vmatpush1.bf16.msra.mxu1 %v5648_v56  ;;  %v5662_v53 = vpack.c.bf16 %v4186_v22, %v4184_v36  ;;  %v3578_v56 = vld [vmem:[%s6282_s3 + $0x238] sm:$0xff]  ;;  %v3608_v22 = vld [vmem:[%s6282_s3 + $0x328] sm:$0xff] }
 0xcc3   : > { %5539 = vmatprep.subr.bf16.mxu0 %v5538_v57  ;;  %5651 = vmatprep.subr.bf16.mxu1 %v5650_v23  ;;  %v4188_v57 = vld [vmem:[%s6297_s20 + $0x2a8] sm:$0xff]  ;;  %v5552_v23 = vpack.c.bf16 %v3565_v27, %v3559_v30  ;;  %v5554_v62 = vpack.c.bf16 %v3578_v56, %v3572_v18  ;;  %v4195_v30 = vld [vmem:[%s6297_s20 + $0x2e0] sm:$0xff]  ;;  %v4197_v27 = vld [vmem:[%s6297_s20 + $0x2f0] sm:$0xff] }
 0xcc4   : > { %v4202_v18 = vld [vmem:[%s6297_s20 + $0x318] sm:$0xff]  ;;  %v5676_v9 = vpack.c.bf16 %v4197_v27, %v4195_v30 }
 0xcc6   : > { %5541 = vmatpush1.bf16.msra.mxu0 %v5540_v34  ;;  %5653 = vmatpush1.bf16.msra.mxu1 %v5652_v26  ;;  %v5666_v34 = vpack.c.bf16 %v4190_v21, %v4188_v57  ;;  %v3590_v26 = vld [vmem:[%s6282_s3 + $0x298] sm:$0xff]  ;;  %v3613_v57 = vld [vmem:[%s6282_s3 + $0x350] sm:$0xff] }
 0xcc7   : > { %5543 = vmatprep.subr.bf16.mxu0 %v5542_v4  ;;  %5655 = vmatprep.subr.bf16.mxu1 %v5654_v20  ;;  %v4192_v4 = vld [vmem:[%s6297_s20 + $0x2c8] sm:$0xff]  ;;  %v5556_v20 = vpack.c.bf16 %v3577_v63, %v3571_v40  ;;  %v5558_v8 = vpack.c.bf16 %v3590_v26, %v3584_v54  ;;  %v4201_v40 = vld [vmem:[%s6297_s20 + $0x310] sm:$0xff] }
 0xcc8   : > { %v3620_v63 = vld [vmem:[%s6282_s3 + $0x388] sm:$0xff]  ;;  %v3625_v26 = vld [vmem:[%s6282_s3 + $0x3b0] sm:$0xff] }
 0xcca   : > { %5545 = vmatpush1.bf16.msra.mxu0 %v5544_v12  ;;  %5657 = vmatpush1.bf16.msra.mxu1 %v5656_v59  ;;  %v5670_v12 = vpack.c.bf16 %v4194_v24, %v4192_v4  ;;  %v3602_v59 = vld [vmem:[%s6282_s3 + $0x2f8] sm:$0xff]  ;;  %v3632_v24 = vld [vmem:[%s6282_s3 + $0x3e8] sm:$0xff] }
 0xccb   : > { %5547 = vmatprep.subr.bf16.mxu0 %v5546_v11  ;;  %5659 = vmatprep.subr.bf16.mxu1 %v5658_v55  ;;  %v4196_v11 = vld [vmem:[%s6297_s20 + $0x2e8] sm:$0xff]  ;;  %v5560_v55 = vpack.c.bf16 %v3589_v19, %v3583_v60  ;;  %v5562_v36 = vpack.c.bf16 %v3602_v59, %v3596_v10  ;;  %v5572_v19 = vpack.c.bf16 %v3625_v26, %v3619_v0  ;;  %v3631_v10 = vld [vmem:[%s6282_s3 + $0x3e0] sm:$0xff]  ;;  %v3650_v59 = vld [vmem:[%s6282_s3 + $0x478] sm:$0xff] }
 0xccc   : > { %v4116_v0 = vld [vmem:[%s6297_s20 + $0x68] sm:$0xff]  ;;  %v4118_v26 = vld [vmem:[%s6297_s20 + $0x78] sm:$0xff] }
 0xcce   : > { %5549 = vmatpush1.bf16.msra.mxu0 %v5548_v41  ;;  %5661 = vmatpush1.bf16.msra.mxu1 %v5660_v45  ;;  %v5674_v41 = vpack.c.bf16 %v4198_v50, %v4196_v11  ;;  %v3614_v45 = vld [vmem:[%s6282_s3 + $0x358] sm:$0xff] }
 0xccf   : > { %5551 = vmatprep.subr.bf16.mxu0 %v5550_v16  ;;  %5663 = vmatprep.subr.bf16.mxu1 %v5662_v53  ;;  %v4200_v16 = vld [vmem:[%s6297_s20 + $0x308] sm:$0xff]  ;;  %v5564_v53 = vpack.c.bf16 %v3601_v3, %v3595_v1  ;;  %v5566_v56 = vpack.c.bf16 %v3614_v45, %v3608_v22  ;;  %v3643_v1 = vld [vmem:[%s6282_s3 + $0x440] sm:$0xff]  ;;  %v3649_v3 = vld [vmem:[%s6282_s3 + $0x470] sm:$0xff] }
 0xcd0   : > { %v5678_v21 = vpack.c.bf16 %v4202_v18, %v4200_v16  ;;  %v5580_v22 = vpack.c.bf16 %v3649_v3, %v3643_v1  ;;  %v4128_v1 = vld [vmem:[%s6297_s20 + $0xc8] sm:$0xff]  ;;  %v4130_v3 = vld [vmem:[%s6297_s20 + $0xd8] sm:$0xff] }
 0xcd2   : > { %5553 = vmatpush1.bf16.msra.mxu0 %v5552_v23  ;;  %5665 = vmatpush1.bf16.msra.mxu1 %v5664_v48  ;;  %v4199_v23 = vld [vmem:[%s6297_s20 + $0x300] sm:$0xff]  ;;  %v3626_v48 = vld [vmem:[%s6282_s3 + $0x3b8] sm:$0xff] }
 0xcd3   : > { %5555 = vmatprep.subr.bf16.mxu0 %v5554_v62  ;;  %5667 = vmatprep.subr.bf16.mxu1 %v5666_v34  ;;  %v5568_v62 = vpack.c.bf16 %v3613_v57, %v3607_v5  ;;  %v5680_v54 = vpack.c.bf16 %v4201_v40, %v4199_v23  ;;  %v5570_v25 = vpack.c.bf16 %v3626_v48, %v3620_v63  ;;  %v4103_v23 = vld [vmem:[%s6297_s20] sm:$0xff]  ;;  %v4108_v40 = vld [vmem:[%s6297_s20 + $0x28] sm:$0xff]  ;;  %v4109_v63 = vld [vmem:[%s6297_s20 + $0x30] sm:$0xff] }
 0xcd4   : > { %v4112_v48 = vld [vmem:[%s6297_s20 + $0x48] sm:$0xff] }
 0xcd6   : > { %5557 = vmatpush1.bf16.msra.mxu0 %v5556_v20  ;;  %5669 = vmatpush1.bf16.msra.mxu1 %v5668_v7  ;;  %v3638_v20 = vld [vmem:[%s6282_s3 + $0x418] sm:$0xff] }
 0xcd7   : > { %5559 = vmatprep.subr.bf16.mxu0 %v5558_v8  ;;  %5671 = vmatprep.subr.bf16.mxu1 %v5670_v12  ;;  %v5574_v8 = vpack.c.bf16 %v3638_v20, %v3632_v24  ;;  %v3637_v12 = vld [vmem:[%s6282_s3 + $0x410] sm:$0xff]  ;;  %v4115_v24 = vld [vmem:[%s6297_s20 + $0x60] sm:$0xff] }
 0xcd8   : > { %v5576_v50 = vpack.c.bf16 %v3637_v12, %v3631_v10  ;;  %v4117_v20 = vld [vmem:[%s6297_s20 + $0x70] sm:$0xff]  ;;  %v4119_v10 = vld [vmem:[%s6297_s20 + $0x80] sm:$0xff] }
 0xcd9   : > { %v4121_v12 = vld [vmem:[%s6297_s20 + $0x90] sm:$0xff] }
 0xcda   : > { %5561 = vmatpush1.bf16.msra.mxu0 %v5560_v55  ;;  %5673 = vmatpush1.bf16.msra.mxu1 %v5672_v35  ;;  %v5578_v55 = vpack.c.bf16 %v3650_v59, %v3644_v61  ;;  %v4104_v35 = vld [vmem:[%s6297_s20 + $0x8] sm:$0xff]  ;;  %v4126_v61 = vld [vmem:[%s6297_s20 + $0xb8] sm:$0xff]  ;;  %v5600_v59 = vpack.c.bf16 %v4121_v12, %v4119_v10  ;;  %v4143_v10 = vld [vmem:[%s6297_s20 + $0x140] sm:$0xff] }
 0xcdb   : > { %5563 = vmatprep.subr.bf16.mxu0 %v5562_v36  ;;  %5675 = vmatprep.subr.bf16.mxu1 %v5674_v41  ;;  %v4106_v36 = vld [vmem:[%s6297_s20 + $0x18] sm:$0xff] }
 0xcdc   : > { %v5582_v41 = vpack.c.bf16 %v4106_v36, %v4104_v35  ;;  %v5606_v36 = vpack.c.bf16 %v4130_v3, %v4128_v1  ;;  %v4215_v3 = vld [vmem:[%s6297_s20 + $0x380] sm:$0xff] }
 0xcde   : > { %5565 = vmatpush1.bf16.msra.mxu0 %v5564_v53  ;;  %5677 = vmatpush1.bf16.msra.mxu1 %v5676_v9 }
 0xcdf   : > { %v3452_v34 = vpop.xlane.xlu0 %3451  ;;  %5567 = vmatprep.subr.bf16.mxu0 %v5566_v56  ;;  %5679 = vmatprep.subr.bf16.mxu1 %v5678_v21 }
 0xce0   : > { %v3459_v4 = vmul.f32 0.0052083335, %v3452_v34 }
 0xce2   : > { %v3462_v60 = vadd.f32 1e-05, %v3459_v4  ;;  %5569 = vmatpush1.bf16.msra.mxu0 %v5568_v62  ;;  %5681 = vmatpush1.bf16.msra.mxu1 %v5680_v54  ;;  %v4114_v62 = vld [vmem:[%s6297_s20 + $0x58] sm:$0xff]  ;;  %v5594_v4 = vpack.c.bf16 %v4118_v26, %v4116_v0  ;;  %v4141_v26 = vld [vmem:[%s6297_s20 + $0x130] sm:$0xff] }
 0xce3   : > { %v3457_v7 = vpop.xlane.xlu1 %3456  ;;  %5571 = vmatprep.subr.bf16.mxu0 %v5570_v25  ;;  %v5590_v34 = vpack.c.bf16 %v4114_v62, %v4112_v48  ;;  %v4113_v25 = vld [vmem:[%s6297_s20 + $0x50] sm:$0xff]  ;;  %v4207_v62 = vld [vmem:[%s6297_s20 + $0x340] sm:$0xff] }
 0xce4   : > { %6006 = vrsqrt.f32 %v3462_v60  ;;  %v3460_v15 = vmul.f32 0.0052083335, %v3457_v7  ;;  %v4120_v60 = vld [vmem:[%s6297_s20 + $0x88] sm:$0xff]  ;;  %v5596_v7 = vpack.c.bf16 %v4117_v20, %v4115_v24  ;;  %v4146_v20 = vld [vmem:[%s6297_s20 + $0x158] sm:$0xff] }
 0xce5   : > { %v4144_v24 = vld [vmem:[%s6297_s20 + $0x148] sm:$0xff] }
 0xce6   : > { %v3463_v11 = vadd.f32 1e-05, %v3460_v15  ;;  %5573 = vmatpush1.bf16.msra.mxu0 %v5572_v19  ;;  %v4122_v19 = vld [vmem:[%s6297_s20 + $0x98] sm:$0xff]  ;;  %v4124_v15 = vld [vmem:[%s6297_s20 + $0xa8] sm:$0xff] }
 0xce7   : > { %5575 = vmatprep.subr.bf16.mxu0 %v5574_v8  ;;  %v5598_v8 = vpack.c.bf16 %v4122_v19, %v4120_v60  ;;  %v4211_v19 = vld [vmem:[%s6297_s20 + $0x360] sm:$0xff] }
 0xce8   : > { %6008 = vrsqrt.f32 %v3463_v11  ;;  %v5602_v11 = vpack.c.bf16 %v4126_v61, %v4124_v15  ;;  %v5622_v15 = vpack.c.bf16 %v4146_v20, %v4144_v24  ;;  %v4145_v61 = vld [vmem:[%s6297_s20 + $0x150] sm:$0xff]  ;;  %v4162_v24 = vld [vmem:[%s6297_s20 + $0x1d8] sm:$0xff] }
 0xcea   : > { %5577 = vmatpush1.bf16.msra.mxu0 %v5576_v50  ;;  %v4123_v50 = vld [vmem:[%s6297_s20 + $0xa0] sm:$0xff] }
 0xceb   : > { %5579 = vmatprep.subr.bf16.mxu0 %v5578_v55  ;;  %v4125_v55 = vld [vmem:[%s6297_s20 + $0xb0] sm:$0xff] }
 0xcec   : > { %v5604_v35 = vpack.c.bf16 %v4125_v55, %v4123_v50  ;;  %v4148_v50 = vld [vmem:[%s6297_s20 + $0x168] sm:$0xff]  ;;  %v4150_v55 = vld [vmem:[%s6297_s20 + $0x178] sm:$0xff] }
 0xcee   : > { %v6007_v30 = vpop.eup %6006  ;;  %5581 = vmatpush1.bf16.msra.mxu0 %v5580_v22  ;;  %v4127_v22 = vld [vmem:[%s6297_s20 + $0xc0] sm:$0xff] }
 0xcef   : > { %v3470_v27 = vmul.f32 %v6007_v30, %v7268_v42  ;;  %v3469_v45 = vmul.f32 %v6007_v30, %v7265_v51  ;;  %5583 = vmatprep.subr.bf16.mxu0 %v5582_v41  ;;  %v4129_v41 = vld [vmem:[%s6297_s20 + $0xd0] sm:$0xff]  ;;  %v4132_v30 = vld [vmem:[%s6297_s20 + $0xe8] sm:$0xff] }
 0xcf1   : > { %v3487_v16 = vmul.f32 %v7303_v49, %v3470_v27  ;;  %v3486_v18 = vmul.f32 %v7300_v58, %v3469_v45  ;;  %v4134_v27 = vld [vmem:[%s6297_s20 + $0xf8] sm:$0xff]  ;;  %v5608_v45 = vpack.c.bf16 %v4129_v41, %v4127_v22  ;;  %v4147_v22 = vld [vmem:[%s6297_s20 + $0x160] sm:$0xff] }
 0xcf2   : > { %v6009_v53 = vpop.eup %6008 }
 0xcf3   : > { %v3504_v5 = vadd.f32 %v7311_v13, %v3487_v16  ;;  %v3503_v9 = vadd.f32 %v7308_v52, %v3486_v18  ;;  %v3472_v56 = vmul.f32 %v6009_v53, %v7278_v44  ;;  %v3471_v42 = vmul.f32 %v6009_v53, %v7275_v43  ;;  %v4105_v43 = vld [vmem:[%s6297_s20 + $0x10] sm:$0xff]  ;;  %v4131_v16 = vld [vmem:[%s6297_s20 + $0xe0] sm:$0xff] }
 0xcf4   : > { %v5610_v18 = vpack.c.bf16 %v4134_v27, %v4132_v30  ;;  %v4133_v53 = vld [vmem:[%s6297_s20 + $0xf0] sm:$0xff]  ;;  %v4220_v30 = vld [vmem:[%s6297_s20 + $0x3a8] sm:$0xff]  ;;  %v4222_v27 = vld [vmem:[%s6297_s20 + $0x3b8] sm:$0xff] }
 0xcf5   : > { %4953 = vmatprep.mubr.msk.f32.mxu0 %vm823_vm2, %v3504_v5  ;;  %4956 = vmatprep.mubr.msk.f32.mxu1 %vm823_vm2, %v3504_v5  ;;  %v3489_v51 = vmul.f32 %v7303_v49, %v3472_v56  ;;  %v3488_v57 = vmul.f32 %v7300_v58, %v3471_v42  ;;  %v4110_v49 = vld [vmem:[%s6297_s20 + $0x38] sm:$0xff]  ;;  %v5584_v58 = vpack.c.bf16 %v4105_v43, %v4103_v23  ;;  %v4136_v56 = vld [vmem:[%s6297_s20 + $0x108] sm:$0xff]  ;;  %v4135_v23 = vld [vmem:[%s6297_s20 + $0x100] sm:$0xff] }
 0xcf6   : > { %3763 = vmatmul.mubr.f32.gmra.mrb[60].mxu0 %v3503_v9  ;;  %3846 = vmatmul.mubr.f32.gmra.mrb[40].mxu1 %v3503_v9  ;;  %v4138_v42 = vld [vmem:[%s6297_s20 + $0x118] sm:$0xff] }
 0xcf7   : > { %v3506_v21 = vadd.f32 %v7311_v13, %v3489_v51  ;;  %v3505_v44 = vadd.f32 %v7308_v52, %v3488_v57  ;;  %v5586_v13 = vpack.c.bf16 %v4110_v49, %v4108_v40  ;;  %v4107_v52 = vld [vmem:[%s6297_s20 + $0x20] sm:$0xff]  ;;  %v5614_v40 = vpack.c.bf16 %v4138_v42, %v4136_v56  ;;  %v4137_v49 = vld [vmem:[%s6297_s20 + $0x110] sm:$0xff]  ;;  %v4154_v56 = vld [vmem:[%s6297_s20 + $0x198] sm:$0xff] }
 0xcf8   : > { %v5588_v54 = vpack.c.bf16 %v4109_v63, %v4107_v52  ;;  %v4203_v57 = vld [vmem:[%s6297_s20 + $0x320] sm:$0xff]  ;;  %v4140_v52 = vld [vmem:[%s6297_s20 + $0x128] sm:$0xff]  ;;  %v4142_v63 = vld [vmem:[%s6297_s20 + $0x138] sm:$0xff] }
 0xcf9   : > { %4954 = vmatprep.mubr.msk.f32.mxu0 %vm823_vm2, %v3506_v21  ;;  %4957 = vmatprep.mubr.msk.f32.mxu1 %vm823_vm2, %v3506_v21  ;;  %v5618_v0 = vpack.c.bf16 %v4142_v63, %v4140_v52  ;;  %v4230_v52 = vld [vmem:[%s6297_s20 + $0x3f8] sm:$0xff]  ;;  %v4156_v63 = vld [vmem:[%s6297_s20 + $0x1a8] sm:$0xff] }
 0xcfa   : > { %3769 = vmatmul.mubr.f32.gmra.mrb[62].mxu0 %v3505_v44  ;;  %3852 = vmatmul.mubr.f32.gmra.mrb[42].mxu1 %v3505_v44 }
 0xcfb   : > { %4958 = vmatprep.mubr.msk.f32.mxu0 %vm823_vm2, %v7324_v46  ;;  %v4111_v46 = vld [vmem:[%s6297_s20 + $0x40] sm:$0xff] }
 0xcfe   : > { %3923 = vmatmul.mubr.f32.vlgmr.msra.gmra.mrb[64].mxu0 %v7327_v14  ;;  %v5592_v14 = vpack.c.bf16 %v4113_v25, %v4111_v46  ;;  %v4139_v46 = vld [vmem:[%s6297_s20 + $0x120] sm:$0xff] }
 0xcff   : > { %4959 = vmatprep.mubr.msk.f32.mxu0 %vm823_vm2, %v3504_v5  ;;  %5585 = vmatpush1.bf16.msra.mxu0 %v5584_v58  ;;  %v4204_v5 = vld [vmem:[%s6297_s20 + $0x328] sm:$0xff] }
 0xd00   : > { %5587 = vmatprep.subr.bf16.mxu0 %v5586_v13  ;;  %v4208_v58 = vld [vmem:[%s6297_s20 + $0x348] sm:$0xff]  ;;  %v4210_v13 = vld [vmem:[%s6297_s20 + $0x358] sm:$0xff] }
 0xd01   : > { %v5686_v48 = vpack.c.bf16 %v4210_v13, %v4208_v58  ;;  %v4153_v58 = vld [vmem:[%s6297_s20 + $0x190] sm:$0xff]  ;;  %v4228_v13 = vld [vmem:[%s6297_s20 + $0x3e8] sm:$0xff] }
 0xd02   : > { %3929 = vmatmul.mubr.f32.gmra.mrb[66].mxu0 %v3503_v9  ;;  %v4206_v9 = vld [vmem:[%s6297_s20 + $0x338] sm:$0xff] }
 0xd03   : > { %4960 = vmatprep.mubr.msk.f32.mxu0 %vm823_vm2, %v3506_v21  ;;  %5589 = vmatpush1.bf16.msra.mxu0 %v5588_v54  ;;  %v5682_v51 = vpack.c.bf16 %v4206_v9, %v4204_v5  ;;  %v4205_v21 = vld [vmem:[%s6297_s20 + $0x330] sm:$0xff]  ;;  %v4152_v9 = vld [vmem:[%s6297_s20 + $0x188] sm:$0xff] }
 0xd04   : > { %5591 = vmatprep.subr.bf16.mxu0 %v5590_v34  ;;  %v5684_v43 = vpack.c.bf16 %v4205_v21, %v4203_v57  ;;  %v4209_v54 = vld [vmem:[%s6297_s20 + $0x350] sm:$0xff]  ;;  %v5616_v34 = vpack.c.bf16 %v4137_v49, %v4135_v23  ;;  %v4226_v57 = vld [vmem:[%s6297_s20 + $0x3d8] sm:$0xff]  ;;  %v5630_v49 = vpack.c.bf16 %v4154_v56, %v4152_v9 }
 0xd05   : > { %5683 = vmatprep.subr.bf16.mxu1 %v5682_v51  ;;  %v5688_v25 = vpack.c.bf16 %v4209_v54, %v4207_v62  ;;  %v4221_v5 = vld [vmem:[%s6297_s20 + $0x3b0] sm:$0xff]  ;;  %v4224_v51 = vld [vmem:[%s6297_s20 + $0x3c8] sm:$0xff]  ;;  %v5706_v54 = vpack.c.bf16 %v4230_v52, %v4228_v13 }
 0xd06   : > { %3935 = vmatmul.mubr.f32.gmra.mrb[68].mxu0 %v3505_v44  ;;  %v5612_v44 = vpack.c.bf16 %v4133_v53, %v4131_v16  ;;  %5685 = vmatpush1.bf16.msra.mxu1 %v5684_v43  ;;  %v4149_v16 = vld [vmem:[%s6297_s20 + $0x170] sm:$0xff]  ;;  %v4219_v53 = vld [vmem:[%s6297_s20 + $0x3a0] sm:$0xff]  ;;  %v5702_v23 = vpack.c.bf16 %v4226_v57, %v4224_v51 }
 0xd07   : > { %5593 = vmatpush1.bf16.msra.mxu0 %v5592_v14  ;;  %5687 = vmatprep.subr.bf16.mxu1 %v5686_v48  ;;  %v4212_v14 = vld [vmem:[%s6297_s20 + $0x368] sm:$0xff]  ;;  %v5700_v42 = vpack.c.bf16 %v4221_v5, %v4219_v53  ;;  %v5628_v21 = vpack.c.bf16 %v4149_v16, %v4147_v22  ;;  %v4223_v43 = vld [vmem:[%s6297_s20 + $0x3c0] sm:$0xff]  ;;  %v4158_v48 = vld [vmem:[%s6297_s20 + $0x1b8] sm:$0xff] }
 0xd08   : > { %5595 = vmatprep.subr.bf16.mxu0 %v5594_v4  ;;  %v4214_v4 = vld [vmem:[%s6297_s20 + $0x378] sm:$0xff] }
 0xd09   : > { %v5690_v60 = vpack.c.bf16 %v4214_v4, %v4212_v14  ;;  %v4157_v14 = vld [vmem:[%s6297_s20 + $0x1b0] sm:$0xff]  ;;  %v4160_v4 = vld [vmem:[%s6297_s20 + $0x1c8] sm:$0xff] }
 0xd0a   : > { %5689 = vmatpush1.bf16.msra.mxu1 %v5688_v25 }
 0xd0b   : > { %5597 = vmatpush1.bf16.msra.mxu0 %v5596_v7  ;;  %v4213_v7 = vld [vmem:[%s6297_s20 + $0x370] sm:$0xff]  ;;  %5691 = vmatprep.subr.bf16.mxu1 %v5690_v60 }
 0xd0c   : > { %5599 = vmatprep.subr.bf16.mxu0 %v5598_v8  ;;  %v5620_v8 = vpack.c.bf16 %v4141_v26, %v4139_v46  ;;  %v5692_v12 = vpack.c.bf16 %v4213_v7, %v4211_v19  ;;  %v4229_v46 = vld [vmem:[%s6297_s20 + $0x3f0] sm:$0xff]  ;;  %v4155_v26 = vld [vmem:[%s6297_s20 + $0x1a0] sm:$0xff]  ;;  %v5638_v7 = vpack.c.bf16 %v4162_v24, %v4160_v4 }
 0xd0d   : > { %v5636_v60 = vpack.c.bf16 %v4157_v14, %v4155_v26  ;;  %v4159_v19 = vld [vmem:[%s6297_s20 + $0x1c0] sm:$0xff] }
 0xd0e   : > { %5693 = vmatpush1.bf16.msra.mxu1 %v5692_v12  ;;  %v4234_v12 = vld [vmem:[%s6297_s20 + $0x418] sm:$0xff] }
 0xd0f   : > { %5601 = vmatpush1.bf16.msra.mxu0 %v5600_v59  ;;  %v4216_v59 = vld [vmem:[%s6297_s20 + $0x388] sm:$0xff] }
 0xd10   : > { %5603 = vmatprep.subr.bf16.mxu0 %v5602_v11  ;;  %v4218_v11 = vld [vmem:[%s6297_s20 + $0x398] sm:$0xff] }
 0xd11   : > { %v5694_v1 = vpack.c.bf16 %v4218_v11, %v4216_v59 }
 0xd13   : > { %5605 = vmatpush1.bf16.msra.mxu0 %v5604_v35  ;;  %v4217_v35 = vld [vmem:[%s6297_s20 + $0x390] sm:$0xff]  ;;  %5695 = vmatprep.subr.bf16.mxu1 %v5694_v1 }
 0xd14   : > { %5607 = vmatprep.subr.bf16.mxu0 %v5606_v36  ;;  %v5624_v36 = vpack.c.bf16 %v4145_v61, %v4143_v10  ;;  %v5696_v41 = vpack.c.bf16 %v4217_v35, %v4215_v3  ;;  %v4232_v10 = vld [vmem:[%s6297_s20 + $0x408] sm:$0xff]  ;;  %v4166_v61 = vld [vmem:[%s6297_s20 + $0x1f8] sm:$0xff]  ;;  %v4165_v1 = vld [vmem:[%s6297_s20 + $0x1f0] sm:$0xff] }
 0xd15   : > { %v5710_v59 = vpack.c.bf16 %v4234_v12, %v4232_v10  ;;  %v7523_v35 = vld [vmem:[%s6287_s14] sm:$0x3f] }
 0xd16   : > { %5697 = vmatpush1.bf16.msra.mxu1 %v5696_v41  ;;  %v7532_v22 = vrot.slane %v7523_v35, %v1049_v37  ;;  %v7536_v41 = vrot.slane %v7523_v35, %v6495_v32 }
 0xd17   : > { %5609 = vmatpush1.bf16.msra.mxu0 %v5608_v45  ;;  %v5626_v45 = vpack.c.bf16 %v4150_v55, %v4148_v50  ;;  %v4163_v55 = vld [vmem:[%s6297_s20 + $0x1e0] sm:$0xff] }
 0xd18   : > { %5611 = vmatprep.subr.bf16.mxu0 %v5610_v18  ;;  %v5698_v18 = vpack.c.bf16 %v4222_v27, %v4220_v30  ;;  %v5644_v3 = vpack.c.bf16 %v4165_v1, %v4163_v55  ;;  %v7541_v30 = vrot.slane %v7523_v35, %v1053_v39 }
 0xd1a   : > { %5699 = vmatprep.subr.bf16.mxu1 %v5698_v18 }
 0xd1b   : > { %5613 = vmatpush1.bf16.msra.mxu0 %v5612_v44  ;;  %v4151_v44 = vld [vmem:[%s6297_s20 + $0x180] sm:$0xff]  ;;  %5701 = vmatpush1.bf16.msra.mxu1 %v5700_v42 }
 0xd1c   : > { %5615 = vmatprep.subr.bf16.mxu0 %v5614_v40  ;;  %v4225_v40 = vld [vmem:[%s6297_s20 + $0x3d0] sm:$0xff]  ;;  %5703 = vmatprep.subr.bf16.mxu1 %v5702_v23  ;;  %v5632_v25 = vpack.c.bf16 %v4153_v58, %v4151_v44 }
 0xd1d   : > { %v5704_v62 = vpack.c.bf16 %v4225_v40, %v4223_v43 }
 0xd1f   : > { %5617 = vmatpush1.bf16.msra.mxu0 %v5616_v34  ;;  %v4227_v34 = vld [vmem:[%s6297_s20 + $0x3e0] sm:$0xff]  ;;  %5705 = vmatpush1.bf16.msra.mxu1 %v5704_v62 }
 0xd20   : > { %5619 = vmatprep.subr.bf16.mxu0 %v5618_v0  ;;  %v5634_v0 = vpack.c.bf16 %v4158_v48, %v4156_v63  ;;  %v5708_v20 = vpack.c.bf16 %v4229_v46, %v4227_v34  ;;  %5707 = vmatprep.subr.bf16.mxu1 %v5706_v54 }
 0xd23   : > { %5621 = vmatpush1.bf16.msra.mxu0 %v5620_v8  ;;  %v4161_v8 = vld [vmem:[%s6297_s20 + $0x1d0] sm:$0xff]  ;;  %5709 = vmatpush1.bf16.msra.mxu1 %v5708_v20 }
 0xd24   : > { %5623 = vmatprep.subr.bf16.mxu0 %v5622_v15  ;;  %v4164_v15 = vld [vmem:[%s6297_s20 + $0x1e8] sm:$0xff]  ;;  %v5640_v11 = vpack.c.bf16 %v4161_v8, %v4159_v19  ;;  %5711 = vmatprep.subr.bf16.mxu1 %v5710_v59  ;;  %v4231_v19 = vld [vmem:[%s6297_s20 + $0x400] sm:$0xff] }
 0xd25   : > { %v5642_v50 = vpack.c.bf16 %v4166_v61, %v4164_v15  ;;  %v4236_v15 = vld [vmem:[%s6297_s20 + $0x428] sm:$0xff]  ;;  %v4238_v61 = vld [vmem:[%s6297_s20 + $0x438] sm:$0xff] }
 0xd27   : > { %5625 = vmatpush1.bf16.msra.mxu0 %v5624_v36  ;;  %v7527_v36 = vrot.slane %v7523_v35, %v6498_v33 }
 0xd28   : > { %5627 = vmatprep.subr.bf16.mxu0 %v5626_v45 }
 0xd2b   : > { %5629 = vmatpush1.bf16.msra.mxu0 %v5628_v21 }
 0xd2c   : > { %5631 = vmatprep.subr.bf16.mxu0 %v5630_v49 }
 0xd2f   : > { %5633 = vmatpush1.bf16.msra.mxu0 %v5632_v25 }
 0xd30   : > { %5635 = vmatprep.subr.bf16.mxu0 %v5634_v0 }
 0xd33   : > { %5637 = vmatpush1.bf16.msra.mxu0 %v5636_v60 }
 0xd34   : > { %5639 = vmatprep.subr.bf16.mxu0 %v5638_v7  ;;  %v4233_v7 = vld [vmem:[%s6297_s20 + $0x410] sm:$0xff] }
 0xd35   : > { %v5712_v1 = vpack.c.bf16 %v4233_v7, %v4231_v19  ;;  %v7579_v19 = vld [vmem:[%s6297_s20 + $0x4f0] sm:$0xff]  ;;  %v7582_v7 = vld [vmem:[%s6297_s20 + $0x508] sm:$0xff] }
 0xd37   : > { %5641 = vmatpush1.bf16.msra.mxu0 %v5640_v11 }
 0xd38   : > { %5643 = vmatprep.subr.bf16.mxu0 %v5642_v50 }
 0xd3b   : > { %5645 = vmatpush1.bf16.msra.mxu0 %v5644_v3 }
 0xd94   : > { %v3758_v27 = vpop.f32.mrb[58].mxu0  ;;  %v3841_v45 = vpop.f32.mrb[38].mxu1 }
 0xd95   : > { %v3759_v16 = vadd.f32 %v3758_v27, %v7527_v36  ;;  %v3842_v18 = vadd.f32 %v3841_v45, %v7532_v22  ;;  %v3760_v53 = vpop.f32.mrb[59].mxu0  ;;  %v3843_v5 = vpop.f32.mrb[39].mxu1  ;;  %v5714_v27 = vpack.c.bf16 %v4238_v61, %v4236_v15  ;;  %v4235_v45 = vld [vmem:[%s6297_s20 + $0x420] sm:$0xff]  ;;  %v7592_v15 = vld [vmem:[%s6297_s20 + $0x510] sm:$0xff]  ;;  %v7595_v61 = vld [vmem:[%s6297_s20 + $0x528] sm:$0xff] }
 0xd96   : > { %v3761_v37 = vadd.f32 %v3760_v53, %v7536_v41  ;;  %v3844_v9 = vadd.f32 %v3843_v5, %v7541_v30  ;;  %v4240_v53 = vld [vmem:[%s6297_s20 + $0x448] sm:$0xff]  ;;  %v4242_v5 = vld [vmem:[%s6297_s20 + $0x458] sm:$0xff] }
 0xd97   : > { %v3959_v56 = vmul.f32 0.044715, %v3759_v16  ;;  %v3961_v42 = vmul.f32 0.044715, %v3842_v18  ;;  %v3941_v8 = vmul.f32 0.5, %v3759_v16  ;;  %v3943_v59 = vmul.f32 0.5, %v3842_v18 }
 0xd98   : > { %v3960_v51 = vmul.f32 0.044715, %v3761_v37  ;;  %v3962_v57 = vmul.f32 0.044715, %v3844_v9  ;;  %v3942_v24 = vmul.f32 0.5, %v3761_v37  ;;  %v3944_v10 = vmul.f32 0.5, %v3844_v9 }
 0xd99   : > { %v3977_v21 = vmul.f32 %v3959_v56, %v3759_v16  ;;  %v3979_v44 = vmul.f32 %v3961_v42, %v3842_v18  ;;  %v4241_v56 = vld [vmem:[%s6297_s20 + $0x450] sm:$0xff]  ;;  %v4244_v42 = vld [vmem:[%s6297_s20 + $0x468] sm:$0xff] }
 0xd9a   : > { %v3978_v39 = vmul.f32 %v3960_v51, %v3761_v37  ;;  %v3980_v23 = vmul.f32 %v3962_v57, %v3844_v9  ;;  %v4246_v51 = vld [vmem:[%s6297_s20 + $0x478] sm:$0xff] }
 0xd9b   : > { %v3995_v43 = vmul.f32 %v3977_v21, %v3759_v16  ;;  %v3997_v40 = vmul.f32 %v3979_v44, %v3842_v18  ;;  %v5722_v21 = vpack.c.bf16 %v4246_v51, %v4244_v42  ;;  %v4243_v44 = vld [vmem:[%s6297_s20 + $0x460] sm:$0xff] }
 0xd9c   : > { %v3996_v49 = vmul.f32 %v3978_v39, %v3761_v37  ;;  %v3998_v58 = vmul.f32 %v3980_v23, %v3844_v9  ;;  %v4245_v39 = vld [vmem:[%s6297_s20 + $0x470] sm:$0xff]  ;;  %v4248_v23 = vld [vmem:[%s6297_s20 + $0x488] sm:$0xff]  ;;  %v7623_v42 = vld [vmem:[%s6297_s20 + $0x540] sm:$0xff] }
 0xd9d   : > { %v4013_v13 = vadd.f32 %v3995_v43, %v3759_v16  ;;  %v4015_v52 = vadd.f32 %v3997_v40, %v3842_v18  ;;  %v4237_v16 = vld [vmem:[%s6297_s20 + $0x430] sm:$0xff]  ;;  %v4250_v43 = vld [vmem:[%s6297_s20 + $0x498] sm:$0xff]  ;;  %v5724_v40 = vpack.c.bf16 %v4245_v39, %v4243_v44 }
 0xd9e   : > { %v4014_v63 = vadd.f32 %v3996_v49, %v3761_v37  ;;  %v4016_v48 = vadd.f32 %v3998_v58, %v3844_v9  ;;  %v5716_v18 = vpack.c.bf16 %v4237_v16, %v4235_v45  ;;  %v5718_v37 = vpack.c.bf16 %v4242_v5, %v4240_v53  ;;  %v4239_v9 = vld [vmem:[%s6297_s20 + $0x440] sm:$0xff]  ;;  %v7639_v39 = vld [vmem:[%s6297_s20 + $0x550] sm:$0xff] }
 0xd9f   : > { %v4031_v62 = vmul.f32 0.7978846, %v4013_v13  ;;  %v4033_v54 = vmul.f32 0.7978846, %v4015_v52  ;;  %v5720_v57 = vpack.c.bf16 %v4241_v56, %v4239_v9  ;;  %v5726_v49 = vpack.c.bf16 %v4250_v43, %v4248_v23  ;;  %v4247_v58 = vld [vmem:[%s6297_s20 + $0x480] sm:$0xff]  ;;  %v4249_v13 = vld [vmem:[%s6297_s20 + $0x490] sm:$0xff] }
 0xda0   : > { %v4032_v34 = vmul.f32 0.7978846, %v4014_v63  ;;  %v4034_v46 = vmul.f32 0.7978846, %v4016_v48  ;;  %v4252_v52 = vld [vmem:[%s6297_s20 + $0x4a8] sm:$0xff]  ;;  %v4254_v63 = vld [vmem:[%s6297_s20 + $0x4b8] sm:$0xff]  ;;  %v5728_v48 = vpack.c.bf16 %v4249_v13, %v4247_v58 }
 0xda1   : > { %6010 = vtanh.f32 %v4031_v62  ;;  %v5730_v62 = vpack.c.bf16 %v4254_v63, %v4252_v52  ;;  %v7617_v9 = vld [vmem:[%s6297_s20 + $0x548] sm:$0xff]  ;;  %v7620_v56 = vld [vmem:[%s6297_s20 + $0x558] sm:$0xff]  ;;  %v7658_v13 = vld [vmem:[%s6297_s20 + $0x570] sm:$0xff] }
 0xda2   : > { %6012 = vtanh.f32 %v4033_v54  ;;  %v4251_v54 = vld [vmem:[%s6297_s20 + $0x4a0] sm:$0xff]  ;;  %v7642_v23 = vld [vmem:[%s6297_s20 + $0x568] sm:$0xff]  ;;  %v7645_v43 = vld [vmem:[%s6297_s20 + $0x578] sm:$0xff] }
 0xda3   : > { %6014 = vtanh.f32 %v4032_v34  ;;  %v4253_v34 = vld [vmem:[%s6297_s20 + $0x4b0] sm:$0xff] }
 0xda4   : > { %6016 = vtanh.f32 %v4034_v46  ;;  %v4256_v46 = vld [vmem:[%s6297_s20 + $0x4c8] sm:$0xff] }
 0xdab   : > { %v6011_v25 = vpop.eup %6010 }
 0xdac   : > { %v6013_v0 = vpop.eup %6012  ;;  %v4067_v14 = vadd.f32 1.0, %v6011_v25  ;;  %v4258_v25 = vld [vmem:[%s6297_s20 + $0x4d8] sm:$0xff] }
 0xdad   : > { %v6015_v26 = vpop.eup %6014  ;;  %v4069_v60 = vadd.f32 1.0, %v6013_v0  ;;  %v5732_v0 = vpack.c.bf16 %v4253_v34, %v4251_v54  ;;  %v5750_v54 = vpack.c.bf16 %v7620_v56, %v7617_v9 }
 0xdae   : > { %v6017_v4 = vpop.eup %6016  ;;  %v4068_v20 = vadd.f32 1.0, %v6015_v26  ;;  %v4085_v55 = vmul.f32 %v4067_v14, %v3941_v8  ;;  %v4255_v26 = vld [vmem:[%s6297_s20 + $0x4c0] sm:$0xff]  ;;  %v4257_v14 = vld [vmem:[%s6297_s20 + $0x4d0] sm:$0xff]  ;;  %v7585_v8 = vld [vmem:[%s6297_s20 + $0x518] sm:$0xff] }
 0xdaf   : > { %v4070_v12 = vadd.f32 1.0, %v6017_v4  ;;  %v4087_v3 = vmul.f32 %v4069_v60, %v3943_v59  ;;  %v5734_v4 = vpack.c.bf16 %v4258_v25, %v4256_v46  ;;  %v7576_v60 = vld [vmem:[%s6297_s20 + $0x4e0] sm:$0xff] }
 0xdb0   : > { %v4086_v11 = vmul.f32 %v4068_v20, %v3942_v24  ;;  %v4260_v24 = vld [vmem:[%s6297_s20 + $0x4e8] sm:$0xff]  ;;  %v4262_v20 = vld [vmem:[%s6297_s20 + $0x4f8] sm:$0xff] }
 0xdb1   : > { %v4088_v50 = vmul.f32 %v4070_v12, %v3944_v10  ;;  %v3675_v10 = vsub.s32 5, %v6492_v29  ;;  %v7589_v12 = vld [vmem:[%s6297_s20 + $0x500] sm:$0xff] }
 0xdb2   : > { %4359 = vmatprep.mubr.f32.mxu0 %v4086_v11  ;;  %v5744_v44 = vpack.c.bf16 %v7592_v15, %v7589_v12  ;;  %v5754_v12 = vpack.c.bf16 %v7645_v43, %v7642_v23  ;;  %v7702_v15 = vld [vmem:[%s6297_s20 + $0x5a8] sm:$0xff] }
 0xdb3   : > { %4442 = vmatprep.mubr.f32.mxu1 %v4088_v50  ;;  %4360 = vmatmul.mubr.f32.vlgmr.msra.gmra.mrb[70].mxu0 %v4085_v55  ;;  %v5736_v50 = vpack.c.bf16 %v4257_v14, %v4255_v26  ;;  %v5738_v55 = vpack.c.bf16 %v4262_v20, %v4260_v24  ;;  %v7650_v58 = vrot.slane %v7523_v35, %v3675_v10 }
 0xdb4   : > { %4443 = vmatmul.mubr.f32.vlgmr.msra.gmra.mrb[44].mxu1 %v4087_v3  ;;  %v7601_v3 = vld [vmem:[%s6297_s20 + $0x520] sm:$0xff]  ;;  %v5752_v14 = vpack.c.bf16 %v7639_v39, %v7623_v42 }
 0xdb5   : > { %5713 = vmatpush1.bf16.msra.mxu1 %v5712_v1  ;;  %v7598_v1 = vld [vmem:[%s6297_s20 + $0x538] sm:$0xff] }
 0xdb6   : > { %5715 = vmatprep.subr.bf16.mxu1 %v5714_v27  ;;  %v7604_v27 = vld [vmem:[%s6297_s20 + $0x530] sm:$0xff]  ;;  %v5746_v29 = vpack.c.bf16 %v7598_v1, %v7595_v61 }
 0xdb9   : > { %5717 = vmatpush1.bf16.msra.mxu1 %v5716_v18  ;;  %v5740_v18 = vpack.c.bf16 %v7579_v19, %v7576_v60  ;;  %v7687_v60 = vld [vmem:[%s6297_s20 + $0x598] sm:$0xff]  ;;  %v7690_v19 = vld [vmem:[%s6297_s20 + $0x580] sm:$0xff] }
 0xdba   : > { %5719 = vmatprep.subr.bf16.mxu1 %v5718_v37  ;;  %v5742_v37 = vpack.c.bf16 %v7585_v8, %v7582_v7  ;;  %v7693_v7 = vld [vmem:[%s6297_s20 + $0x590] sm:$0xff] }
 0xdbd   : > { %5721 = vmatpush1.bf16.msra.mxu1 %v5720_v57 }
 0xdbe   : > { %5723 = vmatprep.subr.bf16.mxu1 %v5722_v21  ;;  %v7634_v21 = vrot.slane %v7523_v35, %v1057_v2  ;;  %v7655_v2 = vld [vmem:[%s6297_s20 + $0x560] sm:$0xff]  ;;  %v5748_v35 = vpack.c.bf16 %v7604_v27, %v7601_v3 }
 0xdc1   : > { %5725 = vmatpush1.bf16.msra.mxu1 %v5724_v40 }
 0xdc2   : > { %5727 = vmatprep.subr.bf16.mxu1 %v5726_v49 }
 0xdc5   : > { %5729 = vmatpush1.bf16.msra.mxu1 %v5728_v48 }
 0xdc6   : > { %5731 = vmatprep.subr.bf16.mxu1 %v5730_v62 }
 0xdc9   : > { %5733 = vmatpush1.bf16.msra.mxu1 %v5732_v0  ;;  %v3764_v59 = vpop.f32.mrb[60].mxu0  ;;  %v3847_v11 = vpop.f32.mrb[40].mxu1 }
 0xdca   : > { %v7607_v45 = vadd.f32 %v3764_v59, %v7527_v36  ;;  %v7610_v16 = vadd.f32 %v3847_v11, %v7532_v22  ;;  %5735 = vmatprep.subr.bf16.mxu1 %v5734_v4  ;;  %v3766_v53 = vpop.f32.mrb[61].mxu0  ;;  %v3849_v5 = vpop.f32.mrb[41].mxu1  ;;  %v7676_v4 = vld [vmem:[%s6297_s20 + $0x588] sm:$0xff] }
 0xdcb   : > { %v7626_v51 = vadd.f32 %v3766_v53, %v7536_v41  ;;  %v7629_v57 = vadd.f32 %v3849_v5, %v7541_v30 }
 0xdcc   : > { %v3965_v40 = vmul.f32 0.044715, %v7607_v45  ;;  %v3967_v49 = vmul.f32 0.044715, %v7610_v16 }
 0xdcd   : > { %v3966_v52 = vmul.f32 0.044715, %v7626_v51  ;;  %v3968_v63 = vmul.f32 0.044715, %v7629_v57  ;;  %5737 = vmatpush1.bf16.msra.mxu1 %v5736_v50  ;;  %v3770_v48 = vpop.f32.mrb[62].mxu0  ;;  %v3853_v62 = vpop.f32.mrb[42].mxu1 }
 0xdce   : > { %v3983_v34 = vmul.f32 %v3965_v40, %v7607_v45  ;;  %v7668_v46 = vadd.f32 %v3770_v48, %v7527_v36  ;;  %v7671_v25 = vadd.f32 %v3853_v62, %v7532_v22  ;;  %5739 = vmatprep.subr.bf16.mxu1 %v5738_v55  ;;  %v3772_v0 = vpop.f32.mrb[63].mxu0  ;;  %v3855_v26 = vpop.f32.mrb[43].mxu1  ;;  %v3985_v8 = vmul.f32 %v3967_v49, %v7610_v16 }
 0xdcf   : > { %v3984_v24 = vmul.f32 %v3966_v52, %v7626_v51  ;;  %v3986_v20 = vmul.f32 %v3968_v63, %v7629_v57  ;;  %v7681_v36 = vadd.f32 %v3772_v0, %v7536_v41  ;;  %v7684_v22 = vadd.f32 %v3855_v26, %v7541_v30  ;;  %v7705_v30 = vld [vmem:[%s6297_s20 + $0x5b8] sm:$0xff] }
 0xdd0   : > { %v3971_v10 = vmul.f32 0.044715, %v7668_v46  ;;  %v5756_v41 = vpack.c.bf16 %v7658_v13, %v7655_v2  ;;  %v4001_v49 = vmul.f32 %v3983_v34, %v7607_v45 }
 0xdd1   : > { %v3972_v61 = vmul.f32 0.044715, %v7681_v36  ;;  %v3974_v59 = vmul.f32 0.044715, %v7684_v22  ;;  %5741 = vmatpush1.bf16.msra.mxu1 %v5740_v18  ;;  %v3924_v11 = vpop.f32.mrb[64].mxu0  ;;  %v4002_v50 = vmul.f32 %v3984_v24, %v7626_v51  ;;  %v4004_v55 = vmul.f32 %v3986_v20, %v7629_v57 }
 0xdd2   : > { %v7712_v1 = vadd.f32 %v3924_v11, %v7634_v21  ;;  %5743 = vmatprep.subr.bf16.mxu1 %v5742_v37  ;;  %v3926_v53 = vpop.f32.mrb[65].mxu0  ;;  %v3973_v18 = vmul.f32 0.044715, %v7671_v25  ;;  %v4019_v26 = vadd.f32 %v4001_v49, %v7607_v45  ;;  %v3989_v34 = vmul.f32 %v3971_v10, %v7668_v46  ;;  %v7741_v10 = vld [vmem:[%s6297_s20 + $0x5b0] sm:$0xff] }
 0xdd3   : > { %v7721_v52 = vadd.f32 %v3926_v53, %v7650_v58  ;;  %v4020_v37 = vadd.f32 %v4002_v50, %v7626_v51  ;;  %v3990_v48 = vmul.f32 %v3972_v61, %v7681_v36  ;;  %v4022_v0 = vadd.f32 %v4004_v55, %v7629_v57  ;;  %v7733_v53 = vld [vmem:[%s6297_s20 + $0x5a0] sm:$0xff] }
 0xdd4   : > { %v3963_v62 = vmul.f32 0.044715, %v7712_v1  ;;  %v3992_v24 = vmul.f32 %v3974_v59, %v7684_v22  ;;  %v4003_v61 = vmul.f32 %v3985_v8, %v7610_v16  ;;  %v4037_v59 = vmul.f32 0.7978846, %v4019_v26  ;;  %v7749_v8 = vld [vmem:[%s6297_s20 + $0x5c8] sm:$0xff] }
 0xdd5   : > { %5745 = vmatpush1.bf16.msra.mxu1 %v5744_v44  ;;  %v3930_v20 = vpop.f32.mrb[66].mxu0  ;;  %v4038_v11 = vmul.f32 0.7978846, %v4020_v37  ;;  %v4040_v49 = vmul.f32 0.7978846, %v4022_v0  ;;  %v4008_v0 = vmul.f32 %v3990_v48, %v7681_v36  ;;  %v3991_v5 = vmul.f32 %v3973_v18, %v7671_v25 }
 0xdd6   : > { %v3981_v50 = vmul.f32 %v3963_v62, %v7712_v1  ;;  %v7738_v63 = vadd.f32 %v3930_v20, %v7634_v21  ;;  %5747 = vmatprep.subr.bf16.mxu1 %v5746_v29  ;;  %v3932_v55 = vpop.f32.mrb[67].mxu0  ;;  %v3964_v44 = vmul.f32 0.044715, %v7721_v52  ;;  %v4021_v37 = vadd.f32 %v4003_v61, %v7610_v16  ;;  %v7752_v62 = vld [vmem:[%s6297_s20 + $0x5d8] sm:$0xff] }
 0xdd7   : > { %v7745_v40 = vadd.f32 %v3932_v55, %v7650_v58  ;;  %6018 = vtanh.f32 %v4038_v11  ;;  %v5764_v61 = vpack.c.bf16 %v7741_v10, %v7733_v53  ;;  %v4026_v3 = vadd.f32 %v4008_v0, %v7681_v36 }
 0xdd8   : > { %v3999_v20 = vmul.f32 %v3981_v50, %v7712_v1  ;;  %v3969_v29 = vmul.f32 0.044715, %v7738_v63  ;;  %6020 = vtanh.f32 %v4040_v49  ;;  %v4039_v55 = vmul.f32 0.7978846, %v4021_v37 }
 0xdd9   : > { %v3970_v26 = vmul.f32 0.044715, %v7745_v40  ;;  %5749 = vmatpush1.bf16.msra.mxu1 %v5748_v35  ;;  %v3936_v11 = vpop.f32.mrb[68].mxu0  ;;  %6022 = vtanh.f32 %v4037_v59  ;;  %v5766_v49 = vpack.c.bf16 %v7752_v62, %v7749_v8  ;;  %v4010_v18 = vmul.f32 %v3992_v24, %v7684_v22 }
 0xdda   : > { %v4017_v50 = vadd.f32 %v3999_v20, %v7712_v1  ;;  %5751 = vmatprep.subr.bf16.mxu1 %v5750_v54  ;;  %v3938_v48 = vpop.f32.mrb[69].mxu0  ;;  %v7772_v27 = vadd.f32 %v3936_v11, %v7634_v21  ;;  %6024 = vtanh.f32 %v4039_v55  ;;  %v3982_v37 = vmul.f32 %v3964_v44, %v7721_v52 }
 0xddb   : > { %v7775_v35 = vadd.f32 %v3938_v48, %v7650_v58  ;;  %v4044_v9 = vmul.f32 0.7978846, %v4026_v3  ;;  %v4007_v56 = vmul.f32 %v3989_v34, %v7668_v46  ;;  %v3987_v54 = vmul.f32 %v3969_v29, %v7738_v63 }
 0xddc   : > { %v4035_v59 = vmul.f32 0.7978846, %v4017_v50  ;;  %v3988_v20 = vmul.f32 %v3970_v26, %v7745_v40  ;;  %v4028_v21 = vadd.f32 %v4010_v18, %v7684_v22  ;;  %v3948_v58 = vmul.f32 0.5, %v7626_v51 }
 0xddd   : > { %v3976_v0 = vmul.f32 0.044715, %v7775_v35  ;;  %5753 = vmatpush1.bf16.msra.mxu1 %v5752_v14  ;;  %v3947_v34 = vmul.f32 0.5, %v7607_v45  ;;  %v4025_v24 = vadd.f32 %v4007_v56, %v7668_v46  ;;  %v4009_v44 = vmul.f32 %v3991_v5, %v7671_v25 }
 0xdde   : > { %5755 = vmatprep.subr.bf16.mxu1 %v5754_v12  ;;  %v3975_v29 = vmul.f32 0.044715, %v7772_v27  ;;  %v3950_v26 = vmul.f32 0.5, %v7629_v57  ;;  %6026 = vtanh.f32 %v4044_v9  ;;  %v4046_v42 = vmul.f32 0.7978846, %v4028_v21 }
 0xddf   : > { %6028 = vtanh.f32 %v4035_v59  ;;  %v4043_v39 = vmul.f32 0.7978846, %v4025_v24  ;;  %v4027_v14 = vadd.f32 %v4009_v44, %v7671_v25  ;;  %v4000_v23 = vmul.f32 %v3982_v37, %v7721_v52  ;;  %v4287_v44 = vld [vmem:[%s6297_s20 + $0x5c0] sm:$0xff] }
 0xde0   : > { %v3994_v51 = vmul.f32 %v3976_v0, %v7775_v35  ;;  %6030 = vtanh.f32 %v4046_v42  ;;  %v4006_v45 = vmul.f32 %v3988_v20, %v7745_v40  ;;  %v4005_v57 = vmul.f32 %v3987_v54, %v7738_v63 }
 0xde1   : > { %v6019_v43 = vpop.eup %6018  ;;  %5757 = vmatpush1.bf16.msra.mxu1 %v5756_v41  ;;  %v7970_v5 = vpack.c.bf16 %v7687_v60, %v7676_v4  ;;  %6032 = vtanh.f32 %v4043_v39  ;;  %v4045_v55 = vmul.f32 0.7978846, %v4027_v14  ;;  %v4018_v50 = vadd.f32 %v4000_v23, %v7721_v52 }
 0xde2   : > { %v6021_v12 = vpop.eup %6020  ;;  %v4074_v11 = vadd.f32 1.0, %v6019_v43  ;;  %v3993_v3 = vmul.f32 %v3975_v29, %v7772_v27  ;;  %v4024_v13 = vadd.f32 %v4006_v45, %v7745_v40  ;;  %v4023_v41 = vadd.f32 %v4005_v57, %v7738_v63  ;;  %v4289_v29 = vld [vmem:[%s6297_s20 + $0x5d0] sm:$0xff]  ;;  %v4291_v45 = vld [vmem:[%s6297_s20 + $0x5e0] sm:$0xff] }
 0xde3   : > { %5759 = vmatprep.subr.bf16.mxu1 %v7970_v5  ;;  %v6023_v48 = vpop.eup %6022  ;;  %v4076_v2 = vadd.f32 1.0, %v6021_v12  ;;  %6034 = vtanh.f32 %v4045_v55  ;;  %v4036_v4 = vmul.f32 0.7978846, %v4018_v50  ;;  %v7971_v37 = vpack.c.bf16 %v7693_v7, %v7690_v19  ;;  %v4292_v19 = vld [vmem:[%s6297_s20 + $0x5e8] sm:$0xff]  ;;  %v4294_v7 = vld [vmem:[%s6297_s20 + $0x5f8] sm:$0xff]  ;;  %v4293_v57 = vld [vmem:[%s6297_s20 + $0x5f0] sm:$0xff]  ;;  %s7973_s20 = scalar_lea.vmem %s7915_s15, %s6228_s19 }
 0xde4   : > { %v4092_v18 = vmul.f32 %v4074_v11, %v3948_v58  ;;  %v4073_v59 = vadd.f32 1.0, %v6023_v48  ;;  %v6025_v60 = vpop.eup %6024  ;;  %v4042_v56 = vmul.f32 0.7978846, %v4024_v13  ;;  %v4041_v54 = vmul.f32 0.7978846, %v4023_v41  ;;  %s7974_s19 = sld [smem:[#allocation2_spill]] }
 0xde5   : > { %5761 = vmatpush1.bf16.msra.mxu1 %v7971_v37  ;;  %v4094_v9 = vmul.f32 %v4076_v2, %v3950_v26  ;;  %v4012_v20 = vmul.f32 %v3994_v51, %v7775_v35  ;;  %v7972_v0 = vpack.c.bf16 %v7705_v30, %v7702_v15  ;;  %v3949_v58 = vmul.f32 0.5, %v7610_v16 }
 0xde6   : > { %4365 = vmatprep.mubr.f32.mxu0 %v4092_v18  ;;  %v4091_v21 = vmul.f32 %v4073_v59, %v3947_v34  ;;  %v4075_v24 = vadd.f32 1.0, %v6025_v60  ;;  %6036 = vtanh.f32 %v4036_v4  ;;  %v4011_v42 = vmul.f32 %v3993_v3, %v7772_v27 }
 0xde7   : > { %5763 = vmatprep.subr.bf16.mxu1 %v7972_v0  ;;  %4448 = vmatprep.mubr.f32.mxu1 %v4094_v9  ;;  %6038 = vtanh.f32 %v4042_v56  ;;  %v4030_v26 = vadd.f32 %v4012_v20, %v7775_v35  ;;  %v5768_v16 = vpack.c.bf16 %v4289_v29, %v4287_v44  ;;  %v3954_v23 = vmul.f32 0.5, %v7681_v36 }
 0xde8   : > { %4366 = vmatmul.mubr.f32.gmra.mrb[72].mxu0 %v4091_v21  ;;  %v4093_v15 = vmul.f32 %v4075_v24, %v3949_v58  ;;  %6040 = vtanh.f32 %v4041_v54  ;;  %v6027_v30 = vpop.eup %6026  ;;  %v4029_v39 = vadd.f32 %v4011_v42, %v7772_v27  ;;  %v5770_v51 = vpack.c.bf16 %v4294_v7, %v4292_v19 }
 0xde9   : > { %5765 = vmatpush1.bf16.msra.mxu1 %v5764_v61  ;;  %v4048_v34 = vmul.f32 0.7978846, %v4030_v26  ;;  %v6029_v14 = vpop.eup %6028  ;;  %v4080_v43 = vadd.f32 1.0, %v6027_v30  ;;  %v3956_v5 = vmul.f32 0.5, %v7684_v22  ;;  %v3953_v55 = vmul.f32 0.5, %v7668_v46 }
 0xdea   : > { %4449 = vmatmul.mubr.f32.gmra.mrb[46].mxu1 %v4093_v15  ;;  %5767 = vmatprep.subr.bf16.mxu1 %v5766_v49  ;;  %v6031_v12 = vpop.eup %6030  ;;  %v4047_v53 = vmul.f32 0.7978846, %v4029_v39  ;;  %v5772_v8 = vpack.c.bf16 %v4293_v57, %v4291_v45  ;;  %v3955_v48 = vmul.f32 0.5, %v7671_v25  ;;  %v3946_v41 = vmul.f32 0.5, %v7721_v52  ;;  %p4961_p8 = scmp.ne.s32.totalorder %s7974_s19, 11 }
 0xdeb   : > { %6042 = vtanh.f32 %v4048_v34  ;;  %v6033_v10 = vpop.eup %6032  ;;  %v4098_v61 = vmul.f32 %v4080_v43, %v3954_v23  ;;  %v4082_v11 = vadd.f32 1.0, %v6031_v12  ;;  %v4071_v18 = vadd.f32 1.0, %v6029_v14  ;;  %s7975_s23 = sld [smem:[#allocation10_spill]] (!%p4961_p8) }
 0xdec   : > { %v4079_v50 = vadd.f32 1.0, %v6033_v10  ;;  %6044 = vtanh.f32 %v4047_v53  ;;  %v3952_v4 = vmul.f32 0.5, %v7745_v40  ;;  %v3945_v37 = vmul.f32 0.5, %v7712_v1 }
 0xded   : > { %5769 = vmatpush1.bf16.msra.mxu1 %v5768_v16  ;;  %v6035_v62 = vpop.eup %6034  ;;  %4371 = vmatprep.mubr.f32.mxu0 %v4098_v61  ;;  %v4100_v36 = vmul.f32 %v4082_v11, %v3956_v5  ;;  %v3958_v0 = vmul.f32 0.5, %v7775_v35  ;;  %v3951_v52 = vmul.f32 0.5, %v7738_v63  ;;  %v3957_v1 = vmul.f32 0.5, %v7772_v27  ;;  %v4550_v63 = vld [vmem:[%s7973_s20] sm:$0x3] }
 0xdee   : > { %5771 = vmatprep.subr.bf16.mxu1 %v5770_v51  ;;  %v4097_v49 = vmul.f32 %v4079_v50, %v3953_v55  ;;  %v4081_v3 = vadd.f32 1.0, %v6035_v62  ;;  %v4089_v54 = vmul.f32 %v4071_v18, %v3945_v37  ;;  %v4555_v27 = vrot.slane %v4550_v63, %v6498_v33 }
 0xdef   : > { %4454 = vmatprep.mubr.f32.mxu1 %v4100_v36  ;;  %v4559_v14 = vrot.slane %v4550_v63, %v6495_v32  ;;  %v6100_v36 = vmov (!%p4961_p8), 0  }
 0xdf0   : > { %v6037_v2 = vpop.eup %6036  ;;  %4372 = vmatmul.mubr.f32.gmra.mrb[74].mxu0 %v4097_v49  ;;  %v4099_v22 = vmul.f32 %v4081_v3, %v3955_v48  ;;  %6052 = vset.pattern.permute.xlu0 (!%p4961_p8), %v6100_v36 }
 0xdf1   : > { %v6039_v13 = vpop.eup %6038  ;;  %5773 = vmatpush1.bf16.msra.mxu1 %v5772_v8  ;;  %v4072_v46 = vadd.f32 1.0, %v6037_v2  ;;  %6053 = vset.pattern.permute.xlu1 (!%p4961_p8), %v6100_v36 }
 0xdf2   : > { %v6041_v59 = vpop.eup %6040  ;;  %v4078_v60 = vadd.f32 1.0, %v6039_v13  ;;  %4455 = vmatmul.mubr.f32.gmra.mrb[48].mxu1 %v4099_v22 }
 0xdf3   : > { %v4090_v9 = vmul.f32 %v4072_v46, %v3946_v41  ;;  %v4077_v20 = vadd.f32 1.0, %v6041_v59 }
 0xdf4   : > { %v4096_v25 = vmul.f32 %v4078_v60, %v3952_v4 }
 0xdf5   : > { %v6043_v56 = vpop.eup %6042  ;;  %4525 = vmatprep.mubr.f32.mxu1 %v4090_v9  ;;  %v4095_v24 = vmul.f32 %v4077_v20, %v3951_v52 }
 0xdf6   : > { %v4084_v21 = vadd.f32 1.0, %v6043_v56  ;;  %v6045_v58 = vpop.eup %6044  ;;  %4526 = vmatmul.mubr.f32.vlgmr.msra.gmra.mrb[44].mxu1 %v4089_v54 }
 0xdf7   : > { %4531 = vmatprep.mubr.f32.mxu1 %v4096_v25  ;;  %v4083_v44 = vadd.f32 1.0, %v6045_v58 }
 0xdf8   : > { %v4102_v40 = vmul.f32 %v4084_v21, %v3958_v0 }
 0xdf9   : > { %v4101_v29 = vmul.f32 %v4083_v44, %v3957_v1 }
 0xdfa   : > { %4532 = vmatmul.mubr.f32.gmra.mrb[46].mxu1 %v4095_v24 }
 0xdfb   : > { %4537 = vmatprep.mubr.f32.mxu1 %v4102_v40 }
 0xdfe   : > { %4538 = vmatmul.mubr.f32.gmra.mrb[48].mxu1 %v4101_v29 }
 0xe86   : > { %v4361_v19 = vpop.f32.mrb[70].mxu0 }
 0xe87   : > { %v4363_v7 = vpop.f32.mrb[71].mxu0 }
 0xebb   : > { %v4367_v26 = vpop.f32.mrb[72].mxu0 }
 0xebc   : > { %v4369_v35 = vpop.f32.mrb[73].mxu0 }
 0xec3   : > { %v4373_v42 = vpop.f32.mrb[74].mxu0 }
 0xec4   : > { %v4375_v15 = vpop.f32.mrb[75].mxu0 }
 0xec9   : > { %v4527_v30 = vpop.f32.mrb[44].mxu1 }
 0xeca   : > { %v5784_v16 = vadd.f32 %v4527_v30, %v4361_v19  ;;  %v4529_v34 = vpop.f32.mrb[45].mxu1 }
 0xecb   : > { %v5785_v39 = vadd.f32 %v4529_v34, %v4363_v7 }
 0xecc   : > { %v4544_v23 = vadd.f32 %v5784_v16, %v7131_v17 }
 0xecd   : > { %v4545_v43 = vadd.f32 %v5785_v39, %v7129_v47  ;;  %v4533_v51 = vpop.f32.mrb[46].mxu1 }
 0xece   : > { %v4562_v45 = vadd.f32 %v4555_v27, %v4544_v23  ;;  %v5786_v57 = vadd.f32 %v4533_v51, %v4367_v26  ;;  %v4535_v12 = vpop.f32.mrb[47].mxu1 }
 0xecf   : > { %v4563_v53 = vadd.f32 %v4559_v14, %v4545_v43  ;;  %v5787_v10 = vadd.f32 %v4535_v12, %v4369_v35 }
 0xed0   : > { %4568 = vst [vmem:[%s6292_s7] sm:$0xff] %v4562_v45  ;;  %v4546_v33 = vadd.f32 %v5786_v57, %v7142_v38 }
 0xed1   : > { %4569 = vst.msk [vmem:[%s6292_s7 + $0x8] sm:$0xff] %vm823_vm2, %v4563_v53  ;;  %v4547_v32 = vadd.f32 %v5787_v10, %v7139_v31  ;;  %v4539_v17 = vpop.f32.mrb[48].mxu1  ;;  %v4584_v31 = vld [vmem:[%s7975_s23] sm:$0xff] (!%p4961_p8) }
 0xed2   : > { %v4564_v61 = vadd.f32 %v4555_v27, %v4546_v33  ;;  %v5788_v47 = vadd.f32 %v4539_v17, %v4373_v42  ;;  %v4541_v5 = vpop.f32.mrb[49].mxu1  ;;  %4589 = vperm.xlu0 (!%p4961_p8), %6052, %v4584_v31  }
 0xed3   : > { %v4565_v11 = vadd.f32 %v4559_v14, %v4547_v32  ;;  %v5789_v55 = vadd.f32 %v4541_v5, %v4375_v15  ;;  %4577 = sbr.rel (%p4961_p8) target bundleno = 3929 (0xf59), region = 92 }
 0xed4   : > { %4570 = vst [vmem:[%s6292_s7 + $0x10] sm:$0xff] %v4564_v61  ;;  %v4548_v50 = vadd.f32 %v5788_v47, %v7146_v6  ;;  %v4586_v6 = vld [vmem:[%s7975_s23 + $0x10] sm:$0xf] (!%p4961_p8) }
 0xed5   : > { %4571 = vst.msk [vmem:[%s6292_s7 + $0x18] sm:$0xff] %vm823_vm2, %v4565_v11  ;;  %v4549_v8 = vadd.f32 %v5789_v55, %v7149_v28  ;;  %4599 = vperm.xlu1 (!%p4961_p8), %6053, %v4586_v6   ;;  %v4585_v28 = vld [vmem:[%s7975_s23 + $0x8] sm:$0xff] (!%p4961_p8) }
 0xed6   : > { %v4566_v62 = vadd.f32 %v4555_v27, %v4548_v50  ;;  %4594 = vperm.xlu0 (!%p4961_p8), %6052, %v4585_v28  }
 0xed7   : > { %v4567_v38 = vadd.f32 %v4559_v14, %v4549_v8  ;;  %v4578_v49 = vld [vmem:[%s6292_s7] sm:$0xff] (!%p4961_p8) }
 0xed8   : > { %4572 = vst [vmem:[%s6292_s7 + $0x20] sm:$0xf] %v4566_v62  ;;  %v4579_v48 = vld [vmem:[%s6292_s7 + $0x8] sm:$0xff] (!%p4961_p8) }
 0xed9   : > { %4573 = vst.msk [vmem:[%s6292_s7 + $0x28] sm:$0xf] %vm834_vm4, %v4567_v38 }
 0xedb   : > { %v4580_v4 = vld [vmem:[%s6292_s7 + $0x10] sm:$0xff] }
 0xedc   : > { %v4581_v60 = vld [vmem:[%s6292_s7 + $0x18] sm:$0xff] }
 0xedf   : > { %v4582_v3 = vld [vmem:[%s6292_s7 + $0x20] sm:$0xf] }
 0xee0   : > { %v4583_v2 = vld [vmem:[%s6292_s7 + $0x28] sm:$0xf] }
 0xf51   : > { %v4590_v13 = vpop.permute.xlu0 %4589 }
 0xf52   : > { %v4602_v41 = vmul.f32 %v4590_v13, %v4578_v49  ;;  %v4603_v46 = vmul.f32 %v4590_v13, %v4579_v48 }
 0xf54   : > { %v4600_v22 = vpop.permute.xlu1 %4599  ;;  %4608 = vst [vmem:[%s6292_s7] sm:$0xff] %v4602_v41  ;;  %4609 = vst.msk [vmem:[%s6292_s7 + $0x8] sm:$0xff] %vm823_vm2, %v4603_v46 }
 0xf55   : > { %v4606_v18 = vmul.f32 %v4600_v22, %v4582_v3  ;;  %v4607_v59 = vmul.f32 %v4600_v22, %v4583_v2  ;;  %v4595_v37 = vpop.permute.xlu0 %4594 }
 0xf56   : > { %v4604_v9 = vmul.f32 %v4595_v37, %v4580_v4  ;;  %v4605_v25 = vmul.f32 %v4595_v37, %v4581_v60 }
 0xf57   : > { %4612 = vst [vmem:[%s6292_s7 + $0x20] sm:$0xf] %v4606_v18  ;;  %4613 = vst.msk [vmem:[%s6292_s7 + $0x28] sm:$0xf] %vm834_vm4, %v4607_v59 }
 0xf58   : > { %4610 = vst [vmem:[%s6292_s7 + $0x10] sm:$0xff] %v4604_v9  ;;  %4611 = vst.msk [vmem:[%s6292_s7 + $0x18] sm:$0xff] %vm823_vm2, %v4605_v25 }
 0xf59 PF: > { %s7976_s30 = sld [smem:[#allocation5_spill]]  ;;  %s7977_s21 = sld [smem:[#allocation3_spill]] }
 0xf5a   : > { %s7978_s22 = sld [smem:[#allocation4_spill]]  ;;  %s7979_s23 = sld [smem:[#allocation6_spill]] }
 0xf5b   : > { %s7980_s24 = sld [smem:[#allocation7_spill]] }
 0xf5f   : > { %s26_s25 = sadd.s32 1, %s7976_s30  }
 0xf60   : > { %p23_p9 = scmp.ge.s32.totalorder %s26_s25, 26  }
 0xf62   :  { %25 = sbr.rel (!%p23_p9) target bundleno = 12 (0xc), region = 164 }

</bundles_post_ra>
